<compile_context>
chip_gen: v7x
topology: tpu7x:2x2x1
jax: 0.10.0
libtpu: 0.0.40
codegen_flags: <defaults>
</compile_context>

<pallas_src>
import functools
import numpy as np
import jax
import jax.numpy as jnp
from jax import lax
from jax.experimental import pallas as pl
from jax.experimental.pallas import tpu as pltpu


# ----------------------- small synthetic config ---------------------------------
class CFG:
    seed = 42
    vocab_size = 100
    hidden_size = 32          # stand-in for config.hidden_size
    num_layers = 4            # hidden_states has num_layers + 1 entries
    num_heads = 4
    intermediate_size = 64
    initializer_range = 0.02
    max_len = 8               # seq length
    batch = 2
    num_tag = 15


H = CFG.hidden_size
NH = CFG.num_heads
DH = H // NH
I_SZ = CFG.intermediate_size
L = CFG.num_layers
NUM_TAG = CFG.num_tag
CPAD = 128                    # class dim lane-padded 15 -> 128
LN_EPS = 1e-7
ATTN_SCALE = 1.0 / float(np.sqrt(DH))
NEG_INF = -1e30


# ----------------------- shared math (used in-kernel and in reference) ------------

def _ln(x, g, b):
    mu = jnp.mean(x, axis=-1, keepdims=True)
    var = jnp.mean((x - mu) ** 2, axis=-1, keepdims=True)
    return (x - mu) * lax.rsqrt(var + LN_EPS) * g + b


def _gelu_tanh(x):
    c = 0.7978845608028654  # sqrt(2/pi)
    return 0.5 * x * (1.0 + jnp.tanh(c * (x + 0.044715 * x * x * x)))


# ----------------------- fused encoder + head + loss kernel -----------------------

def _layer_fwd(x, bias3, wqkv_ref, wo_ref, w1_ref, w2_ref, vecs_ref, l):
    """One transformer encoder layer on the (S, H) rows of one batch item."""
    S = x.shape[0]
    wqkv = wqkv_ref[l]                           # (H, 3H)
    wo = wo_ref[l]                               # (H, H)
    w1 = w1_ref[l]                               # (H, I)
    w2 = w2_ref[l]                               # (I, H)
    vec = vecs_ref[l]                            # (8, 128) packed 1-row params
    bqkv = vec[0:1, :3 * H]
    bo = vec[1:2, :H]
    ln1g, ln1b = vec[2:3, :H], vec[3:4, :H]
    b1 = vec[4:5, :I_SZ]
    b2 = vec[5:6, :H]
    ln2g, ln2b = vec[6:7, :H], vec[7:8, :H]

    # Fused QKV projection: one lane-dense (S, H) @ (H, 3H) matmul.
    qkv = jnp.dot(x, wqkv, preferred_element_type=jnp.float32) + bqkv   # (S, 3H)

    # Head-batched attention: build (NH, S, DH) via leading-dim concat (no
    # in-kernel transposes) and run two batched dot_generals.
    def split_heads(off):
        return jnp.concatenate(
            [qkv[:, off + h * DH: off + (h + 1) * DH].reshape(1, S, DH)
             for h in range(NH)], axis=0)                               # (NH, S, DH)

    q = split_heads(0)
    k = split_heads(H)
    v = split_heads(2 * H)
    s = jnp.einsum('hqd,hkd->hqk', q, k,
                   preferred_element_type=jnp.float32) * ATTN_SCALE + bias3
    s = s - jnp.max(s, axis=-1, keepdims=True)
    p = jnp.exp(s)
    p = p * pl.reciprocal(jnp.sum(p, axis=-1, keepdims=True), approx=True)
    ctx = jnp.einsum('hqk,hkd->hqd', p, v,
                     preferred_element_type=jnp.float32)                # (NH, S, DH)

    # Output projection folded per head (sublane-aligned wo row slices): avoids
    # re-assembling ctx with lane-offset masked stores.
    attn = bo
    for h in range(NH):
        attn = attn + jnp.dot(ctx[h], wo[h * DH:(h + 1) * DH, :],
                              preferred_element_type=jnp.float32)

    x = _ln(x + attn, ln1g, ln1b)
    ff = _gelu_tanh(jnp.dot(x, w1, preferred_element_type=jnp.float32) + b1)
    ff = jnp.dot(ff, w2, preferred_element_type=jnp.float32) + b2
    return _ln(x + ff, ln2g, ln2b)


def _forward_logits(x0_ref, bias_ref, wqkv_ref, wo_ref, w1_ref, w2_ref,
                    vecs_ref, fcw_ref, fcb_ref):
    """Embeddings-in -> padded (S, 128) logits, all layers unrolled in-kernel."""
    x = x0_ref[...]                                   # (S, H)
    bias3 = bias_ref[...].reshape(1, 1, -1)           # (1, 1, S) additive mask
    hs = [x]                                          # hidden_states incl. embeddings
    for l in range(L):
        x = _layer_fwd(x, bias3, wqkv_ref, wo_ref, w1_ref, w2_ref, vecs_ref, l)
        hs.append(x)
    cat = jnp.concatenate(hs[-4:], axis=-1)           # (S, 4H = 128) lane-dense
    return (jnp.dot(cat, fcw_ref[...], preferred_element_type=jnp.float32)
            + fcb_ref[...])                           # (S, 128) lane-dense


def _tag_kernel(x0_ref, bias_ref, wqkv_ref, wo_ref, w1_ref, w2_ref,
                vecs_ref, fcw_ref, fcb_ref, tag_ref):
    tag_ref[...] = _forward_logits(x0_ref, bias_ref, wqkv_ref, wo_ref, w1_ref,
                                   w2_ref, vecs_ref, fcw_ref, fcb_ref)


def _tag_loss_kernel(x0_ref, bias_ref, wqkv_ref, wo_ref, w1_ref, w2_ref,
                     vecs_ref, fcw_ref, fcb_ref, tgt_ref, msk_ref,
                     tag_ref, loss_ref):
    logits = _forward_logits(x0_ref, bias_ref, wqkv_ref, wo_ref, w1_ref,
                             w2_ref, vecs_ref, fcw_ref, fcb_ref)
    tag_ref[...] = logits                             # (S, 128) lane-dense store

    # masked CE over the 15 real classes (padded classes masked to -inf)
    cls = lax.broadcasted_iota(jnp.int32, logits.shape, 1)
    safe = jnp.where(cls < NUM_TAG, logits, NEG_INF)
    m = jnp.max(safe, axis=-1, keepdims=True)
    lse = m + jnp.log(jnp.sum(jnp.exp(safe - m), axis=-1, keepdims=True))
    picked = jnp.sum(jnp.where(cls == tgt_ref[...], logits, 0.0),
                     axis=-1, keepdims=True)
    per_tok = (lse - picked) * msk_ref[...]           # (S, 1)
    # per-batch partial sum; exact global divide happens in the wrapper
    loss_ref[...] = jnp.sum(per_tok, axis=(0, 1), keepdims=True)


def _entity_pallas(x, bias, stacked, fcw, fcb, target_tag=None, mask=None):
    B, S, _ = x.shape
    bias3 = bias.reshape(B, 1, S)

    def bspec(shape):
        return pl.BlockSpec((None,) + shape, lambda b, _s=shape: (b,) + (0,) * len(_s))

    def full(shape):
        return pl.BlockSpec(shape, lambda b, _s=shape: (0,) * len(_s))

    weight_specs = [
        full((L, H, 3 * H)),        # wqkv
        full((L, H, H)),            # wo
        full((L, H, I_SZ)),         # w1
        full((L, I_SZ, H)),         # w2
        full((L, 8, 128)),          # packed per-layer 1-row params
        full((4 * H, CPAD)),        # fc weight (padded)
        full((1, CPAD)),            # fc bias (padded)
    ]
    common_in = [bspec((S, H)), bspec((1, S))] + weight_specs
    cp = pltpu.CompilerParams(dimension_semantics=("parallel",))   # 2 TCs on v7x

    if target_tag is None:
        tag = pl.pallas_call(
            _tag_kernel,
            grid=(B,),
            in_specs=common_in,
            out_specs=pl.BlockSpec((None, S, CPAD), lambda b: (b, 0, 0)),
            out_shape=jax.ShapeDtypeStruct((B, S, CPAD), jnp.float32),
            compiler_params=cp,
        )(x, bias3, *stacked, fcw, fcb)
        return tag[:, :, :NUM_TAG]

    tgt = target_tag.reshape(B, S, 1).astype(jnp.int32)
    msk = mask.reshape(B, S, 1).astype(jnp.float32)
    tag, part = pl.pallas_call(
        _tag_loss_kernel,
        grid=(B,),
        in_specs=common_in + [bspec((S, 1)), bspec((S, 1))],
        out_specs=(pl.BlockSpec((None, S, CPAD), lambda b: (b, 0, 0)),
                   pl.BlockSpec((None, 1, 1), lambda b: (b, 0, 0))),
        out_shape=(jax.ShapeDtypeStruct((B, S, CPAD), jnp.float32),
                   jax.ShapeDtypeStruct((B, 1, 1), jnp.float32)),
        compiler_params=cp,
    )(x, bias3, *stacked, fcw, fcb, tgt, msk)
    loss = jnp.sum(part) / jnp.maximum(jnp.sum(msk), 1.0)   # exact final divide
    return tag[:, :, :NUM_TAG], loss


# ----------------------- glue ------------------------------------------------------

def _stack_layer_params(layers):
    def st(fn):
        return jnp.stack([fn(lp) for lp in layers], axis=0)

    def pad_row(v):
        v = v.reshape(-1)
        return jnp.pad(v, (0, 128 - v.shape[0]))

    wqkv = st(lambda lp: jnp.concatenate([lp['wq'], lp['wk'], lp['wv']], axis=1))
    wo = st(lambda lp: lp['wo'])
    w1 = st(lambda lp: lp['w1'])
    w2 = st(lambda lp: lp['w2'])
    vecs = st(lambda lp: jnp.stack([
        pad_row(jnp.concatenate([lp['bq'], lp['bk'], lp['bv']])),   # row 0: bqkv
        pad_row(lp['bo']),                                          # row 1
        pad_row(lp['ln1_g']), pad_row(lp['ln1_b']),                 # rows 2,3
        pad_row(lp['b1']), pad_row(lp['b2']),                       # rows 4,5
        pad_row(lp['ln2_g']), pad_row(lp['ln2_b']),                 # rows 6,7
    ], axis=0))                                                     # (L, 8, 128)
    return wqkv, wo, w1, w2, vecs


def _ref_layer(x, bias, lp):
    # pure-JAX reference for one encoder layer
    B, S, _ = x.shape
    q = x @ lp['wq'] + lp['bq']
    k = x @ lp['wk'] + lp['bk']
    v = x @ lp['wv'] + lp['bv']

    def split(t):
        return t.reshape(B, S, NH, DH).transpose(0, 2, 1, 3)

    qh, kh, vh = split(q), split(k), split(v)
    s = jnp.einsum('bhqd,bhkd->bhqk', qh, kh) * ATTN_SCALE + bias[:, None, None, :]
    p = jax.nn.softmax(s, axis=-1)
    ctx = jnp.einsum('bhqk,bhkd->bhqd', p, vh)
    ctx = ctx.transpose(0, 2, 1, 3).reshape(B, S, H)

    attn_out = ctx @ lp['wo'] + lp['bo']
    x = _ln(x + attn_out, lp['ln1_g'], lp['ln1_b'])
    ff = _gelu_tanh(x @ lp['w1'] + lp['b1'])
    ff = ff @ lp['w2'] + lp['b2']
    return _ln(x + ff, lp['ln2_g'], lp['ln2_b'])


def entity_model_forward(params, ids, mask, target_tag=None, use_pallas=True):
    B, S = ids.shape

    # embeddings (gather stays in XLA) + LN
    # TODO(synk): embedding gather has no clean tiny-Pallas equivalent; left in XLA.
    emb = params['word_emb'][ids] + params['pos_emb'][None, :S, :]
    x = _ln(emb, params['emb_ln_g'], params['emb_ln_b'])          # (B, S, H)
    bias = (1.0 - mask.astype(jnp.float32)) * -1e9                # (B, S)

    if use_pallas:
        stacked = _stack_layer_params(params['layers'])
        fcw = jnp.zeros((4 * H, CPAD), jnp.float32).at[:, :NUM_TAG].set(params['fc_w'].T)
        fcb = jnp.zeros((1, CPAD), jnp.float32).at[:, :NUM_TAG].set(params['fc_b'][None, :])
        return _entity_pallas(x, bias, stacked, fcw, fcb, target_tag, mask)

    # pure-JAX reference path
    hidden_states = [x]
    xc = x
    for lp in params['layers']:
        xc = _ref_layer(xc, bias, lp)
        hidden_states.append(xc)
    cat = jnp.concatenate([h.reshape(B * S, H) for h in hidden_states[-4:]], axis=-1)
    tag = (cat @ params['fc_w'].T + params['fc_b'][None, :]).reshape(B, S, -1)
    if target_tag is None:
        return tag
    logits = tag.reshape(B * S, -1)
    lse = jax.scipy.special.logsumexp(logits, axis=-1)
    picked = jnp.take_along_axis(logits, target_tag.reshape(B * S, 1), axis=-1)[:, 0]
    m = mask.reshape(B * S).astype(jnp.float32)
    per = (lse - picked) * m
    loss = jnp.sum(per) / jnp.maximum(jnp.sum(m), 1.0)
    return tag, loss


# ----------------------- deterministic parameter init ----------------------------

def init_params(key):
    keys = iter(jax.random.split(key, 64))
    std = CFG.initializer_range
    V, S = CFG.vocab_size, CFG.max_len

    def normal(shape):
        return jax.random.normal(next(keys), shape, jnp.float32) * std

    params = {
        'word_emb': normal((V, H)),
        'pos_emb': normal((S, H)),
        'emb_ln_g': jnp.ones((H,), jnp.float32),
        'emb_ln_b': jnp.zeros((H,), jnp.float32),
        'layers': [],
        # fc = nn.Linear(hidden*4, num_tag): weight ~ N(0, initializer_range), bias = 0
        'fc_w': normal((CFG.num_tag, 4 * H)),
        'fc_b': jnp.zeros((CFG.num_tag,), jnp.float32),
    }
    for _ in range(CFG.num_layers):
        lp = {
            'wq': normal((H, H)), 'bq': jnp.zeros((H,), jnp.float32),
            'wk': normal((H, H)), 'bk': jnp.zeros((H,), jnp.float32),
            'wv': normal((H, H)), 'bv': jnp.zeros((H,), jnp.float32),
            'wo': normal((H, H)), 'bo': jnp.zeros((H,), jnp.float32),
            'ln1_g': jnp.ones((H,), jnp.float32), 'ln1_b': jnp.zeros((H,), jnp.float32),
            'w1': normal((H, I_SZ)), 'b1': jnp.zeros((I_SZ,), jnp.float32),
            'w2': normal((I_SZ, H)), 'b2': jnp.zeros((H,), jnp.float32),
            'ln2_g': jnp.ones((H,), jnp.float32), 'ln2_b': jnp.zeros((H,), jnp.float32),
        }
        params['layers'].append(lp)
    return params


# ----------------------- main -----------------------------------------------------

if __name__ == "__main__":
    key = jax.random.PRNGKey(0)
    pkey, ikey, tkey = jax.random.split(key, 3)
    params = init_params(pkey)

    B, S = CFG.batch, CFG.max_len
    ids = jax.random.randint(ikey, (B, S), 0, CFG.vocab_size, dtype=jnp.int32)
    # attention mask: sequence 0 full, sequence 1 padded at the tail
    mask = jnp.array([[1] * S, [1] * (S - 3) + [0] * 3], dtype=jnp.int32)
    target_tag = jax.random.randint(tkey, (B, S), 0, CFG.num_tag, dtype=jnp.int32)

    fwd = jax.jit(functools.partial(entity_model_forward, use_pallas=True))
    tag, loss = fwd(params, ids, mask, target_tag)
    tag = jax.block_until_ready(tag)
    loss = jax.block_until_ready(loss)

    # no-target path (tag only), also fully in the fused kernel
    fwd_tag = jax.jit(functools.partial(entity_model_forward, use_pallas=True))
    tag_only = jax.block_until_ready(fwd_tag(params, ids, mask))

    # pure-JAX reference check of the Pallas paths
    tag_ref, loss_ref = entity_model_forward(params, ids, mask, target_tag,
                                             use_pallas=False)
    np.testing.assert_allclose(np.asarray(tag), np.asarray(tag_ref),
                               rtol=2e-2, atol=2e-2)
    np.testing.assert_allclose(np.asarray(tag_only), np.asarray(tag_ref),
                               rtol=2e-2, atol=2e-2)
    np.testing.assert_allclose(np.asarray(loss), np.asarray(loss_ref),
                               rtol=2e-2, atol=2e-2)
    assert np.isfinite(np.asarray(loss)).all()

    print("KERNEL_OK")
</pallas_src>

<mosaic_0001>
module attributes {stable_mosaic.version = 11 : i64} {
  func.func @_tag_loss_kernel(%arg0: i32, %arg1: memref<1x8x32xf32, #tpu.memory_space<vmem>>, %arg2: memref<1x1x8xf32, #tpu.memory_space<vmem>>, %arg3: memref<4x32x96xf32, #tpu.memory_space<vmem>>, %arg4: memref<4x32x32xf32, #tpu.memory_space<vmem>>, %arg5: memref<4x32x64xf32, #tpu.memory_space<vmem>>, %arg6: memref<4x64x32xf32, #tpu.memory_space<vmem>>, %arg7: memref<4x8x128xf32, #tpu.memory_space<vmem>>, %arg8: memref<128x128xf32, #tpu.memory_space<vmem>>, %arg9: memref<1x128xf32, #tpu.memory_space<vmem>>, %arg10: memref<1x8x1xi32, #tpu.memory_space<vmem>>, %arg11: memref<1x8x1xf32, #tpu.memory_space<vmem>>, %arg12: memref<1x8x128xf32, #tpu.memory_space<vmem>>, %arg13: memref<1x1x1xf32, #tpu.memory_space<vmem>>) attributes {dimension_semantics = [#tpu.dimension_semantics<parallel>], iteration_bounds = array<i64: 2>, scalar_prefetch = 0 : i64, scratch_operands = 0 : i64, tpu.core_type = #tpu.core_type<tc>, window_params = [{transform_indices = @transform_0, window_bounds = array<i64: 1, 8, 32>}, {transform_indices = @transform_1, window_bounds = array<i64: 1, 1, 8>}, {pipeline_mode = #tpu.pipeline_mode<synchronous>, transform_indices = @transform_2, window_bounds = array<i64: 4, 32, 96>}, {pipeline_mode = #tpu.pipeline_mode<synchronous>, transform_indices = @transform_3, window_bounds = array<i64: 4, 32, 32>}, {pipeline_mode = #tpu.pipeline_mode<synchronous>, transform_indices = @transform_4, window_bounds = array<i64: 4, 32, 64>}, {pipeline_mode = #tpu.pipeline_mode<synchronous>, transform_indices = @transform_5, window_bounds = array<i64: 4, 64, 32>}, {pipeline_mode = #tpu.pipeline_mode<synchronous>, transform_indices = @transform_6, window_bounds = array<i64: 4, 8, 128>}, {pipeline_mode = #tpu.pipeline_mode<synchronous>, transform_indices = @transform_7, window_bounds = array<i64: 128, 128>}, {pipeline_mode = #tpu.pipeline_mode<synchronous>, transform_indices = @transform_8, window_bounds = array<i64: 1, 128>}, {transform_indices = @transform_9, window_bounds = array<i64: 1, 8, 1>}, {transform_indices = @transform_10, window_bounds = array<i64: 1, 8, 1>}, {transform_indices = @transform_11, window_bounds = array<i64: 1, 8, 128>}, {transform_indices = @transform_12, window_bounds = array<i64: 1, 1, 1>}]} {
    %c0 = arith.constant 0 : index
    %c0_0 = arith.constant 0 : index
    %c0_1 = arith.constant 0 : index
    %0 = vector.load %arg1[%c0, %c0_0, %c0_1] : memref<1x8x32xf32, #tpu.memory_space<vmem>>, vector<1x8x32xf32>
    %1 = vector.shape_cast %0 : vector<1x8x32xf32> to vector<8x32xf32>
    %c0_2 = arith.constant 0 : index
    %c0_3 = arith.constant 0 : index
    %c0_4 = arith.constant 0 : index
    %2 = vector.load %arg2[%c0_2, %c0_3, %c0_4] : memref<1x1x8xf32, #tpu.memory_space<vmem>>, vector<1x1x8xf32>
    %3 = vector.shape_cast %2 : vector<1x1x8xf32> to vector<1x8xf32>
    %4 = vector.shape_cast %3 : vector<1x8xf32> to vector<1x1x8xf32>
    %c0_5 = arith.constant 0 : index
    %c0_6 = arith.constant 0 : index
    %c0_7 = arith.constant 0 : index
    %5 = vector.load %arg3[%c0_5, %c0_6, %c0_7] : memref<4x32x96xf32, #tpu.memory_space<vmem>>, vector<1x32x96xf32>
    %6 = vector.shape_cast %5 : vector<1x32x96xf32> to vector<32x96xf32>
    %c0_8 = arith.constant 0 : index
    %c0_9 = arith.constant 0 : index
    %c0_10 = arith.constant 0 : index
    %7 = vector.load %arg4[%c0_8, %c0_9, %c0_10] : memref<4x32x32xf32, #tpu.memory_space<vmem>>, vector<1x32x32xf32>
    %8 = vector.shape_cast %7 : vector<1x32x32xf32> to vector<32x32xf32>
    %c0_11 = arith.constant 0 : index
    %c0_12 = arith.constant 0 : index
    %c0_13 = arith.constant 0 : index
    %9 = vector.load %arg5[%c0_11, %c0_12, %c0_13] : memref<4x32x64xf32, #tpu.memory_space<vmem>>, vector<1x32x64xf32>
    %10 = vector.shape_cast %9 : vector<1x32x64xf32> to vector<32x64xf32>
    %c0_14 = arith.constant 0 : index
    %c0_15 = arith.constant 0 : index
    %c0_16 = arith.constant 0 : index
    %11 = vector.load %arg6[%c0_14, %c0_15, %c0_16] : memref<4x64x32xf32, #tpu.memory_space<vmem>>, vector<1x64x32xf32>
    %12 = vector.shape_cast %11 : vector<1x64x32xf32> to vector<64x32xf32>
    %c0_17 = arith.constant 0 : index
    %c0_18 = arith.constant 0 : index
    %c0_19 = arith.constant 0 : index
    %13 = vector.load %arg7[%c0_17, %c0_18, %c0_19] : memref<4x8x128xf32, #tpu.memory_space<vmem>>, vector<1x8x128xf32>
    %14 = vector.shape_cast %13 : vector<1x8x128xf32> to vector<8x128xf32>
    %15 = vector.extract_strided_slice %14 {offsets = [0, 0], sizes = [1, 96], strides = [1, 1]} : vector<8x128xf32> to vector<1x96xf32>
    %16 = vector.extract_strided_slice %14 {offsets = [1, 0], sizes = [1, 32], strides = [1, 1]} : vector<8x128xf32> to vector<1x32xf32>
    %17 = vector.extract_strided_slice %14 {offsets = [2, 0], sizes = [1, 32], strides = [1, 1]} : vector<8x128xf32> to vector<1x32xf32>
    %18 = vector.extract_strided_slice %14 {offsets = [3, 0], sizes = [1, 32], strides = [1, 1]} : vector<8x128xf32> to vector<1x32xf32>
    %19 = vector.extract_strided_slice %14 {offsets = [4, 0], sizes = [1, 64], strides = [1, 1]} : vector<8x128xf32> to vector<1x64xf32>
    %20 = vector.extract_strided_slice %14 {offsets = [5, 0], sizes = [1, 32], strides = [1, 1]} : vector<8x128xf32> to vector<1x32xf32>
    %21 = vector.extract_strided_slice %14 {offsets = [6, 0], sizes = [1, 32], strides = [1, 1]} : vector<8x128xf32> to vector<1x32xf32>
    %22 = vector.extract_strided_slice %14 {offsets = [7, 0], sizes = [1, 32], strides = [1, 1]} : vector<8x128xf32> to vector<1x32xf32>
    %cst = arith.constant dense<0.000000e+00> : vector<8x96xf32>
    %23 = tpu.matmul %1, %6, %cst {dimension_numbers = #tpu.dot_dimension_numbers<[1], [0], [0], [1], [0, 0, 1, 1], [], []>} : vector<8x32xf32>, vector<32x96xf32>, vector<8x96xf32> -> vector<8x96xf32>
    %24 = vector.broadcast %15 : vector<1x96xf32> to vector<8x96xf32>
    %25 = arith.addf %23, %24 : vector<8x96xf32>
    %26 = vector.extract_strided_slice %25 {offsets = [0, 0], sizes = [8, 8], strides = [1, 1]} : vector<8x96xf32> to vector<8x8xf32>
    %27 = vector.shape_cast %26 : vector<8x8xf32> to vector<1x8x8xf32>
    %28 = vector.extract_strided_slice %25 {offsets = [0, 8], sizes = [8, 8], strides = [1, 1]} : vector<8x96xf32> to vector<8x8xf32>
    %29 = vector.shape_cast %28 : vector<8x8xf32> to vector<1x8x8xf32>
    %30 = vector.extract_strided_slice %25 {offsets = [0, 16], sizes = [8, 8], strides = [1, 1]} : vector<8x96xf32> to vector<8x8xf32>
    %31 = vector.shape_cast %30 : vector<8x8xf32> to vector<1x8x8xf32>
    %32 = vector.extract_strided_slice %25 {offsets = [0, 24], sizes = [8, 8], strides = [1, 1]} : vector<8x96xf32> to vector<8x8xf32>
    %33 = vector.shape_cast %32 : vector<8x8xf32> to vector<1x8x8xf32>
    %34 = tpu.concatenate %27, %29, %31, %33 in 0 : vector<1x8x8xf32>, vector<1x8x8xf32>, vector<1x8x8xf32>, vector<1x8x8xf32> -> vector<4x8x8xf32>
    %35 = vector.extract_strided_slice %25 {offsets = [0, 32], sizes = [8, 8], strides = [1, 1]} : vector<8x96xf32> to vector<8x8xf32>
    %36 = vector.shape_cast %35 : vector<8x8xf32> to vector<1x8x8xf32>
    %37 = vector.extract_strided_slice %25 {offsets = [0, 40], sizes = [8, 8], strides = [1, 1]} : vector<8x96xf32> to vector<8x8xf32>
    %38 = vector.shape_cast %37 : vector<8x8xf32> to vector<1x8x8xf32>
    %39 = vector.extract_strided_slice %25 {offsets = [0, 48], sizes = [8, 8], strides = [1, 1]} : vector<8x96xf32> to vector<8x8xf32>
    %40 = vector.shape_cast %39 : vector<8x8xf32> to vector<1x8x8xf32>
    %41 = vector.extract_strided_slice %25 {offsets = [0, 56], sizes = [8, 8], strides = [1, 1]} : vector<8x96xf32> to vector<8x8xf32>
    %42 = vector.shape_cast %41 : vector<8x8xf32> to vector<1x8x8xf32>
    %43 = tpu.concatenate %36, %38, %40, %42 in 0 : vector<1x8x8xf32>, vector<1x8x8xf32>, vector<1x8x8xf32>, vector<1x8x8xf32> -> vector<4x8x8xf32>
    %44 = vector.extract_strided_slice %25 {offsets = [0, 64], sizes = [8, 8], strides = [1, 1]} : vector<8x96xf32> to vector<8x8xf32>
    %45 = vector.shape_cast %44 : vector<8x8xf32> to vector<1x8x8xf32>
    %46 = vector.extract_strided_slice %25 {offsets = [0, 72], sizes = [8, 8], strides = [1, 1]} : vector<8x96xf32> to vector<8x8xf32>
    %47 = vector.shape_cast %46 : vector<8x8xf32> to vector<1x8x8xf32>
    %48 = vector.extract_strided_slice %25 {offsets = [0, 80], sizes = [8, 8], strides = [1, 1]} : vector<8x96xf32> to vector<8x8xf32>
    %49 = vector.shape_cast %48 : vector<8x8xf32> to vector<1x8x8xf32>
    %50 = vector.extract_strided_slice %25 {offsets = [0, 88], sizes = [8, 8], strides = [1, 1]} : vector<8x96xf32> to vector<8x8xf32>
    %51 = vector.shape_cast %50 : vector<8x8xf32> to vector<1x8x8xf32>
    %52 = tpu.concatenate %45, %47, %49, %51 in 0 : vector<1x8x8xf32>, vector<1x8x8xf32>, vector<1x8x8xf32>, vector<1x8x8xf32> -> vector<4x8x8xf32>
    "tpu.trace_start"() <{level = 10 : i32, message = "hqd,hkd->hqk"}> : () -> ()
    %cst_20 = arith.constant dense<0.000000e+00> : vector<4x8x8xf32>
    %53 = tpu.matmul %34, %43, %cst_20 {dimension_numbers = #tpu.dot_dimension_numbers<[2], [2], [1], [1], [0, 0, 0, 1, 1, 1], [0], [0]>} : vector<4x8x8xf32>, vector<4x8x8xf32>, vector<4x8x8xf32> -> vector<4x8x8xf32>
    "tpu.trace_stop"() : () -> ()
    %cst_21 = arith.constant 0.353553385 : f32
    %54 = vector.broadcast %cst_21 : f32 to vector<4x8x8xf32>
    %55 = arith.mulf %53, %54 : vector<4x8x8xf32>
    %56 = vector.broadcast %4 : vector<1x1x8xf32> to vector<4x8x8xf32>
    %57 = arith.addf %55, %56 : vector<4x8x8xf32>
    %cst_22 = arith.constant dense<0xFF800000> : vector<4x8xf32>
    %58 = vector.multi_reduction <maximumf>, %57, %cst_22 [2] : vector<4x8x8xf32> to vector<4x8xf32>
    %59 = vector.shape_cast %58 : vector<4x8xf32> to vector<4x8x1xf32>
    %60 = vector.broadcast %59 : vector<4x8x1xf32> to vector<4x8x8xf32>
    %61 = arith.subf %57, %60 : vector<4x8x8xf32>
    %62 = math.exp %61 : vector<4x8x8xf32>
    %cst_23 = arith.constant dense<0.000000e+00> : vector<4x8xf32>
    %63 = vector.multi_reduction <add>, %62, %cst_23 [2] : vector<4x8x8xf32> to vector<4x8xf32>
    %64 = vector.shape_cast %63 : vector<4x8xf32> to vector<4x8x1xf32>
    %65 = tpu.reciprocal %64 {approx = true} : vector<4x8x1xf32> -> vector<4x8x1xf32>
    %66 = vector.broadcast %65 : vector<4x8x1xf32> to vector<4x8x8xf32>
    %67 = arith.mulf %62, %66 : vector<4x8x8xf32>
    "tpu.trace_start"() <{level = 10 : i32, message = "hqk,hkd->hqd"}> : () -> ()
    %cst_24 = arith.constant dense<0.000000e+00> : vector<4x8x8xf32>
    %68 = tpu.matmul %67, %52, %cst_24 {dimension_numbers = #tpu.dot_dimension_numbers<[2], [1], [1], [2], [0, 0, 0, 1, 1, 2], [0], [0]>} : vector<4x8x8xf32>, vector<4x8x8xf32>, vector<4x8x8xf32> -> vector<4x8x8xf32>
    "tpu.trace_stop"() : () -> ()
    %69 = vector.extract_strided_slice %68 {offsets = [0, 0, 0], sizes = [1, 8, 8], strides = [1, 1, 1]} : vector<4x8x8xf32> to vector<1x8x8xf32>
    %70 = vector.shape_cast %69 : vector<1x8x8xf32> to vector<8x8xf32>
    %71 = vector.extract_strided_slice %8 {offsets = [0, 0], sizes = [8, 32], strides = [1, 1]} : vector<32x32xf32> to vector<8x32xf32>
    %cst_25 = arith.constant dense<0.000000e+00> : vector<8x32xf32>
    %72 = tpu.matmul %70, %71, %cst_25 {dimension_numbers = #tpu.dot_dimension_numbers<[1], [0], [0], [1], [0, 0, 1, 1], [], []>} : vector<8x8xf32>, vector<8x32xf32>, vector<8x32xf32> -> vector<8x32xf32>
    %73 = vector.broadcast %16 : vector<1x32xf32> to vector<8x32xf32>
    %74 = arith.addf %73, %72 : vector<8x32xf32>
    %75 = vector.extract_strided_slice %68 {offsets = [1, 0, 0], sizes = [1, 8, 8], strides = [1, 1, 1]} : vector<4x8x8xf32> to vector<1x8x8xf32>
    %76 = vector.shape_cast %75 : vector<1x8x8xf32> to vector<8x8xf32>
    %77 = vector.extract_strided_slice %8 {offsets = [8, 0], sizes = [8, 32], strides = [1, 1]} : vector<32x32xf32> to vector<8x32xf32>
    %cst_26 = arith.constant dense<0.000000e+00> : vector<8x32xf32>
    %78 = tpu.matmul %76, %77, %cst_26 {dimension_numbers = #tpu.dot_dimension_numbers<[1], [0], [0], [1], [0, 0, 1, 1], [], []>} : vector<8x8xf32>, vector<8x32xf32>, vector<8x32xf32> -> vector<8x32xf32>
    %79 = arith.addf %74, %78 : vector<8x32xf32>
    %80 = vector.extract_strided_slice %68 {offsets = [2, 0, 0], sizes = [1, 8, 8], strides = [1, 1, 1]} : vector<4x8x8xf32> to vector<1x8x8xf32>
    %81 = vector.shape_cast %80 : vector<1x8x8xf32> to vector<8x8xf32>
    %82 = vector.extract_strided_slice %8 {offsets = [16, 0], sizes = [8, 32], strides = [1, 1]} : vector<32x32xf32> to vector<8x32xf32>
    %cst_27 = arith.constant dense<0.000000e+00> : vector<8x32xf32>
    %83 = tpu.matmul %81, %82, %cst_27 {dimension_numbers = #tpu.dot_dimension_numbers<[1], [0], [0], [1], [0, 0, 1, 1], [], []>} : vector<8x8xf32>, vector<8x32xf32>, vector<8x32xf32> -> vector<8x32xf32>
    %84 = arith.addf %79, %83 : vector<8x32xf32>
    %85 = vector.extract_strided_slice %68 {offsets = [3, 0, 0], sizes = [1, 8, 8], strides = [1, 1, 1]} : vector<4x8x8xf32> to vector<1x8x8xf32>
    %86 = vector.shape_cast %85 : vector<1x8x8xf32> to vector<8x8xf32>
    %87 = vector.extract_strided_slice %8 {offsets = [24, 0], sizes = [8, 32], strides = [1, 1]} : vector<32x32xf32> to vector<8x32xf32>
    %cst_28 = arith.constant dense<0.000000e+00> : vector<8x32xf32>
    %88 = tpu.matmul %86, %87, %cst_28 {dimension_numbers = #tpu.dot_dimension_numbers<[1], [0], [0], [1], [0, 0, 1, 1], [], []>} : vector<8x8xf32>, vector<8x32xf32>, vector<8x32xf32> -> vector<8x32xf32>
    %89 = arith.addf %84, %88 : vector<8x32xf32>
    %90 = arith.addf %1, %89 : vector<8x32xf32>
    %cst_29 = arith.constant dense<0.000000e+00> : vector<8xf32>
    %91 = vector.multi_reduction <add>, %90, %cst_29 [1] : vector<8x32xf32> to vector<8xf32>
    %92 = vector.shape_cast %91 : vector<8xf32> to vector<8x1xf32>
    %cst_30 = arith.constant 3.200000e+01 : f32
    %93 = vector.broadcast %cst_30 : f32 to vector<8x1xf32>
    %94 = arith.divf %92, %93 : vector<8x1xf32>
    %95 = vector.broadcast %94 : vector<8x1xf32> to vector<8x32xf32>
    %96 = arith.subf %90, %95 : vector<8x32xf32>
    %97 = arith.mulf %96, %96 : vector<8x32xf32>
    %cst_31 = arith.constant dense<0.000000e+00> : vector<8xf32>
    %98 = vector.multi_reduction <add>, %97, %cst_31 [1] : vector<8x32xf32> to vector<8xf32>
    %99 = vector.shape_cast %98 : vector<8xf32> to vector<8x1xf32>
    %cst_32 = arith.constant 3.200000e+01 : f32
    %100 = vector.broadcast %cst_32 : f32 to vector<8x1xf32>
    %101 = arith.divf %99, %100 : vector<8x1xf32>
    %102 = vector.broadcast %94 : vector<8x1xf32> to vector<8x32xf32>
    %103 = arith.subf %90, %102 : vector<8x32xf32>
    %cst_33 = arith.constant 1.000000e-07 : f32
    %104 = vector.broadcast %cst_33 : f32 to vector<8x1xf32>
    %105 = arith.addf %101, %104 : vector<8x1xf32>
    %106 = math.rsqrt %105 : vector<8x1xf32>
    %107 = vector.broadcast %106 : vector<8x1xf32> to vector<8x32xf32>
    %108 = arith.mulf %103, %107 : vector<8x32xf32>
    %109 = vector.broadcast %17 : vector<1x32xf32> to vector<8x32xf32>
    %110 = arith.mulf %108, %109 : vector<8x32xf32>
    %111 = vector.broadcast %18 : vector<1x32xf32> to vector<8x32xf32>
    %112 = arith.addf %110, %111 : vector<8x32xf32>
    %cst_34 = arith.constant dense<0.000000e+00> : vector<8x64xf32>
    %113 = tpu.matmul %112, %10, %cst_34 {dimension_numbers = #tpu.dot_dimension_numbers<[1], [0], [0], [1], [0, 0, 1, 1], [], []>} : vector<8x32xf32>, vector<32x64xf32>, vector<8x64xf32> -> vector<8x64xf32>
    %114 = vector.broadcast %19 : vector<1x64xf32> to vector<8x64xf32>
    %115 = arith.addf %113, %114 : vector<8x64xf32>
    %cst_35 = arith.constant 5.000000e-01 : f32
    %116 = vector.broadcast %cst_35 : f32 to vector<8x64xf32>
    %117 = arith.mulf %116, %115 : vector<8x64xf32>
    %cst_36 = arith.constant 4.471500e-02 : f32
    %118 = vector.broadcast %cst_36 : f32 to vector<8x64xf32>
    %119 = arith.mulf %118, %115 : vector<8x64xf32>
    %120 = arith.mulf %119, %115 : vector<8x64xf32>
    %121 = arith.mulf %120, %115 : vector<8x64xf32>
    %122 = arith.addf %115, %121 : vector<8x64xf32>
    %cst_37 = arith.constant 0.797884583 : f32
    %123 = vector.broadcast %cst_37 : f32 to vector<8x64xf32>
    %124 = arith.mulf %123, %122 : vector<8x64xf32>
    %125 = math.tanh %124 : vector<8x64xf32>
    %cst_38 = arith.constant 1.000000e+00 : f32
    %126 = vector.broadcast %cst_38 : f32 to vector<8x64xf32>
    %127 = arith.addf %126, %125 : vector<8x64xf32>
    %128 = arith.mulf %117, %127 : vector<8x64xf32>
    %cst_39 = arith.constant dense<0.000000e+00> : vector<8x32xf32>
    %129 = tpu.matmul %128, %12, %cst_39 {dimension_numbers = #tpu.dot_dimension_numbers<[1], [0], [0], [1], [0, 0, 1, 1], [], []>} : vector<8x64xf32>, vector<64x32xf32>, vector<8x32xf32> -> vector<8x32xf32>
    %130 = vector.broadcast %20 : vector<1x32xf32> to vector<8x32xf32>
    %131 = arith.addf %129, %130 : vector<8x32xf32>
    %132 = arith.addf %112, %131 : vector<8x32xf32>
    %cst_40 = arith.constant dense<0.000000e+00> : vector<8xf32>
    %133 = vector.multi_reduction <add>, %132, %cst_40 [1] : vector<8x32xf32> to vector<8xf32>
    %134 = vector.shape_cast %133 : vector<8xf32> to vector<8x1xf32>
    %cst_41 = arith.constant 3.200000e+01 : f32
    %135 = vector.broadcast %cst_41 : f32 to vector<8x1xf32>
    %136 = arith.divf %134, %135 : vector<8x1xf32>
    %137 = vector.broadcast %136 : vector<8x1xf32> to vector<8x32xf32>
    %138 = arith.subf %132, %137 : vector<8x32xf32>
    %139 = arith.mulf %138, %138 : vector<8x32xf32>
    %cst_42 = arith.constant dense<0.000000e+00> : vector<8xf32>
    %140 = vector.multi_reduction <add>, %139, %cst_42 [1] : vector<8x32xf32> to vector<8xf32>
    %141 = vector.shape_cast %140 : vector<8xf32> to vector<8x1xf32>
    %cst_43 = arith.constant 3.200000e+01 : f32
    %142 = vector.broadcast %cst_43 : f32 to vector<8x1xf32>
    %143 = arith.divf %141, %142 : vector<8x1xf32>
    %144 = vector.broadcast %136 : vector<8x1xf32> to vector<8x32xf32>
    %145 = arith.subf %132, %144 : vector<8x32xf32>
    %cst_44 = arith.constant 1.000000e-07 : f32
    %146 = vector.broadcast %cst_44 : f32 to vector<8x1xf32>
    %147 = arith.addf %143, %146 : vector<8x1xf32>
    %148 = math.rsqrt %147 : vector<8x1xf32>
    %149 = vector.broadcast %148 : vector<8x1xf32> to vector<8x32xf32>
    %150 = arith.mulf %145, %149 : vector<8x32xf32>
    %151 = vector.broadcast %21 : vector<1x32xf32> to vector<8x32xf32>
    %152 = arith.mulf %150, %151 : vector<8x32xf32>
    %153 = vector.broadcast %22 : vector<1x32xf32> to vector<8x32xf32>
    %154 = arith.addf %152, %153 : vector<8x32xf32>
    %c1 = arith.constant 1 : index
    %c0_45 = arith.constant 0 : index
    %c0_46 = arith.constant 0 : index
    %155 = vector.load %arg3[%c1, %c0_45, %c0_46] : memref<4x32x96xf32, #tpu.memory_space<vmem>>, vector<1x32x96xf32>
    %156 = vector.shape_cast %155 : vector<1x32x96xf32> to vector<32x96xf32>
    %c1_47 = arith.constant 1 : index
    %c0_48 = arith.constant 0 : index
    %c0_49 = arith.constant 0 : index
    %157 = vector.load %arg4[%c1_47, %c0_48, %c0_49] : memref<4x32x32xf32, #tpu.memory_space<vmem>>, vector<1x32x32xf32>
    %158 = vector.shape_cast %157 : vector<1x32x32xf32> to vector<32x32xf32>
    %c1_50 = arith.constant 1 : index
    %c0_51 = arith.constant 0 : index
    %c0_52 = arith.constant 0 : index
    %159 = vector.load %arg5[%c1_50, %c0_51, %c0_52] : memref<4x32x64xf32, #tpu.memory_space<vmem>>, vector<1x32x64xf32>
    %160 = vector.shape_cast %159 : vector<1x32x64xf32> to vector<32x64xf32>
    %c1_53 = arith.constant 1 : index
    %c0_54 = arith.constant 0 : index
    %c0_55 = arith.constant 0 : index
    %161 = vector.load %arg6[%c1_53, %c0_54, %c0_55] : memref<4x64x32xf32, #tpu.memory_space<vmem>>, vector<1x64x32xf32>
    %162 = vector.shape_cast %161 : vector<1x64x32xf32> to vector<64x32xf32>
    %c1_56 = arith.constant 1 : index
    %c0_57 = arith.constant 0 : index
    %c0_58 = arith.constant 0 : index
    %163 = vector.load %arg7[%c1_56, %c0_57, %c0_58] : memref<4x8x128xf32, #tpu.memory_space<vmem>>, vector<1x8x128xf32>
    %164 = vector.shape_cast %163 : vector<1x8x128xf32> to vector<8x128xf32>
    %165 = vector.extract_strided_slice %164 {offsets = [0, 0], sizes = [1, 96], strides = [1, 1]} : vector<8x128xf32> to vector<1x96xf32>
    %166 = vector.extract_strided_slice %164 {offsets = [1, 0], sizes = [1, 32], strides = [1, 1]} : vector<8x128xf32> to vector<1x32xf32>
    %167 = vector.extract_strided_slice %164 {offsets = [2, 0], sizes = [1, 32], strides = [1, 1]} : vector<8x128xf32> to vector<1x32xf32>
    %168 = vector.extract_strided_slice %164 {offsets = [3, 0], sizes = [1, 32], strides = [1, 1]} : vector<8x128xf32> to vector<1x32xf32>
    %169 = vector.extract_strided_slice %164 {offsets = [4, 0], sizes = [1, 64], strides = [1, 1]} : vector<8x128xf32> to vector<1x64xf32>
    %170 = vector.extract_strided_slice %164 {offsets = [5, 0], sizes = [1, 32], strides = [1, 1]} : vector<8x128xf32> to vector<1x32xf32>
    %171 = vector.extract_strided_slice %164 {offsets = [6, 0], sizes = [1, 32], strides = [1, 1]} : vector<8x128xf32> to vector<1x32xf32>
    %172 = vector.extract_strided_slice %164 {offsets = [7, 0], sizes = [1, 32], strides = [1, 1]} : vector<8x128xf32> to vector<1x32xf32>
    %cst_59 = arith.constant dense<0.000000e+00> : vector<8x96xf32>
    %173 = tpu.matmul %154, %156, %cst_59 {dimension_numbers = #tpu.dot_dimension_numbers<[1], [0], [0], [1], [0, 0, 1, 1], [], []>} : vector<8x32xf32>, vector<32x96xf32>, vector<8x96xf32> -> vector<8x96xf32>
    %174 = vector.broadcast %165 : vector<1x96xf32> to vector<8x96xf32>
    %175 = arith.addf %173, %174 : vector<8x96xf32>
    %176 = vector.extract_strided_slice %175 {offsets = [0, 0], sizes = [8, 8], strides = [1, 1]} : vector<8x96xf32> to vector<8x8xf32>
    %177 = vector.shape_cast %176 : vector<8x8xf32> to vector<1x8x8xf32>
    %178 = vector.extract_strided_slice %175 {offsets = [0, 8], sizes = [8, 8], strides = [1, 1]} : vector<8x96xf32> to vector<8x8xf32>
    %179 = vector.shape_cast %178 : vector<8x8xf32> to vector<1x8x8xf32>
    %180 = vector.extract_strided_slice %175 {offsets = [0, 16], sizes = [8, 8], strides = [1, 1]} : vector<8x96xf32> to vector<8x8xf32>
    %181 = vector.shape_cast %180 : vector<8x8xf32> to vector<1x8x8xf32>
    %182 = vector.extract_strided_slice %175 {offsets = [0, 24], sizes = [8, 8], strides = [1, 1]} : vector<8x96xf32> to vector<8x8xf32>
    %183 = vector.shape_cast %182 : vector<8x8xf32> to vector<1x8x8xf32>
    %184 = tpu.concatenate %177, %179, %181, %183 in 0 : vector<1x8x8xf32>, vector<1x8x8xf32>, vector<1x8x8xf32>, vector<1x8x8xf32> -> vector<4x8x8xf32>
    %185 = vector.extract_strided_slice %175 {offsets = [0, 32], sizes = [8, 8], strides = [1, 1]} : vector<8x96xf32> to vector<8x8xf32>
    %186 = vector.shape_cast %185 : vector<8x8xf32> to vector<1x8x8xf32>
    %187 = vector.extract_strided_slice %175 {offsets = [0, 40], sizes = [8, 8], strides = [1, 1]} : vector<8x96xf32> to vector<8x8xf32>
    %188 = vector.shape_cast %187 : vector<8x8xf32> to vector<1x8x8xf32>
    %189 = vector.extract_strided_slice %175 {offsets = [0, 48], sizes = [8, 8], strides = [1, 1]} : vector<8x96xf32> to vector<8x8xf32>
    %190 = vector.shape_cast %189 : vector<8x8xf32> to vector<1x8x8xf32>
    %191 = vector.extract_strided_slice %175 {offsets = [0, 56], sizes = [8, 8], strides = [1, 1]} : vector<8x96xf32> to vector<8x8xf32>
    %192 = vector.shape_cast %191 : vector<8x8xf32> to vector<1x8x8xf32>
    %193 = tpu.concatenate %186, %188, %190, %192 in 0 : vector<1x8x8xf32>, vector<1x8x8xf32>, vector<1x8x8xf32>, vector<1x8x8xf32> -> vector<4x8x8xf32>
    %194 = vector.extract_strided_slice %175 {offsets = [0, 64], sizes = [8, 8], strides = [1, 1]} : vector<8x96xf32> to vector<8x8xf32>
    %195 = vector.shape_cast %194 : vector<8x8xf32> to vector<1x8x8xf32>
    %196 = vector.extract_strided_slice %175 {offsets = [0, 72], sizes = [8, 8], strides = [1, 1]} : vector<8x96xf32> to vector<8x8xf32>
    %197 = vector.shape_cast %196 : vector<8x8xf32> to vector<1x8x8xf32>
    %198 = vector.extract_strided_slice %175 {offsets = [0, 80], sizes = [8, 8], strides = [1, 1]} : vector<8x96xf32> to vector<8x8xf32>
    %199 = vector.shape_cast %198 : vector<8x8xf32> to vector<1x8x8xf32>
    %200 = vector.extract_strided_slice %175 {offsets = [0, 88], sizes = [8, 8], strides = [1, 1]} : vector<8x96xf32> to vector<8x8xf32>
    %201 = vector.shape_cast %200 : vector<8x8xf32> to vector<1x8x8xf32>
    %202 = tpu.concatenate %195, %197, %199, %201 in 0 : vector<1x8x8xf32>, vector<1x8x8xf32>, vector<1x8x8xf32>, vector<1x8x8xf32> -> vector<4x8x8xf32>
    "tpu.trace_start"() <{level = 10 : i32, message = "hqd,hkd->hqk"}> : () -> ()
    %cst_60 = arith.constant dense<0.000000e+00> : vector<4x8x8xf32>
    %203 = tpu.matmul %184, %193, %cst_60 {dimension_numbers = #tpu.dot_dimension_numbers<[2], [2], [1], [1], [0, 0, 0, 1, 1, 1], [0], [0]>} : vector<4x8x8xf32>, vector<4x8x8xf32>, vector<4x8x8xf32> -> vector<4x8x8xf32>
    "tpu.trace_stop"() : () -> ()
    %cst_61 = arith.constant 0.353553385 : f32
    %204 = vector.broadcast %cst_61 : f32 to vector<4x8x8xf32>
    %205 = arith.mulf %203, %204 : vector<4x8x8xf32>
    %206 = vector.broadcast %4 : vector<1x1x8xf32> to vector<4x8x8xf32>
    %207 = arith.addf %205, %206 : vector<4x8x8xf32>
    %cst_62 = arith.constant dense<0xFF800000> : vector<4x8xf32>
    %208 = vector.multi_reduction <maximumf>, %207, %cst_62 [2] : vector<4x8x8xf32> to vector<4x8xf32>
    %209 = vector.shape_cast %208 : vector<4x8xf32> to vector<4x8x1xf32>
    %210 = vector.broadcast %209 : vector<4x8x1xf32> to vector<4x8x8xf32>
    %211 = arith.subf %207, %210 : vector<4x8x8xf32>
    %212 = math.exp %211 : vector<4x8x8xf32>
    %cst_63 = arith.constant dense<0.000000e+00> : vector<4x8xf32>
    %213 = vector.multi_reduction <add>, %212, %cst_63 [2] : vector<4x8x8xf32> to vector<4x8xf32>
    %214 = vector.shape_cast %213 : vector<4x8xf32> to vector<4x8x1xf32>
    %215 = tpu.reciprocal %214 {approx = true} : vector<4x8x1xf32> -> vector<4x8x1xf32>
    %216 = vector.broadcast %215 : vector<4x8x1xf32> to vector<4x8x8xf32>
    %217 = arith.mulf %212, %216 : vector<4x8x8xf32>
    "tpu.trace_start"() <{level = 10 : i32, message = "hqk,hkd->hqd"}> : () -> ()
    %cst_64 = arith.constant dense<0.000000e+00> : vector<4x8x8xf32>
    %218 = tpu.matmul %217, %202, %cst_64 {dimension_numbers = #tpu.dot_dimension_numbers<[2], [1], [1], [2], [0, 0, 0, 1, 1, 2], [0], [0]>} : vector<4x8x8xf32>, vector<4x8x8xf32>, vector<4x8x8xf32> -> vector<4x8x8xf32>
    "tpu.trace_stop"() : () -> ()
    %219 = vector.extract_strided_slice %218 {offsets = [0, 0, 0], sizes = [1, 8, 8], strides = [1, 1, 1]} : vector<4x8x8xf32> to vector<1x8x8xf32>
    %220 = vector.shape_cast %219 : vector<1x8x8xf32> to vector<8x8xf32>
    %221 = vector.extract_strided_slice %158 {offsets = [0, 0], sizes = [8, 32], strides = [1, 1]} : vector<32x32xf32> to vector<8x32xf32>
    %cst_65 = arith.constant dense<0.000000e+00> : vector<8x32xf32>
    %222 = tpu.matmul %220, %221, %cst_65 {dimension_numbers = #tpu.dot_dimension_numbers<[1], [0], [0], [1], [0, 0, 1, 1], [], []>} : vector<8x8xf32>, vector<8x32xf32>, vector<8x32xf32> -> vector<8x32xf32>
    %223 = vector.broadcast %166 : vector<1x32xf32> to vector<8x32xf32>
    %224 = arith.addf %223, %222 : vector<8x32xf32>
    %225 = vector.extract_strided_slice %218 {offsets = [1, 0, 0], sizes = [1, 8, 8], strides = [1, 1, 1]} : vector<4x8x8xf32> to vector<1x8x8xf32>
    %226 = vector.shape_cast %225 : vector<1x8x8xf32> to vector<8x8xf32>
    %227 = vector.extract_strided_slice %158 {offsets = [8, 0], sizes = [8, 32], strides = [1, 1]} : vector<32x32xf32> to vector<8x32xf32>
    %cst_66 = arith.constant dense<0.000000e+00> : vector<8x32xf32>
    %228 = tpu.matmul %226, %227, %cst_66 {dimension_numbers = #tpu.dot_dimension_numbers<[1], [0], [0], [1], [0, 0, 1, 1], [], []>} : vector<8x8xf32>, vector<8x32xf32>, vector<8x32xf32> -> vector<8x32xf32>
    %229 = arith.addf %224, %228 : vector<8x32xf32>
    %230 = vector.extract_strided_slice %218 {offsets = [2, 0, 0], sizes = [1, 8, 8], strides = [1, 1, 1]} : vector<4x8x8xf32> to vector<1x8x8xf32>
    %231 = vector.shape_cast %230 : vector<1x8x8xf32> to vector<8x8xf32>
    %232 = vector.extract_strided_slice %158 {offsets = [16, 0], sizes = [8, 32], strides = [1, 1]} : vector<32x32xf32> to vector<8x32xf32>
    %cst_67 = arith.constant dense<0.000000e+00> : vector<8x32xf32>
    %233 = tpu.matmul %231, %232, %cst_67 {dimension_numbers = #tpu.dot_dimension_numbers<[1], [0], [0], [1], [0, 0, 1, 1], [], []>} : vector<8x8xf32>, vector<8x32xf32>, vector<8x32xf32> -> vector<8x32xf32>
    %234 = arith.addf %229, %233 : vector<8x32xf32>
    %235 = vector.extract_strided_slice %218 {offsets = [3, 0, 0], sizes = [1, 8, 8], strides = [1, 1, 1]} : vector<4x8x8xf32> to vector<1x8x8xf32>
    %236 = vector.shape_cast %235 : vector<1x8x8xf32> to vector<8x8xf32>
    %237 = vector.extract_strided_slice %158 {offsets = [24, 0], sizes = [8, 32], strides = [1, 1]} : vector<32x32xf32> to vector<8x32xf32>
    %cst_68 = arith.constant dense<0.000000e+00> : vector<8x32xf32>
    %238 = tpu.matmul %236, %237, %cst_68 {dimension_numbers = #tpu.dot_dimension_numbers<[1], [0], [0], [1], [0, 0, 1, 1], [], []>} : vector<8x8xf32>, vector<8x32xf32>, vector<8x32xf32> -> vector<8x32xf32>
    %239 = arith.addf %234, %238 : vector<8x32xf32>
    %240 = arith.addf %154, %239 : vector<8x32xf32>
    %cst_69 = arith.constant dense<0.000000e+00> : vector<8xf32>
    %241 = vector.multi_reduction <add>, %240, %cst_69 [1] : vector<8x32xf32> to vector<8xf32>
    %242 = vector.shape_cast %241 : vector<8xf32> to vector<8x1xf32>
    %cst_70 = arith.constant 3.200000e+01 : f32
    %243 = vector.broadcast %cst_70 : f32 to vector<8x1xf32>
    %244 = arith.divf %242, %243 : vector<8x1xf32>
    %245 = vector.broadcast %244 : vector<8x1xf32> to vector<8x32xf32>
    %246 = arith.subf %240, %245 : vector<8x32xf32>
    %247 = arith.mulf %246, %246 : vector<8x32xf32>
    %cst_71 = arith.constant dense<0.000000e+00> : vector<8xf32>
    %248 = vector.multi_reduction <add>, %247, %cst_71 [1] : vector<8x32xf32> to vector<8xf32>
    %249 = vector.shape_cast %248 : vector<8xf32> to vector<8x1xf32>
    %cst_72 = arith.constant 3.200000e+01 : f32
    %250 = vector.broadcast %cst_72 : f32 to vector<8x1xf32>
    %251 = arith.divf %249, %250 : vector<8x1xf32>
    %252 = vector.broadcast %244 : vector<8x1xf32> to vector<8x32xf32>
    %253 = arith.subf %240, %252 : vector<8x32xf32>
    %cst_73 = arith.constant 1.000000e-07 : f32
    %254 = vector.broadcast %cst_73 : f32 to vector<8x1xf32>
    %255 = arith.addf %251, %254 : vector<8x1xf32>
    %256 = math.rsqrt %255 : vector<8x1xf32>
    %257 = vector.broadcast %256 : vector<8x1xf32> to vector<8x32xf32>
    %258 = arith.mulf %253, %257 : vector<8x32xf32>
    %259 = vector.broadcast %167 : vector<1x32xf32> to vector<8x32xf32>
    %260 = arith.mulf %258, %259 : vector<8x32xf32>
    %261 = vector.broadcast %168 : vector<1x32xf32> to vector<8x32xf32>
    %262 = arith.addf %260, %261 : vector<8x32xf32>
    %cst_74 = arith.constant dense<0.000000e+00> : vector<8x64xf32>
    %263 = tpu.matmul %262, %160, %cst_74 {dimension_numbers = #tpu.dot_dimension_numbers<[1], [0], [0], [1], [0, 0, 1, 1], [], []>} : vector<8x32xf32>, vector<32x64xf32>, vector<8x64xf32> -> vector<8x64xf32>
    %264 = vector.broadcast %169 : vector<1x64xf32> to vector<8x64xf32>
    %265 = arith.addf %263, %264 : vector<8x64xf32>
    %cst_75 = arith.constant 5.000000e-01 : f32
    %266 = vector.broadcast %cst_75 : f32 to vector<8x64xf32>
    %267 = arith.mulf %266, %265 : vector<8x64xf32>
    %cst_76 = arith.constant 4.471500e-02 : f32
    %268 = vector.broadcast %cst_76 : f32 to vector<8x64xf32>
    %269 = arith.mulf %268, %265 : vector<8x64xf32>
    %270 = arith.mulf %269, %265 : vector<8x64xf32>
    %271 = arith.mulf %270, %265 : vector<8x64xf32>
    %272 = arith.addf %265, %271 : vector<8x64xf32>
    %cst_77 = arith.constant 0.797884583 : f32
    %273 = vector.broadcast %cst_77 : f32 to vector<8x64xf32>
    %274 = arith.mulf %273, %272 : vector<8x64xf32>
    %275 = math.tanh %274 : vector<8x64xf32>
    %cst_78 = arith.constant 1.000000e+00 : f32
    %276 = vector.broadcast %cst_78 : f32 to vector<8x64xf32>
    %277 = arith.addf %276, %275 : vector<8x64xf32>
    %278 = arith.mulf %267, %277 : vector<8x64xf32>
    %cst_79 = arith.constant dense<0.000000e+00> : vector<8x32xf32>
    %279 = tpu.matmul %278, %162, %cst_79 {dimension_numbers = #tpu.dot_dimension_numbers<[1], [0], [0], [1], [0, 0, 1, 1], [], []>} : vector<8x64xf32>, vector<64x32xf32>, vector<8x32xf32> -> vector<8x32xf32>
    %280 = vector.broadcast %170 : vector<1x32xf32> to vector<8x32xf32>
    %281 = arith.addf %279, %280 : vector<8x32xf32>
    %282 = arith.addf %262, %281 : vector<8x32xf32>
    %cst_80 = arith.constant dense<0.000000e+00> : vector<8xf32>
    %283 = vector.multi_reduction <add>, %282, %cst_80 [1] : vector<8x32xf32> to vector<8xf32>
    %284 = vector.shape_cast %283 : vector<8xf32> to vector<8x1xf32>
    %cst_81 = arith.constant 3.200000e+01 : f32
    %285 = vector.broadcast %cst_81 : f32 to vector<8x1xf32>
    %286 = arith.divf %284, %285 : vector<8x1xf32>
    %287 = vector.broadcast %286 : vector<8x1xf32> to vector<8x32xf32>
    %288 = arith.subf %282, %287 : vector<8x32xf32>
    %289 = arith.mulf %288, %288 : vector<8x32xf32>
    %cst_82 = arith.constant dense<0.000000e+00> : vector<8xf32>
    %290 = vector.multi_reduction <add>, %289, %cst_82 [1] : vector<8x32xf32> to vector<8xf32>
    %291 = vector.shape_cast %290 : vector<8xf32> to vector<8x1xf32>
    %cst_83 = arith.constant 3.200000e+01 : f32
    %292 = vector.broadcast %cst_83 : f32 to vector<8x1xf32>
    %293 = arith.divf %291, %292 : vector<8x1xf32>
    %294 = vector.broadcast %286 : vector<8x1xf32> to vector<8x32xf32>
    %295 = arith.subf %282, %294 : vector<8x32xf32>
    %cst_84 = arith.constant 1.000000e-07 : f32
    %296 = vector.broadcast %cst_84 : f32 to vector<8x1xf32>
    %297 = arith.addf %293, %296 : vector<8x1xf32>
    %298 = math.rsqrt %297 : vector<8x1xf32>
    %299 = vector.broadcast %298 : vector<8x1xf32> to vector<8x32xf32>
    %300 = arith.mulf %295, %299 : vector<8x32xf32>
    %301 = vector.broadcast %171 : vector<1x32xf32> to vector<8x32xf32>
    %302 = arith.mulf %300, %301 : vector<8x32xf32>
    %303 = vector.broadcast %172 : vector<1x32xf32> to vector<8x32xf32>
    %304 = arith.addf %302, %303 : vector<8x32xf32>
    %c2 = arith.constant 2 : index
    %c0_85 = arith.constant 0 : index
    %c0_86 = arith.constant 0 : index
    %305 = vector.load %arg3[%c2, %c0_85, %c0_86] : memref<4x32x96xf32, #tpu.memory_space<vmem>>, vector<1x32x96xf32>
    %306 = vector.shape_cast %305 : vector<1x32x96xf32> to vector<32x96xf32>
    %c2_87 = arith.constant 2 : index
    %c0_88 = arith.constant 0 : index
    %c0_89 = arith.constant 0 : index
    %307 = vector.load %arg4[%c2_87, %c0_88, %c0_89] : memref<4x32x32xf32, #tpu.memory_space<vmem>>, vector<1x32x32xf32>
    %308 = vector.shape_cast %307 : vector<1x32x32xf32> to vector<32x32xf32>
    %c2_90 = arith.constant 2 : index
    %c0_91 = arith.constant 0 : index
    %c0_92 = arith.constant 0 : index
    %309 = vector.load %arg5[%c2_90, %c0_91, %c0_92] : memref<4x32x64xf32, #tpu.memory_space<vmem>>, vector<1x32x64xf32>
    %310 = vector.shape_cast %309 : vector<1x32x64xf32> to vector<32x64xf32>
    %c2_93 = arith.constant 2 : index
    %c0_94 = arith.constant 0 : index
    %c0_95 = arith.constant 0 : index
    %311 = vector.load %arg6[%c2_93, %c0_94, %c0_95] : memref<4x64x32xf32, #tpu.memory_space<vmem>>, vector<1x64x32xf32>
    %312 = vector.shape_cast %311 : vector<1x64x32xf32> to vector<64x32xf32>
    %c2_96 = arith.constant 2 : index
    %c0_97 = arith.constant 0 : index
    %c0_98 = arith.constant 0 : index
    %313 = vector.load %arg7[%c2_96, %c0_97, %c0_98] : memref<4x8x128xf32, #tpu.memory_space<vmem>>, vector<1x8x128xf32>
    %314 = vector.shape_cast %313 : vector<1x8x128xf32> to vector<8x128xf32>
    %315 = vector.extract_strided_slice %314 {offsets = [0, 0], sizes = [1, 96], strides = [1, 1]} : vector<8x128xf32> to vector<1x96xf32>
    %316 = vector.extract_strided_slice %314 {offsets = [1, 0], sizes = [1, 32], strides = [1, 1]} : vector<8x128xf32> to vector<1x32xf32>
    %317 = vector.extract_strided_slice %314 {offsets = [2, 0], sizes = [1, 32], strides = [1, 1]} : vector<8x128xf32> to vector<1x32xf32>
    %318 = vector.extract_strided_slice %314 {offsets = [3, 0], sizes = [1, 32], strides = [1, 1]} : vector<8x128xf32> to vector<1x32xf32>
    %319 = vector.extract_strided_slice %314 {offsets = [4, 0], sizes = [1, 64], strides = [1, 1]} : vector<8x128xf32> to vector<1x64xf32>
    %320 = vector.extract_strided_slice %314 {offsets = [5, 0], sizes = [1, 32], strides = [1, 1]} : vector<8x128xf32> to vector<1x32xf32>
    %321 = vector.extract_strided_slice %314 {offsets = [6, 0], sizes = [1, 32], strides = [1, 1]} : vector<8x128xf32> to vector<1x32xf32>
    %322 = vector.extract_strided_slice %314 {offsets = [7, 0], sizes = [1, 32], strides = [1, 1]} : vector<8x128xf32> to vector<1x32xf32>
    %cst_99 = arith.constant dense<0.000000e+00> : vector<8x96xf32>
    %323 = tpu.matmul %304, %306, %cst_99 {dimension_numbers = #tpu.dot_dimension_numbers<[1], [0], [0], [1], [0, 0, 1, 1], [], []>} : vector<8x32xf32>, vector<32x96xf32>, vector<8x96xf32> -> vector<8x96xf32>
    %324 = vector.broadcast %315 : vector<1x96xf32> to vector<8x96xf32>
    %325 = arith.addf %323, %324 : vector<8x96xf32>
    %326 = vector.extract_strided_slice %325 {offsets = [0, 0], sizes = [8, 8], strides = [1, 1]} : vector<8x96xf32> to vector<8x8xf32>
    %327 = vector.shape_cast %326 : vector<8x8xf32> to vector<1x8x8xf32>
    %328 = vector.extract_strided_slice %325 {offsets = [0, 8], sizes = [8, 8], strides = [1, 1]} : vector<8x96xf32> to vector<8x8xf32>
    %329 = vector.shape_cast %328 : vector<8x8xf32> to vector<1x8x8xf32>
    %330 = vector.extract_strided_slice %325 {offsets = [0, 16], sizes = [8, 8], strides = [1, 1]} : vector<8x96xf32> to vector<8x8xf32>
    %331 = vector.shape_cast %330 : vector<8x8xf32> to vector<1x8x8xf32>
    %332 = vector.extract_strided_slice %325 {offsets = [0, 24], sizes = [8, 8], strides = [1, 1]} : vector<8x96xf32> to vector<8x8xf32>
    %333 = vector.shape_cast %332 : vector<8x8xf32> to vector<1x8x8xf32>
    %334 = tpu.concatenate %327, %329, %331, %333 in 0 : vector<1x8x8xf32>, vector<1x8x8xf32>, vector<1x8x8xf32>, vector<1x8x8xf32> -> vector<4x8x8xf32>
    %335 = vector.extract_strided_slice %325 {offsets = [0, 32], sizes = [8, 8], strides = [1, 1]} : vector<8x96xf32> to vector<8x8xf32>
    %336 = vector.shape_cast %335 : vector<8x8xf32> to vector<1x8x8xf32>
    %337 = vector.extract_strided_slice %325 {offsets = [0, 40], sizes = [8, 8], strides = [1, 1]} : vector<8x96xf32> to vector<8x8xf32>
    %338 = vector.shape_cast %337 : vector<8x8xf32> to vector<1x8x8xf32>
    %339 = vector.extract_strided_slice %325 {offsets = [0, 48], sizes = [8, 8], strides = [1, 1]} : vector<8x96xf32> to vector<8x8xf32>
    %340 = vector.shape_cast %339 : vector<8x8xf32> to vector<1x8x8xf32>
    %341 = vector.extract_strided_slice %325 {offsets = [0, 56], sizes = [8, 8], strides = [1, 1]} : vector<8x96xf32> to vector<8x8xf32>
    %342 = vector.shape_cast %341 : vector<8x8xf32> to vector<1x8x8xf32>
    %343 = tpu.concatenate %336, %338, %340, %342 in 0 : vector<1x8x8xf32>, vector<1x8x8xf32>, vector<1x8x8xf32>, vector<1x8x8xf32> -> vector<4x8x8xf32>
    %344 = vector.extract_strided_slice %325 {offsets = [0, 64], sizes = [8, 8], strides = [1, 1]} : vector<8x96xf32> to vector<8x8xf32>
    %345 = vector.shape_cast %344 : vector<8x8xf32> to vector<1x8x8xf32>
    %346 = vector.extract_strided_slice %325 {offsets = [0, 72], sizes = [8, 8], strides = [1, 1]} : vector<8x96xf32> to vector<8x8xf32>
    %347 = vector.shape_cast %346 : vector<8x8xf32> to vector<1x8x8xf32>
    %348 = vector.extract_strided_slice %325 {offsets = [0, 80], sizes = [8, 8], strides = [1, 1]} : vector<8x96xf32> to vector<8x8xf32>
    %349 = vector.shape_cast %348 : vector<8x8xf32> to vector<1x8x8xf32>
    %350 = vector.extract_strided_slice %325 {offsets = [0, 88], sizes = [8, 8], strides = [1, 1]} : vector<8x96xf32> to vector<8x8xf32>
    %351 = vector.shape_cast %350 : vector<8x8xf32> to vector<1x8x8xf32>
    %352 = tpu.concatenate %345, %347, %349, %351 in 0 : vector<1x8x8xf32>, vector<1x8x8xf32>, vector<1x8x8xf32>, vector<1x8x8xf32> -> vector<4x8x8xf32>
    "tpu.trace_start"() <{level = 10 : i32, message = "hqd,hkd->hqk"}> : () -> ()
    %cst_100 = arith.constant dense<0.000000e+00> : vector<4x8x8xf32>
    %353 = tpu.matmul %334, %343, %cst_100 {dimension_numbers = #tpu.dot_dimension_numbers<[2], [2], [1], [1], [0, 0, 0, 1, 1, 1], [0], [0]>} : vector<4x8x8xf32>, vector<4x8x8xf32>, vector<4x8x8xf32> -> vector<4x8x8xf32>
    "tpu.trace_stop"() : () -> ()
    %cst_101 = arith.constant 0.353553385 : f32
    %354 = vector.broadcast %cst_101 : f32 to vector<4x8x8xf32>
    %355 = arith.mulf %353, %354 : vector<4x8x8xf32>
    %356 = vector.broadcast %4 : vector<1x1x8xf32> to vector<4x8x8xf32>
    %357 = arith.addf %355, %356 : vector<4x8x8xf32>
    %cst_102 = arith.constant dense<0xFF800000> : vector<4x8xf32>
    %358 = vector.multi_reduction <maximumf>, %357, %cst_102 [2] : vector<4x8x8xf32> to vector<4x8xf32>
    %359 = vector.shape_cast %358 : vector<4x8xf32> to vector<4x8x1xf32>
    %360 = vector.broadcast %359 : vector<4x8x1xf32> to vector<4x8x8xf32>
    %361 = arith.subf %357, %360 : vector<4x8x8xf32>
    %362 = math.exp %361 : vector<4x8x8xf32>
    %cst_103 = arith.constant dense<0.000000e+00> : vector<4x8xf32>
    %363 = vector.multi_reduction <add>, %362, %cst_103 [2] : vector<4x8x8xf32> to vector<4x8xf32>
    %364 = vector.shape_cast %363 : vector<4x8xf32> to vector<4x8x1xf32>
    %365 = tpu.reciprocal %364 {approx = true} : vector<4x8x1xf32> -> vector<4x8x1xf32>
    %366 = vector.broadcast %365 : vector<4x8x1xf32> to vector<4x8x8xf32>
    %367 = arith.mulf %362, %366 : vector<4x8x8xf32>
    "tpu.trace_start"() <{level = 10 : i32, message = "hqk,hkd->hqd"}> : () -> ()
    %cst_104 = arith.constant dense<0.000000e+00> : vector<4x8x8xf32>
    %368 = tpu.matmul %367, %352, %cst_104 {dimension_numbers = #tpu.dot_dimension_numbers<[2], [1], [1], [2], [0, 0, 0, 1, 1, 2], [0], [0]>} : vector<4x8x8xf32>, vector<4x8x8xf32>, vector<4x8x8xf32> -> vector<4x8x8xf32>
    "tpu.trace_stop"() : () -> ()
    %369 = vector.extract_strided_slice %368 {offsets = [0, 0, 0], sizes = [1, 8, 8], strides = [1, 1, 1]} : vector<4x8x8xf32> to vector<1x8x8xf32>
    %370 = vector.shape_cast %369 : vector<1x8x8xf32> to vector<8x8xf32>
    %371 = vector.extract_strided_slice %308 {offsets = [0, 0], sizes = [8, 32], strides = [1, 1]} : vector<32x32xf32> to vector<8x32xf32>
    %cst_105 = arith.constant dense<0.000000e+00> : vector<8x32xf32>
    %372 = tpu.matmul %370, %371, %cst_105 {dimension_numbers = #tpu.dot_dimension_numbers<[1], [0], [0], [1], [0, 0, 1, 1], [], []>} : vector<8x8xf32>, vector<8x32xf32>, vector<8x32xf32> -> vector<8x32xf32>
    %373 = vector.broadcast %316 : vector<1x32xf32> to vector<8x32xf32>
    %374 = arith.addf %373, %372 : vector<8x32xf32>
    %375 = vector.extract_strided_slice %368 {offsets = [1, 0, 0], sizes = [1, 8, 8], strides = [1, 1, 1]} : vector<4x8x8xf32> to vector<1x8x8xf32>
    %376 = vector.shape_cast %375 : vector<1x8x8xf32> to vector<8x8xf32>
    %377 = vector.extract_strided_slice %308 {offsets = [8, 0], sizes = [8, 32], strides = [1, 1]} : vector<32x32xf32> to vector<8x32xf32>
    %cst_106 = arith.constant dense<0.000000e+00> : vector<8x32xf32>
    %378 = tpu.matmul %376, %377, %cst_106 {dimension_numbers = #tpu.dot_dimension_numbers<[1], [0], [0], [1], [0, 0, 1, 1], [], []>} : vector<8x8xf32>, vector<8x32xf32>, vector<8x32xf32> -> vector<8x32xf32>
    %379 = arith.addf %374, %378 : vector<8x32xf32>
    %380 = vector.extract_strided_slice %368 {offsets = [2, 0, 0], sizes = [1, 8, 8], strides = [1, 1, 1]} : vector<4x8x8xf32> to vector<1x8x8xf32>
    %381 = vector.shape_cast %380 : vector<1x8x8xf32> to vector<8x8xf32>
    %382 = vector.extract_strided_slice %308 {offsets = [16, 0], sizes = [8, 32], strides = [1, 1]} : vector<32x32xf32> to vector<8x32xf32>
    %cst_107 = arith.constant dense<0.000000e+00> : vector<8x32xf32>
    %383 = tpu.matmul %381, %382, %cst_107 {dimension_numbers = #tpu.dot_dimension_numbers<[1], [0], [0], [1], [0, 0, 1, 1], [], []>} : vector<8x8xf32>, vector<8x32xf32>, vector<8x32xf32> -> vector<8x32xf32>
    %384 = arith.addf %379, %383 : vector<8x32xf32>
    %385 = vector.extract_strided_slice %368 {offsets = [3, 0, 0], sizes = [1, 8, 8], strides = [1, 1, 1]} : vector<4x8x8xf32> to vector<1x8x8xf32>
    %386 = vector.shape_cast %385 : vector<1x8x8xf32> to vector<8x8xf32>
    %387 = vector.extract_strided_slice %308 {offsets = [24, 0], sizes = [8, 32], strides = [1, 1]} : vector<32x32xf32> to vector<8x32xf32>
    %cst_108 = arith.constant dense<0.000000e+00> : vector<8x32xf32>
    %388 = tpu.matmul %386, %387, %cst_108 {dimension_numbers = #tpu.dot_dimension_numbers<[1], [0], [0], [1], [0, 0, 1, 1], [], []>} : vector<8x8xf32>, vector<8x32xf32>, vector<8x32xf32> -> vector<8x32xf32>
    %389 = arith.addf %384, %388 : vector<8x32xf32>
    %390 = arith.addf %304, %389 : vector<8x32xf32>
    %cst_109 = arith.constant dense<0.000000e+00> : vector<8xf32>
    %391 = vector.multi_reduction <add>, %390, %cst_109 [1] : vector<8x32xf32> to vector<8xf32>
    %392 = vector.shape_cast %391 : vector<8xf32> to vector<8x1xf32>
    %cst_110 = arith.constant 3.200000e+01 : f32
    %393 = vector.broadcast %cst_110 : f32 to vector<8x1xf32>
    %394 = arith.divf %392, %393 : vector<8x1xf32>
    %395 = vector.broadcast %394 : vector<8x1xf32> to vector<8x32xf32>
    %396 = arith.subf %390, %395 : vector<8x32xf32>
    %397 = arith.mulf %396, %396 : vector<8x32xf32>
    %cst_111 = arith.constant dense<0.000000e+00> : vector<8xf32>
    %398 = vector.multi_reduction <add>, %397, %cst_111 [1] : vector<8x32xf32> to vector<8xf32>
    %399 = vector.shape_cast %398 : vector<8xf32> to vector<8x1xf32>
    %cst_112 = arith.constant 3.200000e+01 : f32
    %400 = vector.broadcast %cst_112 : f32 to vector<8x1xf32>
    %401 = arith.divf %399, %400 : vector<8x1xf32>
    %402 = vector.broadcast %394 : vector<8x1xf32> to vector<8x32xf32>
    %403 = arith.subf %390, %402 : vector<8x32xf32>
    %cst_113 = arith.constant 1.000000e-07 : f32
    %404 = vector.broadcast %cst_113 : f32 to vector<8x1xf32>
    %405 = arith.addf %401, %404 : vector<8x1xf32>
    %406 = math.rsqrt %405 : vector<8x1xf32>
    %407 = vector.broadcast %406 : vector<8x1xf32> to vector<8x32xf32>
    %408 = arith.mulf %403, %407 : vector<8x32xf32>
    %409 = vector.broadcast %317 : vector<1x32xf32> to vector<8x32xf32>
    %410 = arith.mulf %408, %409 : vector<8x32xf32>
    %411 = vector.broadcast %318 : vector<1x32xf32> to vector<8x32xf32>
    %412 = arith.addf %410, %411 : vector<8x32xf32>
    %cst_114 = arith.constant dense<0.000000e+00> : vector<8x64xf32>
    %413 = tpu.matmul %412, %310, %cst_114 {dimension_numbers = #tpu.dot_dimension_numbers<[1], [0], [0], [1], [0, 0, 1, 1], [], []>} : vector<8x32xf32>, vector<32x64xf32>, vector<8x64xf32> -> vector<8x64xf32>
    %414 = vector.broadcast %319 : vector<1x64xf32> to vector<8x64xf32>
    %415 = arith.addf %413, %414 : vector<8x64xf32>
    %cst_115 = arith.constant 5.000000e-01 : f32
    %416 = vector.broadcast %cst_115 : f32 to vector<8x64xf32>
    %417 = arith.mulf %416, %415 : vector<8x64xf32>
    %cst_116 = arith.constant 4.471500e-02 : f32
    %418 = vector.broadcast %cst_116 : f32 to vector<8x64xf32>
    %419 = arith.mulf %418, %415 : vector<8x64xf32>
    %420 = arith.mulf %419, %415 : vector<8x64xf32>
    %421 = arith.mulf %420, %415 : vector<8x64xf32>
    %422 = arith.addf %415, %421 : vector<8x64xf32>
    %cst_117 = arith.constant 0.797884583 : f32
    %423 = vector.broadcast %cst_117 : f32 to vector<8x64xf32>
    %424 = arith.mulf %423, %422 : vector<8x64xf32>
    %425 = math.tanh %424 : vector<8x64xf32>
    %cst_118 = arith.constant 1.000000e+00 : f32
    %426 = vector.broadcast %cst_118 : f32 to vector<8x64xf32>
    %427 = arith.addf %426, %425 : vector<8x64xf32>
    %428 = arith.mulf %417, %427 : vector<8x64xf32>
    %cst_119 = arith.constant dense<0.000000e+00> : vector<8x32xf32>
    %429 = tpu.matmul %428, %312, %cst_119 {dimension_numbers = #tpu.dot_dimension_numbers<[1], [0], [0], [1], [0, 0, 1, 1], [], []>} : vector<8x64xf32>, vector<64x32xf32>, vector<8x32xf32> -> vector<8x32xf32>
    %430 = vector.broadcast %320 : vector<1x32xf32> to vector<8x32xf32>
    %431 = arith.addf %429, %430 : vector<8x32xf32>
    %432 = arith.addf %412, %431 : vector<8x32xf32>
    %cst_120 = arith.constant dense<0.000000e+00> : vector<8xf32>
    %433 = vector.multi_reduction <add>, %432, %cst_120 [1] : vector<8x32xf32> to vector<8xf32>
    %434 = vector.shape_cast %433 : vector<8xf32> to vector<8x1xf32>
    %cst_121 = arith.constant 3.200000e+01 : f32
    %435 = vector.broadcast %cst_121 : f32 to vector<8x1xf32>
    %436 = arith.divf %434, %435 : vector<8x1xf32>
    %437 = vector.broadcast %436 : vector<8x1xf32> to vector<8x32xf32>
    %438 = arith.subf %432, %437 : vector<8x32xf32>
    %439 = arith.mulf %438, %438 : vector<8x32xf32>
    %cst_122 = arith.constant dense<0.000000e+00> : vector<8xf32>
    %440 = vector.multi_reduction <add>, %439, %cst_122 [1] : vector<8x32xf32> to vector<8xf32>
    %441 = vector.shape_cast %440 : vector<8xf32> to vector<8x1xf32>
    %cst_123 = arith.constant 3.200000e+01 : f32
    %442 = vector.broadcast %cst_123 : f32 to vector<8x1xf32>
    %443 = arith.divf %441, %442 : vector<8x1xf32>
    %444 = vector.broadcast %436 : vector<8x1xf32> to vector<8x32xf32>
    %445 = arith.subf %432, %444 : vector<8x32xf32>
    %cst_124 = arith.constant 1.000000e-07 : f32
    %446 = vector.broadcast %cst_124 : f32 to vector<8x1xf32>
    %447 = arith.addf %443, %446 : vector<8x1xf32>
    %448 = math.rsqrt %447 : vector<8x1xf32>
    %449 = vector.broadcast %448 : vector<8x1xf32> to vector<8x32xf32>
    %450 = arith.mulf %445, %449 : vector<8x32xf32>
    %451 = vector.broadcast %321 : vector<1x32xf32> to vector<8x32xf32>
    %452 = arith.mulf %450, %451 : vector<8x32xf32>
    %453 = vector.broadcast %322 : vector<1x32xf32> to vector<8x32xf32>
    %454 = arith.addf %452, %453 : vector<8x32xf32>
    %c3 = arith.constant 3 : index
    %c0_125 = arith.constant 0 : index
    %c0_126 = arith.constant 0 : index
    %455 = vector.load %arg3[%c3, %c0_125, %c0_126] : memref<4x32x96xf32, #tpu.memory_space<vmem>>, vector<1x32x96xf32>
    %456 = vector.shape_cast %455 : vector<1x32x96xf32> to vector<32x96xf32>
    %c3_127 = arith.constant 3 : index
    %c0_128 = arith.constant 0 : index
    %c0_129 = arith.constant 0 : index
    %457 = vector.load %arg4[%c3_127, %c0_128, %c0_129] : memref<4x32x32xf32, #tpu.memory_space<vmem>>, vector<1x32x32xf32>
    %458 = vector.shape_cast %457 : vector<1x32x32xf32> to vector<32x32xf32>
    %c3_130 = arith.constant 3 : index
    %c0_131 = arith.constant 0 : index
    %c0_132 = arith.constant 0 : index
    %459 = vector.load %arg5[%c3_130, %c0_131, %c0_132] : memref<4x32x64xf32, #tpu.memory_space<vmem>>, vector<1x32x64xf32>
    %460 = vector.shape_cast %459 : vector<1x32x64xf32> to vector<32x64xf32>
    %c3_133 = arith.constant 3 : index
    %c0_134 = arith.constant 0 : index
    %c0_135 = arith.constant 0 : index
    %461 = vector.load %arg6[%c3_133, %c0_134, %c0_135] : memref<4x64x32xf32, #tpu.memory_space<vmem>>, vector<1x64x32xf32>
    %462 = vector.shape_cast %461 : vector<1x64x32xf32> to vector<64x32xf32>
    %c3_136 = arith.constant 3 : index
    %c0_137 = arith.constant 0 : index
    %c0_138 = arith.constant 0 : index
    %463 = vector.load %arg7[%c3_136, %c0_137, %c0_138] : memref<4x8x128xf32, #tpu.memory_space<vmem>>, vector<1x8x128xf32>
    %464 = vector.shape_cast %463 : vector<1x8x128xf32> to vector<8x128xf32>
    %465 = vector.extract_strided_slice %464 {offsets = [0, 0], sizes = [1, 96], strides = [1, 1]} : vector<8x128xf32> to vector<1x96xf32>
    %466 = vector.extract_strided_slice %464 {offsets = [1, 0], sizes = [1, 32], strides = [1, 1]} : vector<8x128xf32> to vector<1x32xf32>
    %467 = vector.extract_strided_slice %464 {offsets = [2, 0], sizes = [1, 32], strides = [1, 1]} : vector<8x128xf32> to vector<1x32xf32>
    %468 = vector.extract_strided_slice %464 {offsets = [3, 0], sizes = [1, 32], strides = [1, 1]} : vector<8x128xf32> to vector<1x32xf32>
    %469 = vector.extract_strided_slice %464 {offsets = [4, 0], sizes = [1, 64], strides = [1, 1]} : vector<8x128xf32> to vector<1x64xf32>
    %470 = vector.extract_strided_slice %464 {offsets = [5, 0], sizes = [1, 32], strides = [1, 1]} : vector<8x128xf32> to vector<1x32xf32>
    %471 = vector.extract_strided_slice %464 {offsets = [6, 0], sizes = [1, 32], strides = [1, 1]} : vector<8x128xf32> to vector<1x32xf32>
    %472 = vector.extract_strided_slice %464 {offsets = [7, 0], sizes = [1, 32], strides = [1, 1]} : vector<8x128xf32> to vector<1x32xf32>
    %cst_139 = arith.constant dense<0.000000e+00> : vector<8x96xf32>
    %473 = tpu.matmul %454, %456, %cst_139 {dimension_numbers = #tpu.dot_dimension_numbers<[1], [0], [0], [1], [0, 0, 1, 1], [], []>} : vector<8x32xf32>, vector<32x96xf32>, vector<8x96xf32> -> vector<8x96xf32>
    %474 = vector.broadcast %465 : vector<1x96xf32> to vector<8x96xf32>
    %475 = arith.addf %473, %474 : vector<8x96xf32>
    %476 = vector.extract_strided_slice %475 {offsets = [0, 0], sizes = [8, 8], strides = [1, 1]} : vector<8x96xf32> to vector<8x8xf32>
    %477 = vector.shape_cast %476 : vector<8x8xf32> to vector<1x8x8xf32>
    %478 = vector.extract_strided_slice %475 {offsets = [0, 8], sizes = [8, 8], strides = [1, 1]} : vector<8x96xf32> to vector<8x8xf32>
    %479 = vector.shape_cast %478 : vector<8x8xf32> to vector<1x8x8xf32>
    %480 = vector.extract_strided_slice %475 {offsets = [0, 16], sizes = [8, 8], strides = [1, 1]} : vector<8x96xf32> to vector<8x8xf32>
    %481 = vector.shape_cast %480 : vector<8x8xf32> to vector<1x8x8xf32>
    %482 = vector.extract_strided_slice %475 {offsets = [0, 24], sizes = [8, 8], strides = [1, 1]} : vector<8x96xf32> to vector<8x8xf32>
    %483 = vector.shape_cast %482 : vector<8x8xf32> to vector<1x8x8xf32>
    %484 = tpu.concatenate %477, %479, %481, %483 in 0 : vector<1x8x8xf32>, vector<1x8x8xf32>, vector<1x8x8xf32>, vector<1x8x8xf32> -> vector<4x8x8xf32>
    %485 = vector.extract_strided_slice %475 {offsets = [0, 32], sizes = [8, 8], strides = [1, 1]} : vector<8x96xf32> to vector<8x8xf32>
    %486 = vector.shape_cast %485 : vector<8x8xf32> to vector<1x8x8xf32>
    %487 = vector.extract_strided_slice %475 {offsets = [0, 40], sizes = [8, 8], strides = [1, 1]} : vector<8x96xf32> to vector<8x8xf32>
    %488 = vector.shape_cast %487 : vector<8x8xf32> to vector<1x8x8xf32>
    %489 = vector.extract_strided_slice %475 {offsets = [0, 48], sizes = [8, 8], strides = [1, 1]} : vector<8x96xf32> to vector<8x8xf32>
    %490 = vector.shape_cast %489 : vector<8x8xf32> to vector<1x8x8xf32>
    %491 = vector.extract_strided_slice %475 {offsets = [0, 56], sizes = [8, 8], strides = [1, 1]} : vector<8x96xf32> to vector<8x8xf32>
    %492 = vector.shape_cast %491 : vector<8x8xf32> to vector<1x8x8xf32>
    %493 = tpu.concatenate %486, %488, %490, %492 in 0 : vector<1x8x8xf32>, vector<1x8x8xf32>, vector<1x8x8xf32>, vector<1x8x8xf32> -> vector<4x8x8xf32>
    %494 = vector.extract_strided_slice %475 {offsets = [0, 64], sizes = [8, 8], strides = [1, 1]} : vector<8x96xf32> to vector<8x8xf32>
    %495 = vector.shape_cast %494 : vector<8x8xf32> to vector<1x8x8xf32>
    %496 = vector.extract_strided_slice %475 {offsets = [0, 72], sizes = [8, 8], strides = [1, 1]} : vector<8x96xf32> to vector<8x8xf32>
    %497 = vector.shape_cast %496 : vector<8x8xf32> to vector<1x8x8xf32>
    %498 = vector.extract_strided_slice %475 {offsets = [0, 80], sizes = [8, 8], strides = [1, 1]} : vector<8x96xf32> to vector<8x8xf32>
    %499 = vector.shape_cast %498 : vector<8x8xf32> to vector<1x8x8xf32>
    %500 = vector.extract_strided_slice %475 {offsets = [0, 88], sizes = [8, 8], strides = [1, 1]} : vector<8x96xf32> to vector<8x8xf32>
    %501 = vector.shape_cast %500 : vector<8x8xf32> to vector<1x8x8xf32>
    %502 = tpu.concatenate %495, %497, %499, %501 in 0 : vector<1x8x8xf32>, vector<1x8x8xf32>, vector<1x8x8xf32>, vector<1x8x8xf32> -> vector<4x8x8xf32>
    "tpu.trace_start"() <{level = 10 : i32, message = "hqd,hkd->hqk"}> : () -> ()
    %cst_140 = arith.constant dense<0.000000e+00> : vector<4x8x8xf32>
    %503 = tpu.matmul %484, %493, %cst_140 {dimension_numbers = #tpu.dot_dimension_numbers<[2], [2], [1], [1], [0, 0, 0, 1, 1, 1], [0], [0]>} : vector<4x8x8xf32>, vector<4x8x8xf32>, vector<4x8x8xf32> -> vector<4x8x8xf32>
    "tpu.trace_stop"() : () -> ()
    %cst_141 = arith.constant 0.353553385 : f32
    %504 = vector.broadcast %cst_141 : f32 to vector<4x8x8xf32>
    %505 = arith.mulf %503, %504 : vector<4x8x8xf32>
    %506 = vector.broadcast %4 : vector<1x1x8xf32> to vector<4x8x8xf32>
    %507 = arith.addf %505, %506 : vector<4x8x8xf32>
    %cst_142 = arith.constant dense<0xFF800000> : vector<4x8xf32>
    %508 = vector.multi_reduction <maximumf>, %507, %cst_142 [2] : vector<4x8x8xf32> to vector<4x8xf32>
    %509 = vector.shape_cast %508 : vector<4x8xf32> to vector<4x8x1xf32>
    %510 = vector.broadcast %509 : vector<4x8x1xf32> to vector<4x8x8xf32>
    %511 = arith.subf %507, %510 : vector<4x8x8xf32>
    %512 = math.exp %511 : vector<4x8x8xf32>
    %cst_143 = arith.constant dense<0.000000e+00> : vector<4x8xf32>
    %513 = vector.multi_reduction <add>, %512, %cst_143 [2] : vector<4x8x8xf32> to vector<4x8xf32>
    %514 = vector.shape_cast %513 : vector<4x8xf32> to vector<4x8x1xf32>
    %515 = tpu.reciprocal %514 {approx = true} : vector<4x8x1xf32> -> vector<4x8x1xf32>
    %516 = vector.broadcast %515 : vector<4x8x1xf32> to vector<4x8x8xf32>
    %517 = arith.mulf %512, %516 : vector<4x8x8xf32>
    "tpu.trace_start"() <{level = 10 : i32, message = "hqk,hkd->hqd"}> : () -> ()
    %cst_144 = arith.constant dense<0.000000e+00> : vector<4x8x8xf32>
    %518 = tpu.matmul %517, %502, %cst_144 {dimension_numbers = #tpu.dot_dimension_numbers<[2], [1], [1], [2], [0, 0, 0, 1, 1, 2], [0], [0]>} : vector<4x8x8xf32>, vector<4x8x8xf32>, vector<4x8x8xf32> -> vector<4x8x8xf32>
    "tpu.trace_stop"() : () -> ()
    %519 = vector.extract_strided_slice %518 {offsets = [0, 0, 0], sizes = [1, 8, 8], strides = [1, 1, 1]} : vector<4x8x8xf32> to vector<1x8x8xf32>
    %520 = vector.shape_cast %519 : vector<1x8x8xf32> to vector<8x8xf32>
    %521 = vector.extract_strided_slice %458 {offsets = [0, 0], sizes = [8, 32], strides = [1, 1]} : vector<32x32xf32> to vector<8x32xf32>
    %cst_145 = arith.constant dense<0.000000e+00> : vector<8x32xf32>
    %522 = tpu.matmul %520, %521, %cst_145 {dimension_numbers = #tpu.dot_dimension_numbers<[1], [0], [0], [1], [0, 0, 1, 1], [], []>} : vector<8x8xf32>, vector<8x32xf32>, vector<8x32xf32> -> vector<8x32xf32>
    %523 = vector.broadcast %466 : vector<1x32xf32> to vector<8x32xf32>
    %524 = arith.addf %523, %522 : vector<8x32xf32>
    %525 = vector.extract_strided_slice %518 {offsets = [1, 0, 0], sizes = [1, 8, 8], strides = [1, 1, 1]} : vector<4x8x8xf32> to vector<1x8x8xf32>
    %526 = vector.shape_cast %525 : vector<1x8x8xf32> to vector<8x8xf32>
    %527 = vector.extract_strided_slice %458 {offsets = [8, 0], sizes = [8, 32], strides = [1, 1]} : vector<32x32xf32> to vector<8x32xf32>
    %cst_146 = arith.constant dense<0.000000e+00> : vector<8x32xf32>
    %528 = tpu.matmul %526, %527, %cst_146 {dimension_numbers = #tpu.dot_dimension_numbers<[1], [0], [0], [1], [0, 0, 1, 1], [], []>} : vector<8x8xf32>, vector<8x32xf32>, vector<8x32xf32> -> vector<8x32xf32>
    %529 = arith.addf %524, %528 : vector<8x32xf32>
    %530 = vector.extract_strided_slice %518 {offsets = [2, 0, 0], sizes = [1, 8, 8], strides = [1, 1, 1]} : vector<4x8x8xf32> to vector<1x8x8xf32>
    %531 = vector.shape_cast %530 : vector<1x8x8xf32> to vector<8x8xf32>
    %532 = vector.extract_strided_slice %458 {offsets = [16, 0], sizes = [8, 32], strides = [1, 1]} : vector<32x32xf32> to vector<8x32xf32>
    %cst_147 = arith.constant dense<0.000000e+00> : vector<8x32xf32>
    %533 = tpu.matmul %531, %532, %cst_147 {dimension_numbers = #tpu.dot_dimension_numbers<[1], [0], [0], [1], [0, 0, 1, 1], [], []>} : vector<8x8xf32>, vector<8x32xf32>, vector<8x32xf32> -> vector<8x32xf32>
    %534 = arith.addf %529, %533 : vector<8x32xf32>
    %535 = vector.extract_strided_slice %518 {offsets = [3, 0, 0], sizes = [1, 8, 8], strides = [1, 1, 1]} : vector<4x8x8xf32> to vector<1x8x8xf32>
    %536 = vector.shape_cast %535 : vector<1x8x8xf32> to vector<8x8xf32>
    %537 = vector.extract_strided_slice %458 {offsets = [24, 0], sizes = [8, 32], strides = [1, 1]} : vector<32x32xf32> to vector<8x32xf32>
    %cst_148 = arith.constant dense<0.000000e+00> : vector<8x32xf32>
    %538 = tpu.matmul %536, %537, %cst_148 {dimension_numbers = #tpu.dot_dimension_numbers<[1], [0], [0], [1], [0, 0, 1, 1], [], []>} : vector<8x8xf32>, vector<8x32xf32>, vector<8x32xf32> -> vector<8x32xf32>
    %539 = arith.addf %534, %538 : vector<8x32xf32>
    %540 = arith.addf %454, %539 : vector<8x32xf32>
    %cst_149 = arith.constant dense<0.000000e+00> : vector<8xf32>
    %541 = vector.multi_reduction <add>, %540, %cst_149 [1] : vector<8x32xf32> to vector<8xf32>
    %542 = vector.shape_cast %541 : vector<8xf32> to vector<8x1xf32>
    %cst_150 = arith.constant 3.200000e+01 : f32
    %543 = vector.broadcast %cst_150 : f32 to vector<8x1xf32>
    %544 = arith.divf %542, %543 : vector<8x1xf32>
    %545 = vector.broadcast %544 : vector<8x1xf32> to vector<8x32xf32>
    %546 = arith.subf %540, %545 : vector<8x32xf32>
    %547 = arith.mulf %546, %546 : vector<8x32xf32>
    %cst_151 = arith.constant dense<0.000000e+00> : vector<8xf32>
    %548 = vector.multi_reduction <add>, %547, %cst_151 [1] : vector<8x32xf32> to vector<8xf32>
    %549 = vector.shape_cast %548 : vector<8xf32> to vector<8x1xf32>
    %cst_152 = arith.constant 3.200000e+01 : f32
    %550 = vector.broadcast %cst_152 : f32 to vector<8x1xf32>
    %551 = arith.divf %549, %550 : vector<8x1xf32>
    %552 = vector.broadcast %544 : vector<8x1xf32> to vector<8x32xf32>
    %553 = arith.subf %540, %552 : vector<8x32xf32>
    %cst_153 = arith.constant 1.000000e-07 : f32
    %554 = vector.broadcast %cst_153 : f32 to vector<8x1xf32>
    %555 = arith.addf %551, %554 : vector<8x1xf32>
    %556 = math.rsqrt %555 : vector<8x1xf32>
    %557 = vector.broadcast %556 : vector<8x1xf32> to vector<8x32xf32>
    %558 = arith.mulf %553, %557 : vector<8x32xf32>
    %559 = vector.broadcast %467 : vector<1x32xf32> to vector<8x32xf32>
    %560 = arith.mulf %558, %559 : vector<8x32xf32>
    %561 = vector.broadcast %468 : vector<1x32xf32> to vector<8x32xf32>
    %562 = arith.addf %560, %561 : vector<8x32xf32>
    %cst_154 = arith.constant dense<0.000000e+00> : vector<8x64xf32>
    %563 = tpu.matmul %562, %460, %cst_154 {dimension_numbers = #tpu.dot_dimension_numbers<[1], [0], [0], [1], [0, 0, 1, 1], [], []>} : vector<8x32xf32>, vector<32x64xf32>, vector<8x64xf32> -> vector<8x64xf32>
    %564 = vector.broadcast %469 : vector<1x64xf32> to vector<8x64xf32>
    %565 = arith.addf %563, %564 : vector<8x64xf32>
    %cst_155 = arith.constant 5.000000e-01 : f32
    %566 = vector.broadcast %cst_155 : f32 to vector<8x64xf32>
    %567 = arith.mulf %566, %565 : vector<8x64xf32>
    %cst_156 = arith.constant 4.471500e-02 : f32
    %568 = vector.broadcast %cst_156 : f32 to vector<8x64xf32>
    %569 = arith.mulf %568, %565 : vector<8x64xf32>
    %570 = arith.mulf %569, %565 : vector<8x64xf32>
    %571 = arith.mulf %570, %565 : vector<8x64xf32>
    %572 = arith.addf %565, %571 : vector<8x64xf32>
    %cst_157 = arith.constant 0.797884583 : f32
    %573 = vector.broadcast %cst_157 : f32 to vector<8x64xf32>
    %574 = arith.mulf %573, %572 : vector<8x64xf32>
    %575 = math.tanh %574 : vector<8x64xf32>
    %cst_158 = arith.constant 1.000000e+00 : f32
    %576 = vector.broadcast %cst_158 : f32 to vector<8x64xf32>
    %577 = arith.addf %576, %575 : vector<8x64xf32>
    %578 = arith.mulf %567, %577 : vector<8x64xf32>
    %cst_159 = arith.constant dense<0.000000e+00> : vector<8x32xf32>
    %579 = tpu.matmul %578, %462, %cst_159 {dimension_numbers = #tpu.dot_dimension_numbers<[1], [0], [0], [1], [0, 0, 1, 1], [], []>} : vector<8x64xf32>, vector<64x32xf32>, vector<8x32xf32> -> vector<8x32xf32>
    %580 = vector.broadcast %470 : vector<1x32xf32> to vector<8x32xf32>
    %581 = arith.addf %579, %580 : vector<8x32xf32>
    %582 = arith.addf %562, %581 : vector<8x32xf32>
    %cst_160 = arith.constant dense<0.000000e+00> : vector<8xf32>
    %583 = vector.multi_reduction <add>, %582, %cst_160 [1] : vector<8x32xf32> to vector<8xf32>
    %584 = vector.shape_cast %583 : vector<8xf32> to vector<8x1xf32>
    %cst_161 = arith.constant 3.200000e+01 : f32
    %585 = vector.broadcast %cst_161 : f32 to vector<8x1xf32>
    %586 = arith.divf %584, %585 : vector<8x1xf32>
    %587 = vector.broadcast %586 : vector<8x1xf32> to vector<8x32xf32>
    %588 = arith.subf %582, %587 : vector<8x32xf32>
    %589 = arith.mulf %588, %588 : vector<8x32xf32>
    %cst_162 = arith.constant dense<0.000000e+00> : vector<8xf32>
    %590 = vector.multi_reduction <add>, %589, %cst_162 [1] : vector<8x32xf32> to vector<8xf32>
    %591 = vector.shape_cast %590 : vector<8xf32> to vector<8x1xf32>
    %cst_163 = arith.constant 3.200000e+01 : f32
    %592 = vector.broadcast %cst_163 : f32 to vector<8x1xf32>
    %593 = arith.divf %591, %592 : vector<8x1xf32>
    %594 = vector.broadcast %586 : vector<8x1xf32> to vector<8x32xf32>
    %595 = arith.subf %582, %594 : vector<8x32xf32>
    %cst_164 = arith.constant 1.000000e-07 : f32
    %596 = vector.broadcast %cst_164 : f32 to vector<8x1xf32>
    %597 = arith.addf %593, %596 : vector<8x1xf32>
    %598 = math.rsqrt %597 : vector<8x1xf32>
    %599 = vector.broadcast %598 : vector<8x1xf32> to vector<8x32xf32>
    %600 = arith.mulf %595, %599 : vector<8x32xf32>
    %601 = vector.broadcast %471 : vector<1x32xf32> to vector<8x32xf32>
    %602 = arith.mulf %600, %601 : vector<8x32xf32>
    %603 = vector.broadcast %472 : vector<1x32xf32> to vector<8x32xf32>
    %604 = arith.addf %602, %603 : vector<8x32xf32>
    %605 = tpu.concatenate %154, %304, %454, %604 in 1 : vector<8x32xf32>, vector<8x32xf32>, vector<8x32xf32>, vector<8x32xf32> -> vector<8x128xf32>
    %c0_165 = arith.constant 0 : index
    %c0_166 = arith.constant 0 : index
    %606 = vector.load %arg8[%c0_165, %c0_166] : memref<128x128xf32, #tpu.memory_space<vmem>>, vector<128x128xf32>
    %cst_167 = arith.constant dense<0.000000e+00> : vector<8x128xf32>
    %607 = tpu.matmul %605, %606, %cst_167 {dimension_numbers = #tpu.dot_dimension_numbers<[1], [0], [0], [1], [0, 0, 1, 1], [], []>} : vector<8x128xf32>, vector<128x128xf32>, vector<8x128xf32> -> vector<8x128xf32>
    %c0_168 = arith.constant 0 : index
    %c0_169 = arith.constant 0 : index
    %608 = vector.load %arg9[%c0_168, %c0_169] : memref<1x128xf32, #tpu.memory_space<vmem>>, vector<1x128xf32>
    %609 = vector.broadcast %608 : vector<1x128xf32> to vector<8x128xf32>
    %610 = arith.addf %607, %609 : vector<8x128xf32>
    %c0_170 = arith.constant 0 : index
    %c0_171 = arith.constant 0 : index
    %c0_172 = arith.constant 0 : index
    %611 = vector.load %arg12[%c0_170, %c0_171, %c0_172] : memref<1x8x128xf32, #tpu.memory_space<vmem>>, vector<1x8x128xf32>
    %612 = vector.shape_cast %611 : vector<1x8x128xf32> to vector<8x128xf32>
    %613 = vector.shape_cast %610 : vector<8x128xf32> to vector<1x8x128xf32>
    tpu.vector_store %arg12[%c0_170, %c0_171, %c0_172], %613 {strides = array<i32>} : memref<1x8x128xf32, #tpu.memory_space<vmem>>, vector<1x8x128xf32>,
    %614 = tpu.iota {dimensions = array<i32: 1>} : vector<8x128xi32>
    %c15_i32 = arith.constant 15 : i32
    %615 = vector.broadcast %c15_i32 : i32 to vector<8x128xi32>
    %616 = arith.cmpi slt, %614, %615 : vector<8x128xi32>
    %cst_173 = arith.constant -1.000000e+30 : f32
    %617 = vector.broadcast %cst_173 : f32 to vector<8x128xf32>
    %618 = arith.select %616, %610, %617 : vector<8x128xi1>, vector<8x128xf32>
    %cst_174 = arith.constant dense<0xFF800000> : vector<8xf32>
    %619 = vector.multi_reduction <maximumf>, %618, %cst_174 [1] : vector<8x128xf32> to vector<8xf32>
    %620 = vector.shape_cast %619 : vector<8xf32> to vector<8x1xf32>
    %621 = vector.broadcast %620 : vector<8x1xf32> to vector<8x128xf32>
    %622 = arith.subf %618, %621 : vector<8x128xf32>
    %623 = math.exp %622 : vector<8x128xf32>
    %cst_175 = arith.constant dense<0.000000e+00> : vector<8xf32>
    %624 = vector.multi_reduction <add>, %623, %cst_175 [1] : vector<8x128xf32> to vector<8xf32>
    %625 = vector.shape_cast %624 : vector<8xf32> to vector<8x1xf32>
    %626 = math.log %625 : vector<8x1xf32>
    %627 = arith.addf %620, %626 : vector<8x1xf32>
    %c0_176 = arith.constant 0 : index
    %c0_177 = arith.constant 0 : index
    %c0_178 = arith.constant 0 : index
    %628 = vector.load %arg10[%c0_176, %c0_177, %c0_178] : memref<1x8x1xi32, #tpu.memory_space<vmem>>, vector<1x8x1xi32>
    %629 = vector.shape_cast %628 : vector<1x8x1xi32> to vector<8x1xi32>
    %630 = vector.broadcast %629 : vector<8x1xi32> to vector<8x128xi32>
    %631 = arith.cmpi eq, %614, %630 : vector<8x128xi32>
    %cst_179 = arith.constant 0.000000e+00 : f32
    %632 = vector.broadcast %cst_179 : f32 to vector<8x128xf32>
    %633 = arith.select %631, %610, %632 : vector<8x128xi1>, vector<8x128xf32>
    %cst_180 = arith.constant dense<0.000000e+00> : vector<8xf32>
    %634 = vector.multi_reduction <add>, %633, %cst_180 [1] : vector<8x128xf32> to vector<8xf32>
    %635 = vector.shape_cast %634 : vector<8xf32> to vector<8x1xf32>
    %636 = arith.subf %627, %635 : vector<8x1xf32>
    %c0_181 = arith.constant 0 : index
    %c0_182 = arith.constant 0 : index
    %c0_183 = arith.constant 0 : index
    %637 = vector.load %arg11[%c0_181, %c0_182, %c0_183] : memref<1x8x1xf32, #tpu.memory_space<vmem>>, vector<1x8x1xf32>
    %638 = vector.shape_cast %637 : vector<1x8x1xf32> to vector<8x1xf32>
    %639 = arith.mulf %636, %638 : vector<8x1xf32>
    %640 = vector.shape_cast %639 : vector<8x1xf32> to vector<1x8x1xf32>
    %cst_184 = arith.constant dense<0.000000e+00> : vector<1xf32>
    %641 = vector.multi_reduction <add>, %640, %cst_184 [1, 2] : vector<1x8x1xf32> to vector<1xf32>
    %642 = vector.shape_cast %641 : vector<1xf32> to vector<1x1x1xf32>
    %643 = vector.extract %642[0, 0, 0] : f32 from vector<1x1x1xf32>
    %644 = vector.broadcast %643 : f32 to vector<1x1xf32>
    %c0_185 = arith.constant 0 : index
    %c0_186 = arith.constant 0 : index
    %c0_187 = arith.constant 0 : index
    %645 = vector.load %arg13[%c0_185, %c0_186, %c0_187] : memref<1x1x1xf32, #tpu.memory_space<vmem>>, vector<1x1x1xf32>
    %646 = vector.shape_cast %645 : vector<1x1x1xf32> to vector<1x1xf32>
    %647 = vector.shape_cast %644 : vector<1x1xf32> to vector<1x1x1xf32>
    tpu.vector_store %arg13[%c0_185, %c0_186, %c0_187], %647 {strides = array<i32>} : memref<1x1x1xf32, #tpu.memory_space<vmem>>, vector<1x1x1xf32>,
    return
  }
  func.func @transform_0(%arg0: i32) -> (i32, i32, i32) {
    %c0_i32 = arith.constant 0 : i32
    %c0_i32_0 = arith.constant 0 : i32
    %c0_i32_1 = arith.constant 0 : i32
    return %arg0, %c0_i32, %c0_i32_0 : i32, i32, i32
  }
  func.func @transform_1(%arg0: i32) -> (i32, i32, i32) {
    %c0_i32 = arith.constant 0 : i32
    %c0_i32_0 = arith.constant 0 : i32
    %c0_i32_1 = arith.constant 0 : i32
    return %arg0, %c0_i32, %c0_i32_0 : i32, i32, i32
  }
  func.func @transform_2(%arg0: i32) -> (i32, i32, i32) {
    %c0_i32 = arith.constant 0 : i32
    %c0_i32_0 = arith.constant 0 : i32
    %c0_i32_1 = arith.constant 0 : i32
    %c0_i32_2 = arith.constant 0 : i32
    return %c0_i32, %c0_i32_0, %c0_i32_1 : i32, i32, i32
  }
  func.func @transform_3(%arg0: i32) -> (i32, i32, i32) {
    %c0_i32 = arith.constant 0 : i32
    %c0_i32_0 = arith.constant 0 : i32
    %c0_i32_1 = arith.constant 0 : i32
    %c0_i32_2 = arith.constant 0 : i32
    return %c0_i32, %c0_i32_0, %c0_i32_1 : i32, i32, i32
  }
  func.func @transform_4(%arg0: i32) -> (i32, i32, i32) {
    %c0_i32 = arith.constant 0 : i32
    %c0_i32_0 = arith.constant 0 : i32
    %c0_i32_1 = arith.constant 0 : i32
    %c0_i32_2 = arith.constant 0 : i32
    return %c0_i32, %c0_i32_0, %c0_i32_1 : i32, i32, i32
  }
  func.func @transform_5(%arg0: i32) -> (i32, i32, i32) {
    %c0_i32 = arith.constant 0 : i32
    %c0_i32_0 = arith.constant 0 : i32
    %c0_i32_1 = arith.constant 0 : i32
    %c0_i32_2 = arith.constant 0 : i32
    return %c0_i32, %c0_i32_0, %c0_i32_1 : i32, i32, i32
  }
  func.func @transform_6(%arg0: i32) -> (i32, i32, i32) {
    %c0_i32 = arith.constant 0 : i32
    %c0_i32_0 = arith.constant 0 : i32
    %c0_i32_1 = arith.constant 0 : i32
    %c0_i32_2 = arith.constant 0 : i32
    return %c0_i32, %c0_i32_0, %c0_i32_1 : i32, i32, i32
  }
  func.func @transform_7(%arg0: i32) -> (i32, i32) {
    %c0_i32 = arith.constant 0 : i32
    %c0_i32_0 = arith.constant 0 : i32
    %c0_i32_1 = arith.constant 0 : i32
    return %c0_i32, %c0_i32_0 : i32, i32
  }
  func.func @transform_8(%arg0: i32) -> (i32, i32) {
    %c0_i32 = arith.constant 0 : i32
    %c0_i32_0 = arith.constant 0 : i32
    %c0_i32_1 = arith.constant 0 : i32
    return %c0_i32, %c0_i32_0 : i32, i32
  }
  func.func @transform_9(%arg0: i32) -> (i32, i32, i32) {
    %c0_i32 = arith.constant 0 : i32
    %c0_i32_0 = arith.constant 0 : i32
    %c0_i32_1 = arith.constant 0 : i32
    return %arg0, %c0_i32, %c0_i32_0 : i32, i32, i32
  }
  func.func @transform_10(%arg0: i32) -> (i32, i32, i32) {
    %c0_i32 = arith.constant 0 : i32
    %c0_i32_0 = arith.constant 0 : i32
    %c0_i32_1 = arith.constant 0 : i32
    return %arg0, %c0_i32, %c0_i32_0 : i32, i32, i32
  }
  func.func @transform_11(%arg0: i32) -> (i32, i32, i32) {
    %c0_i32 = arith.constant 0 : i32
    %c0_i32_0 = arith.constant 0 : i32
    %c0_i32_1 = arith.constant 0 : i32
    return %arg0, %c0_i32, %c0_i32_0 : i32, i32, i32
  }
  func.func @transform_12(%arg0: i32) -> (i32, i32, i32) {
    %c0_i32 = arith.constant 0 : i32
    %c0_i32_0 = arith.constant 0 : i32
    %c0_i32_1 = arith.constant 0 : i32
    return %arg0, %c0_i32, %c0_i32_0 : i32, i32, i32
  }
}

</mosaic_0001>

<bundles_post_ra>
// kernel: entity_model_forward.1
= control target key start
LH: loop header
LB: loop body
LE: loop exit
PB: predicated region body
PF: predicated region fallthrough
CT: control target
= control target key end

     0   :  { %s8070_s0 = inlined_call_operand.vmem [shape: f32[2,8,32], index: 0, kind: input, shape index: {}]   ;;  %s8071_s1 = inlined_call_operand.vmem [shape: f32[2,1,8], index: 1, kind: input, shape index: {}]   ;;  %s8072_s2 = inlined_call_operand.vmem [shape: f32[4,32,96], index: 2, kind: input, shape index: {}]   ;;  %s8073_s3 = inlined_call_operand.vmem [shape: f32[4,32,32], index: 3, kind: input, shape index: {}]   ;;  %s8074_s4 = inlined_call_operand.vmem [shape: f32[4,32,64], index: 4, kind: input, shape index: {}]   ;;  %s8075_s5 = inlined_call_operand.vmem [shape: f32[4,64,32], index: 5, kind: input, shape index: {}]   ;;  %s8076_s6 = inlined_call_operand.vmem [shape: f32[4,8,128], index: 6, kind: input, shape index: {}]   ;;  %s8077_s7 = inlined_call_operand.vmem [shape: f32[128,128], index: 7, kind: input, shape index: {}]   ;;  %s8078_s8 = inlined_call_operand.vmem [shape: f32[1,128], index: 8, kind: input, shape index: {}]   ;;  %s8079_s9 = inlined_call_operand.vmem [shape: s32[2,8,1], index: 9, kind: input, shape index: {}]   ;;  %s8080_s10 = inlined_call_operand.vmem [shape: f32[2,8,1], index: 10, kind: input, shape index: {}]   ;;  %s8081_s11 = inlined_call_operand.hbm [shape: f32[2,8,128], index: 11, kind: output, shape index: {0}]   ;;  %s8082_s12 = inlined_call_operand.vmem [shape: f32[2,1,1], index: 12, kind: output, shape index: {1}]  }
   0x1   :  { %8099 = sst [smem:[#allocation11_spill]] %s8070_s0 }
   0x2   :  { %8100 = sst [smem:[#allocation12_spill]] %s8071_s1 }
   0x3   :  { %18 = vsyncpa [#allocation3], 0 }
   0x4   :  { %20 = vsyncpa [#allocation3 + $0x1], 0  ;;  %s7061_s21 = smov 0   ;;  %s7063_s22 = smov 0  }
   0x5   :  { %s7065_s23 = smov 0   ;;  %s7067_s24 = smov 0  }
   0x6 LB: > { %8101 = sst [smem:[#allocation5_spill]] %s6971_s21  ;;  %s7082_s25 = sadd.s32 4294967295, %s6983_s24   ;;  %s6983_s24 = sphi %s7067_s24, %s8119_s24   ;;  %s6979_s23 = sphi %s7065_s23, %s8121_s23   ;;  %s6975_s22 = sphi %s7063_s22, %s8123_s22   ;;  %s6971_s21 = sphi %s7061_s21, %s8122_s21  }
   0x7   : > { %8102 = sst [smem:[#allocation6_spill]] %s6979_s23  ;;  %s5875_s26 = sadd.s32 4294967294, %s6983_s24  }
   0x8   : > { %8103 = sst [smem:[#allocation7_spill]] %s6983_s24  ;;  %s7086_s27 = sadd.s32 1, %s6983_s24  }
   0x9   : > { %8104 = sst [smem:[#allocation8_spill]] %s7086_s27  ;;  %s284_s28 = sadd.s32 1, %s6979_s23 }
   0xa   : > { %s281_s29 = ssub.s32 %s6983_s24, %s7086_s27  ;;  %p294_p0 = scmp.ne.s32.totalorder %s6979_s23, %s6975_s22 }
   0xb   : > { %p282_p1 = scmp.eq.s32.totalorder %s281_s29, 0  ;;  %p295_p2 = scmp.eq.s32.totalorder %s7082_s25, 1 }
   0xc   : > { %p300_p3 = scmp.ne.s32.totalorder %s6975_s22, %s6971_s21  ;;  %p301_p4 = scmp.eq.s32.totalorder %s5875_s26, 1 }
   0xd   : > { %s7097_s30 = scalar_select %p282_p1, %s6979_s23, %s284_s28  }
   0xe   : > { %p7099_p5 = por %p295_p2, %p294_p0  ;;  %p7103_p6 = por %p301_p4, %p300_p3 }
   0xf   : > { %8105 = sst [smem:[#allocation9_spill]] %s7097_s30  ;;  %p5878_p7 = scmp.ge.s32.totalorder %s6983_s24, 1 }
  0x10   : > { %s8107_s14 = scalar_select %p7103_p6, 1, 0 }
  0x11   : > { %p393_p8 = scmp.lt.s32.totalorder %s6983_s24, 3 }
  0x12   : > { %8108 = sst [smem:[#allocation10_spill]] %s8107_s14 }
  0x13   : > { %p394_p9 = pnand %p5878_p7, %p393_p8 }
  0x14   : > { %v468_v0 = vld [vmem:[%s8072_s2] sm:$0xff] (!%p394_p9)  ;;  %v469_v1 = vld [vmem:[%s8072_s2 + $0x8] sm:$0xff] (!%p394_p9)  ;;  %v470_v2 = vld [vmem:[%s8072_s2 + $0x10] sm:$0xff] (!%p394_p9)  ;;  %v6985_v3 = vmov (!%p394_p9), 0.0|0.0   ;;  %vm6986_vm0 = vmmov (!%p394_p9), 0   ;;  %v6987_v6 = vmov (!%p394_p9), 0.0   ;;  %v489_v9 = vlaneseq (!%p394_p9) }
  0x15   : > { %397 = sbr.rel (%p394_p9) target bundleno = 10858 (0x2a6a), region = 64  ;;  %6656 = vmatprep.subr.bf16.mxu1 (!%p394_p9), %v6985_v3  ;;  %v6657_v4 = vpack.c.bf16 (!%p394_p9), %v469_v1, %v468_v0  ;;  %v471_v5 = vld [vmem:[%s8072_s2 + $0x18] sm:$0xff] (!%p394_p9)  ;;  %6225 = vmatprep.mubr.msk.f32.mxu1 (!%p394_p9), %vm6986_vm0, %v6987_v6  ;;  %p448_p10 = scmp.lt.s32.totalorder (!%p394_p9), %s7082_s25, 1  ;;  %vm493_vm1 = vcmask (!%p394_p9), 261120   ;;  %v7155_v12 = vld [vmem:[%s8076_s6] sm:$0xff] (!%p394_p9)  ;;  %vm576_vm2 = vcmask (!%p394_p9), 64512  }
  0x16   : > { %6248 = vmatprep.subr.mxu0 (!%p394_p9), %v6987_v6  ;;  %6250 = vmatprep.mubr.msk.f32.mxu0 (!%p394_p9), %vm6986_vm0, %v6987_v6  ;;  %v6660_v7 = vpack.c.bf16 (!%p394_p9), %v471_v5, %v470_v2  ;;  %s8109_s0 = sld [smem:[#allocation11_spill]] (!%p394_p9)  ;;  %v7147_v10 = vshrl.u32 (!%p394_p9), %v489_v9, 7  ;;  %s8087_s26 = smov (!%p394_p9), 104   ;;  %vm1656_vm3 = vcmask (!%p394_p9), 523264   ;;  %vm5609_vm4 = vcmask (!%p394_p9), 785408  }
  0x17   : > { %6658 = vmatpush3.bf16.msra.mxu1 (!%p394_p9), %v6657_v4  ;;  %s8089_s28 = smov (!%p394_p9), 120   ;;  %s8085_s16 = smov (!%p394_p9), 96   ;;  %vm5730_vm7 = vcmask (!%p394_p9), 7168  }
  0x18   : > { %6659 = vmatprep.subr.bf16.mxu1 (!%p394_p9), %v6985_v3  ;;  %v7150_v11 = vsub.s32 (!%p394_p9), 0, %v7147_v10  ;;  %s8091_s17 = smov (!%p394_p9), 112   ;;  %s8110_s1 = sld [smem:[#allocation12_spill]] (!%p394_p9) }
  0x1a   : > { %v492_v13 = vrot.slane (!%p394_p9), %v7155_v12, %v7150_v11 }
  0x1b   : > { %6661 = vmatpush3.bf16.msra.mxu1 (!%p394_p9), %v6660_v7 }
  0x1c   : > { %s7129_s29 = scalar_select %p448_p10, %s7082_s25, 1  ;;  %6228 = vmatprep.subr.mxu1 %v6987_v6 }
  0x1e   : > { %s7133_s15 = sshll.u32 %s7129_s29, 3  ;;  %s7205_s20 = scalar_lea.vmem %s8110_s1, %s7129_s29 }
  0x1f   : > { %s451_s18 = scalar_lea.vmem %s8109_s0, %s7133_s15  ;;  %v7208_v24 = vld [vmem:[%s7205_s20] ss:$0 sm:$0xff]  ;;  %s8112_s0 = smov 120  }
  0x20   : > { %v7139_v8 = vld [vmem:[%s451_s18] sm:$0xff]  ;;  %s8083_s18 = smov 64   ;;  %s8113_s1 = smov 104  }
  0x21   : > { %6226 = vmatmul.mubr.msk.f32.vlgmr.msra.gmra.mrb[0].mxu1 %vm493_vm1, %v7139_v8  ;;  %s462_s14 = scalar_lea.vmem %s8080_s10, %s7133_s15 }
  0x22   : > { %6230 = vmatprep.mubr.msk.f32.mxu1 %vm6986_vm0, %v6987_v6 }
  0xf4   : > { %v563_v14 = vpop.f32.mrb[0].mxu1 }
  0xf5   : > { %v7159_v15 = vadd.f32 %v563_v14, %v492_v13  ;;  %v6227_v16 = vpop.f32.mrb[1].mxu1 }
  0xf7   : > { %572 = vrot.lane.b32.xlu1 %v7159_v15, %s8087_s26  ;;  %568 = vrot.lane.b32.xlu0 %v7159_v15, %s8089_s28  ;;  %s8111_s26 = smov 112   ;;  %s8115_s28 = smov 64  }
  0xfb   : > { %574 = vrot.lane.b32.xlu1 %v7159_v15, %s8085_s16  ;;  %570 = vrot.lane.b32.xlu0 %v7159_v15, %s8091_s17  ;;  %s8114_s17 = smov 96  }
 0x169   : > { %v7169_v17 = vpop.permute.xlu1 %572  ;;  %v569_v18 = vpop.permute.xlu0 %568 }
 0x16a   : > { %651 = vrot.lane.b32.xlu0 %v569_v18, %s8085_s16 }
 0x16d   : > { %v575_v19 = vpop.permute.xlu1 %574  ;;  %v7172_v20 = vpop.permute.xlu0 %570 }
 0x16e   : > { %6229 = vmatpush3.xpose.msk.msra.mxu1 %vm576_vm2, %v575_v19  ;;  %803 = vrot.lane.b32.xlu0 %v7169_v17, %s8085_s16 }
 0x16f   : > { %727 = vrot.lane.b32.xlu1 %v7172_v20, %s8085_s16  ;;  %6233 = vmatprep.subr.mxu1 %v6987_v6  ;;  %s6025_s16 = sshll.u32 %s7082_s25, 7 }
 0x171   : > { %6231 = vmatmul.mubr.msk.f32.vlgmr.msra.gmra.mrb[2].mxu1 %vm576_vm2, %v7159_v15 }
 0x172   : > { %6235 = vmatprep.mubr.msk.f32.mxu1 %vm6986_vm0, %v6987_v6 }
 0x1dc   : > { %v652_v21 = vpop.permute.xlu0 %651 }
 0x1dd   : > { %6234 = vmatpush3.xpose.msk.msra.mxu1 %vm576_vm2, %v652_v21 }
 0x1de   : > { %6238 = vmatprep.subr.mxu1 %v6987_v6 }
 0x1e0   : > { %6236 = vmatmul.mubr.msk.f32.vlgmr.msra.gmra.mrb[4].mxu1 %vm576_vm2, %v569_v18  ;;  %v804_v23 = vpop.permute.xlu0 %803 }
 0x1e1   : > { %v728_v22 = vpop.permute.xlu1 %727  ;;  %6240 = vmatprep.mubr.msk.f32.mxu1 %vm6986_vm0, %v6987_v6 }
 0x1e2   : > { %6239 = vmatpush3.xpose.msk.msra.mxu1 %vm576_vm2, %v728_v22  ;;  %v472_v22 = vld [vmem:[%s8073_s3] sm:$0xff] }
 0x1e3   : > { %6243 = vmatprep.subr.mxu1 %v6987_v6 }
 0x1e5   : > { %6241 = vmatmul.mubr.msk.f32.vlgmr.msra.gmra.mrb[6].mxu1 %vm576_vm2, %v7172_v20 }
 0x1e6   : > { %6244 = vmatpush3.xpose.msk.msra.mxu1 %vm576_vm2, %v804_v23  ;;  %6245 = vmatprep.mubr.msk.f32.mxu1 %vm6986_vm0, %v6987_v6 }
 0x1e7   : > { %6253 = vmatprep.subr.mxu1 %v6987_v6 }
 0x1e9   : > { %6246 = vmatmul.mubr.msk.f32.vlgmr.msra.gmra.mrb[8].mxu1 %vm576_vm2, %v7169_v17 }
 0x1ea   : > { %6255 = vmatprep.mubr.msk.f32.mxu1 %vm6986_vm0, %v6987_v6 }
 0x244   : > { %v647_v25 = vpop.f32.mrb[2].mxu1 }
 0x245   : > { %v879_v26 = vmul.f32 0.35355338, %v647_v25  ;;  %v6232_v27 = vpop.f32.mrb[3].mxu1 }
 0x246   : > { %v474_v27 = vld [vmem:[%s8073_s3 + $0x10] sm:$0xff] }
 0x247   : > { %v889_v28 = vadd.f32 %v7208_v24, %v879_v26  ;;  %v473_v26 = vld [vmem:[%s8073_s3 + $0x8] sm:$0xff] }
 0x249   : > { %v893_v29 = vsel %vm576_vm2, %v889_v28, -inf }
 0x24a   : > { %894 = vmax.xlane.f32.xlu1 %v893_v29 }
 0x2b3   : > { %v723_v30 = vpop.f32.mrb[4].mxu1 }
 0x2b4   : > { %v880_v31 = vmul.f32 0.35355338, %v723_v30  ;;  %v6237_v32 = vpop.f32.mrb[5].mxu1  ;;  %v475_v30 = vld [vmem:[%s8073_s3 + $0x18] sm:$0xff] }
 0x2b6   : > { %v890_v33 = vadd.f32 %v7208_v24, %v880_v31 }
 0x2b8   : > { %v799_v34 = vpop.f32.mrb[6].mxu1  ;;  %v896_v35 = vsel %vm576_vm2, %v890_v33, -inf }
 0x2b9   : > { %v881_v36 = vmul.f32 0.35355338, %v799_v34  ;;  %v6242_v37 = vpop.f32.mrb[7].mxu1  ;;  %897 = vmax.xlane.f32.xlu0 %v896_v35 }
 0x2bb   : > { %v891_v38 = vadd.f32 %v7208_v24, %v881_v36 }
 0x2bc   : > { %v875_v39 = vpop.f32.mrb[8].mxu1 }
 0x2bd   : > { %v882_v40 = vmul.f32 0.35355338, %v875_v39  ;;  %v6247_v41 = vpop.f32.mrb[9].mxu1  ;;  %v899_v42 = vsel %vm576_vm2, %v891_v38, -inf  ;;  %v7274_v39 = vsub.s32 1, %v7147_v10 }
 0x2be   : > { %900 = vmax.xlane.f32.xlu0 %v899_v42 }
 0x2bf   : > { %v892_v43 = vadd.f32 %v7208_v24, %v882_v40  ;;  %v1317_v40 = vrot.slane %v7155_v12, %v7274_v39 }
 0x2c1   : > { %v902_v44 = vsel %vm576_vm2, %v892_v43, -inf }
 0x2c2   : > { %903 = vmax.xlane.f32.xlu1 %v902_v44 }
 0x2d3   : > { %1013 = vrot.lane.b32.xlu1 %v569_v18, %s8083_s18 }
 0x2d4   : > { %937 = vrot.lane.b32.xlu0 %v7159_v15, %s8083_s18 }
 0x2d7   : > { %v895_v45 = vpop.xlane.xlu1 %894 }
 0x2d8   : > { %v905_v46 = vsub.f32 %v889_v28, %v895_v45 }
 0x2da   : > { %v909_v47 = vmul.f32 1.442695, %v905_v46 }
 0x2dc   : > { %6828 = vpow2.f32 %v909_v47 }
 0x2e6   : > { %v6829_v48 = vpop.eup %6828 }
 0x2e7   : > { %v917_v49 = vsel %vm576_vm2, %v6829_v48, 0.0 }
 0x2f3   : > { %918 = vadd.xlane.f32.xlu0 %v917_v49 }
 0x346   : > { %v898_v50 = vpop.xlane.xlu0 %897 }
 0x347   : > { %v906_v51 = vsub.f32 %v890_v33, %v898_v50 }
 0x349   : > { %v911_v52 = vmul.f32 1.442695, %v906_v51 }
 0x34b   : > { %6830 = vpow2.f32 %v911_v52  ;;  %v901_v53 = vpop.xlane.xlu0 %900 }
 0x34c   : > { %v907_v54 = vsub.f32 %v891_v38, %v901_v53 }
 0x34e   : > { %v913_v55 = vmul.f32 1.442695, %v907_v54 }
 0x34f   : > { %v938_v56 = vpop.permute.xlu0 %937  ;;  %v904_v57 = vpop.xlane.xlu1 %903 }
 0x350   : > { %6832 = vpow2.f32 %v913_v55  ;;  %v908_v58 = vsub.f32 %v892_v43, %v904_v57  ;;  %6249 = vmatpush3.msra.mxu0 %v938_v56 }
 0x351   : > { %6258 = vmatprep.subr.mxu0 %v6987_v6 }
 0x352   : > { %v915_v59 = vmul.f32 1.442695, %v908_v58  ;;  %v476_v58 = vld [vmem:[%s8074_s4] sm:$0xff] }
 0x353   : > { %v1014_v60 = vpop.permute.xlu1 %1013 }
 0x354   : > { %6834 = vpow2.f32 %v915_v59  ;;  %6254 = vmatpush3.msra.mxu1 %v1014_v60  ;;  %v477_v59 = vld [vmem:[%s8074_s4 + $0x8] sm:$0xff] }
 0x355   : > { %v6831_v61 = vpop.eup %6830  ;;  %6263 = vmatprep.subr.mxu1 %v6987_v6  ;;  %v6663_v60 = vpack.c.bf16 %v477_v59, %v476_v58  ;;  %v5904_v58 = vld [vmem:[%s8072_s2 + $0x28] sm:$0xff] }
 0x356   : > { %v920_v62 = vsel %vm576_vm2, %v6831_v61, 0.0 }
 0x357   : > { %921 = vadd.xlane.f32.xlu1 %v920_v62 }
 0x35a   : > { %v6833_v63 = vpop.eup %6832 }
 0x35b   : > { %v923_v0 = vsel %vm576_vm2, %v6833_v63, 0.0 }
 0x35c   : > { %924 = vadd.xlane.f32.xlu0 %v923_v0 }
 0x35e   : > { %v6835_v1 = vpop.eup %6834 }
 0x35f   : > { %v926_v2 = vsel %vm576_vm2, %v6835_v1, 0.0 }
 0x360   : > { %927 = vadd.xlane.f32.xlu1 %v926_v2  ;;  %v7296_v2 = vsub.s32 2, %v7147_v10 }
 0x371   : > { %1089 = vrot.lane.b32.xlu1 %v7172_v20, %s8083_s18 }
 0x372   : > { %1165 = vrot.lane.b32.xlu0 %v7169_v17, %s8083_s18  ;;  %s6993_s18 = smov 32  }
 0x380   : > { %v919_v4 = vpop.xlane.xlu0 %918 }
 0x381   : > { %6836 = vrcp.f32 %v919_v4  ;;  %v7299_v4 = vsub.s32 3, %v7147_v10 }
 0x38b   : > { %v6837_v5 = vpop.eup %6836 }
 0x38c   : > { %v933_v7 = vmul.f32 %v6837_v5, %v6829_v48  ;;  %v1559_v5 = vrot.slane %v7155_v12, %v7296_v2 }
 0x38e   : > { %6251 = vmatmul.mubr.msk.f32.vlgmr.msra.gmra.mrb[0].mxu0 %vm576_vm2, %v933_v7 }
 0x38f   : > { %6260 = vmatprep.mubr.msk.f32.mxu0 %vm6986_vm0, %v6987_v6 }
 0x3e4   : > { %v922_v13 = vpop.xlane.xlu1 %921 }
 0x3e5   : > { %6838 = vrcp.f32 %v922_v13 }
 0x3e9   : > { %v925_v14 = vpop.xlane.xlu0 %924 }
 0x3ea   : > { %6840 = vrcp.f32 %v925_v14  ;;  %v1564_v14 = vrot.slane %v7155_v12, %v7299_v4 }
 0x3ed   : > { %v928_v15 = vpop.xlane.xlu1 %927  ;;  %v1166_v20 = vpop.permute.xlu0 %1165 }
 0x3ee   : > { %6842 = vrcp.f32 %v928_v15 }
 0x3ef   : > { %v6839_v16 = vpop.eup %6838 }
 0x3f0   : > { %v934_v18 = vmul.f32 %v6839_v16, %v6831_v61  ;;  %v479_v61 = vld [vmem:[%s8074_s4 + $0x18] sm:$0xff] }
 0x3f1   : > { %v1090_v19 = vpop.permute.xlu1 %1089 }
 0x3f2   : > { %6259 = vmatpush3.msra.mxu0 %v1090_v19  ;;  %6256 = vmatmul.mubr.msk.f32.vlgmr.msra.gmra.mrb[10].mxu1 %vm576_vm2, %v934_v18  ;;  %v480_v18 = vld [vmem:[%s8075_s5] sm:$0xff]  ;;  %v481_v19 = vld [vmem:[%s8075_s5 + $0x8] sm:$0xff] }
 0x3f3   : > { %6264 = vmatpush3.msra.mxu1 %v1166_v20  ;;  %6265 = vmatprep.mubr.msk.f32.mxu1 %vm6986_vm0, %v6987_v6  ;;  %v6669_v20 = vpack.c.bf16 %v481_v19, %v480_v18 }
 0x3f4   : > { %v6841_v17 = vpop.eup %6840  ;;  %6268 = vmatprep.subr.mxu0 %v6987_v6  ;;  %6273 = vmatprep.subr.mxu1 %v6987_v6 }
 0x3f5   : > { %v935_v21 = vmul.f32 %v6841_v17, %v6833_v63  ;;  %v482_v17 = vld [vmem:[%s8075_s5 + $0x10] sm:$0xff] }
 0x3f7   : > { %6261 = vmatmul.mubr.msk.f32.vlgmr.msra.gmra.mrb[2].mxu0 %vm576_vm2, %v935_v21  ;;  %v483_v21 = vld [vmem:[%s8075_s5 + $0x18] sm:$0xff] }
 0x3f8   : > { %v6843_v23 = vpop.eup %6842  ;;  %6269 = vmatpush3.msra.mxu0 %v472_v22  ;;  %6270 = vmatprep.mubr.msk.f32.mxu0 %vm6986_vm0, %v6987_v6  ;;  %v6672_v22 = vpack.c.bf16 %v483_v21, %v482_v17 }
 0x3f9   : > { %v936_v25 = vmul.f32 %v6843_v23, %v6835_v1  ;;  %6278 = vmatprep.subr.mxu0 %v6987_v6  ;;  %v484_v23 = vld [vmem:[%s8075_s5 + $0x20] sm:$0xff] }
 0x3fb   : > { %6266 = vmatmul.mubr.msk.f32.vlgmr.msra.gmra.mrb[12].mxu1 %vm576_vm2, %v936_v25  ;;  %v485_v25 = vld [vmem:[%s8075_s5 + $0x28] sm:$0xff] }
 0x3fc   : > { %6275 = vmatprep.mubr.msk.f32.mxu1 %vm6986_vm0, %v6987_v6  ;;  %6274 = vmatpush3.msra.mxu1 %v473_v26  ;;  %v6675_v26 = vpack.c.bf16 %v485_v25, %v484_v23 }
 0x3fd   : > { %6283 = vmatprep.subr.mxu1 %v6987_v6 }
 0x461   : > { %v1009_v28 = vpop.f32.mrb[0].mxu0 }
 0x462   : > { %v6252_v29 = vpop.f32.mrb[1].mxu0  ;;  %6271 = vmatmul.mubr.msk.f32.vlgmr.msra.gmra.mrb[4].mxu0 %vm576_vm2, %v1009_v28  ;;  %v487_v28 = vld [vmem:[%s8075_s5 + $0x38] sm:$0xff] }
 0x463   : > { %6279 = vmatpush3.msra.mxu0 %v474_v27  ;;  %6280 = vmatprep.mubr.msk.f32.mxu0 %vm6986_vm0, %v6987_v6  ;;  %v486_v27 = vld [vmem:[%s8075_s5 + $0x30] sm:$0xff] }
 0x464   : > { %6662 = vmatprep.subr.bf16.mxu0 %v6985_v3  ;;  %v6678_v29 = vpack.c.bf16 %v487_v28, %v486_v27 }
 0x4c5   : > { %v1085_v31 = vpop.f32.mrb[10].mxu1 }
 0x4c6   : > { %v6257_v32 = vpop.f32.mrb[11].mxu1  ;;  %6276 = vmatmul.mubr.msk.f32.vlgmr.msra.gmra.mrb[14].mxu1 %vm576_vm2, %v1085_v31 }
 0x4c7   : > { %6284 = vmatpush3.msra.mxu1 %v475_v30  ;;  %6285 = vmatprep.mubr.msk.f32.mxu1 %vm6986_vm0, %v6987_v6  ;;  %v7337_v30 = vsub.s32 4, %v7147_v10 }
 0x4c8   : > { %6668 = vmatprep.subr.bf16.mxu1 %v6985_v3 }
 0x4c9   : > { %v1569_v31 = vrot.slane %v7155_v12, %v7337_v30 }
 0x4ca   : > { %v1161_v33 = vpop.f32.mrb[2].mxu0 }
 0x4cb   : > { %v6262_v34 = vpop.f32.mrb[3].mxu0  ;;  %6281 = vmatmul.mubr.msk.f32.vlgmr.msra.gmra.mrb[6].mxu0 %vm576_vm2, %v1161_v33 }
 0x4cc   : > { %6296 = vmatprep.mubr.msk.f32.mxu0 %vm6986_vm0, %v6987_v6  ;;  %6664 = vmatpush3.bf16.msra.mxu0 %v6663_v60  ;;  %v5905_v60 = vld [vmem:[%s8072_s2 + $0x30] sm:$0xff] }
 0x4cd   : > { %6665 = vmatprep.subr.bf16.mxu0 %v6985_v3 }
 0x4ce   : > { %v1237_v35 = vpop.f32.mrb[12].mxu1 }
 0x4cf   : > { %v6267_v36 = vpop.f32.mrb[13].mxu1  ;;  %6286 = vmatmul.mubr.msk.f32.vlgmr.msra.gmra.mrb[16].mxu1 %vm576_vm2, %v1237_v35 }
 0x4d0   : > { %6315 = vmatprep.mubr.msk.f32.mxu1 %vm6986_vm0, %v6987_v6  ;;  %6670 = vmatpush3.bf16.msra.mxu1 %v6669_v20 }
 0x4d1   : > { %6671 = vmatprep.subr.bf16.mxu1 %v6985_v3 }
 0x4d4   : > { %6673 = vmatpush3.bf16.msra.mxu1 %v6672_v22 }
 0x4d5   : > { %6674 = vmatprep.subr.bf16.mxu1 %v6985_v3 }
 0x4d8   : > { %6676 = vmatpush3.bf16.msra.mxu1 %v6675_v26 }
 0x4d9   : > { %6677 = vmatprep.subr.bf16.mxu1 %v6985_v3 }
 0x4dc   : > { %6679 = vmatpush3.bf16.msra.mxu1 %v6678_v29 }
 0x4dd   : > { %6334 = vmatprep.subr.mxu1 %v6987_v6 }
 0x535   : > { %v1310_v37 = vpop.f32.mrb[4].mxu0 }
 0x536   : > { %v6272_v38 = vpop.f32.mrb[5].mxu0  ;;  %v1318_v41 = vadd.f32 %v1317_v40, %v1310_v37 }
 0x599   : > { %v1388_v42 = vpop.f32.mrb[14].mxu1 }
 0x59a   : > { %v1392_v43 = vadd.f32 %v1388_v42, %v1318_v41  ;;  %v6277_v44 = vpop.f32.mrb[15].mxu1 }
 0x59e   : > { %v1462_v45 = vpop.f32.mrb[6].mxu0 }
 0x59f   : > { %v1466_v46 = vadd.f32 %v1462_v45, %v1392_v43  ;;  %v6282_v47 = vpop.f32.mrb[7].mxu0  ;;  %v7345_v45 = vsub.s32 5, %v7147_v10 }
 0x5a2   : > { %v1536_v48 = vpop.f32.mrb[16].mxu1 }
 0x5a3   : > { %v1540_v49 = vadd.f32 %v1536_v48, %v1466_v46  ;;  %v6287_v50 = vpop.f32.mrb[17].mxu1  ;;  %v1655_v46 = vrot.slane %v7155_v12, %v7345_v45 }
 0x5a5   : > { %v1541_v51 = vadd.f32 %v1540_v49, %v7139_v8  ;;  %v478_v8 = vld [vmem:[%s8074_s4 + $0x10] sm:$0xff] }
 0x5a6   : > { %v6666_v62 = vpack.c.bf16 %v479_v61, %v478_v8  ;;  %v5906_v8 = vld [vmem:[%s8072_s2 + $0x38] sm:$0xff] }
 0x5a7   : > { %v1542_v52 = vsel %vm493_vm1, %v1541_v51, 0.0  ;;  %v6684_v61 = vpack.c.bf16 %v5906_v8, %v5905_v60 }
 0x5a8   : > { %1543 = vadd.xlane.f32.xlu1 %v1542_v52  ;;  %6667 = vmatpush3.bf16.msra.mxu0 %v6666_v62 }
 0x5a9   : > { %6680 = vmatprep.subr.bf16.mxu0 %v6985_v3 }
 0x635   : > { %v1544_v53 = vpop.xlane.xlu1 %1543 }
 0x636   : > { %v1546_v54 = vmul.f32 0.03125, %v1544_v53 }
 0x638   : > { %v1547_v55 = vsub.f32 %v1541_v51, %v1546_v54 }
 0x63a   : > { %v1548_v56 = vmul.f32 %v1547_v55, %v1547_v55 }
 0x63c   : > { %v1549_v57 = vsel %vm493_vm1, %v1548_v56, 0.0 }
 0x63d   : > { %1550 = vadd.xlane.f32.xlu0 %v1549_v57  ;;  %v5903_v57 = vld [vmem:[%s8072_s2 + $0x20] sm:$0xff] }
 0x63e   : > { %v6681_v59 = vpack.c.bf16 %v5904_v58, %v5903_v57 }
 0x6ca   : > { %v1551_v63 = vpop.xlane.xlu0 %1550 }
 0x6cb   : > { %v1552_v0 = vmul.f32 0.03125, %v1551_v63 }
 0x6cd   : > { %v1553_v1 = vadd.f32 1e-07, %v1552_v0 }
 0x6cf   : > { %6844 = vrsqrt.f32 %v1553_v1  ;;  %v7366_v1 = vsub.s32 6, %v7147_v10 }
 0x6d9   : > { %v6845_v7 = vpop.eup %6844 }
 0x6da   : > { %v1555_v13 = vmul.f32 %v6845_v7, %v1547_v55  ;;  %v1747_v7 = vrot.slane %v7155_v12, %v7366_v1 }
 0x6dc   : > { %v1560_v15 = vmul.f32 %v1559_v5, %v1555_v13  ;;  %v7369_v5 = vsub.s32 7, %v7147_v10  ;;  %v7384_v10 = vld [vmem:[%s8076_s6 + $0x8] sm:$0xff] }
 0x6dd   : > { %v1783_v19 = vrot.slane %v7384_v10, %v7150_v11 }
 0x6de   : > { %v1565_v16 = vadd.f32 %v1564_v14, %v1560_v15  ;;  %v1752_v15 = vrot.slane %v7155_v12, %v7369_v5 }
 0x6e0   : > { %6297 = vmatmul.mubr.msk.f32.vlgmr.msra.gmra.mrb[8].mxu0 %vm493_vm1, %v1565_v16 }
 0x6e1   : > { %6326 = vmatprep.mubr.msk.f32.mxu0 %vm6986_vm0, %v6987_v6  ;;  %6682 = vmatpush3.bf16.msra.mxu0 %v6681_v59 }
 0x6e2   : > { %6683 = vmatprep.subr.bf16.mxu0 %v6985_v3 }
 0x6e5   : > { %6685 = vmatpush3.bf16.msra.mxu0 %v6684_v61 }
 0x6e6   : > { %6329 = vmatprep.subr.mxu0 %v6987_v6 }
 0x7b3   : > { %v1639_v32 = vpop.f32.mrb[8].mxu0 }
 0x7b4   : > { %v1640_v33 = vadd.f32 %v1639_v32, %v1569_v31  ;;  %v6298_v34 = vpop.f32.mrb[9].mxu0 }
 0x7b6   : > { %v1644_v35 = vmul.f32 0.044715, %v1640_v33  ;;  %v1643_v42 = vmul.f32 0.5, %v1640_v33 }
 0x7b8   : > { %v1645_v36 = vmul.f32 %v1644_v35, %v1640_v33 }
 0x7ba   : > { %v1646_v37 = vmul.f32 %v1645_v36, %v1640_v33 }
 0x7bc   : > { %v1647_v38 = vadd.f32 %v1646_v37, %v1640_v33 }
 0x7be   : > { %v1648_v40 = vmul.f32 0.7978846, %v1647_v38 }
 0x7c0   : > { %6846 = vtanh.f32 %v1648_v40 }
 0x7ca   : > { %v6847_v41 = vpop.eup %6846 }
 0x7cb   : > { %v1650_v43 = vadd.f32 1.0, %v6847_v41 }
 0x7cd   : > { %v1651_v44 = vmul.f32 %v1650_v43, %v1643_v42 }
 0x7cf   : > { %6316 = vmatmul.mubr.msk.f32.vlgmr.msra.gmra.mrb[18].mxu1 %vm1656_vm3, %v1651_v44 }
 0x7d0   : > { %6336 = vmatprep.mubr.msk.f32.mxu1 %vm6986_vm0, %v6987_v6 }
 0x8a2   : > { %v1726_v47 = vpop.f32.mrb[18].mxu1 }
 0x8a3   : > { %v1727_v48 = vadd.f32 %v1726_v47, %v1655_v46  ;;  %v6317_v49 = vpop.f32.mrb[19].mxu1 }
 0x8a5   : > { %v1730_v50 = vadd.f32 %v1727_v48, %v1565_v16 }
 0x8a7   : > { %v1731_v51 = vsel %vm493_vm1, %v1730_v50, 0.0 }
 0x8a8   : > { %1732 = vadd.xlane.f32.xlu0 %v1731_v51 }
 0x935   : > { %v1733_v52 = vpop.xlane.xlu0 %1732 }
 0x936   : > { %v1734_v53 = vmul.f32 0.03125, %v1733_v52 }
 0x938   : > { %v1735_v54 = vsub.f32 %v1730_v50, %v1734_v53 }
 0x93a   : > { %v1736_v55 = vmul.f32 %v1735_v54, %v1735_v54 }
 0x93c   : > { %v1737_v56 = vsel %vm493_vm1, %v1736_v55, 0.0 }
 0x93d   : > { %1738 = vadd.xlane.f32.xlu1 %v1737_v56 }
 0x9ca   : > { %v1739_v62 = vpop.xlane.xlu1 %1738 }
 0x9cb   : > { %v1740_v63 = vmul.f32 0.03125, %v1739_v62 }
 0x9cd   : > { %v1741_v0 = vadd.f32 1e-07, %v1740_v63 }
 0x9cf   : > { %6848 = vrsqrt.f32 %v1741_v0 }
 0x9d9   : > { %v6849_v13 = vpop.eup %6848 }
 0x9da   : > { %v1743_v14 = vmul.f32 %v6849_v13, %v1735_v54 }
 0x9dc   : > { %v1748_v16 = vmul.f32 %v1747_v7, %v1743_v14 }
 0x9de   : > { %v7375_v18 = vadd.f32 %v1752_v15, %v1748_v16 }
 0x9e0   : > { %6327 = vmatmul.mubr.msk.f32.vlgmr.msra.gmra.mrb[10].mxu0 %vm493_vm1, %v7375_v18 }
 0x9e1   : > { %6331 = vmatprep.mubr.msk.f32.mxu0 %vm6986_vm0, %v6987_v6 }
 0xab3   : > { %v1853_v20 = vpop.f32.mrb[10].mxu0 }
 0xab4   : > { %v1854_v17 = vadd.f32 %v1853_v20, %v1783_v19  ;;  %v6328_v12 = vpop.f32.mrb[11].mxu0 }
 0xab6   : > { %1860 = vrot.lane.b32.xlu1 %v1854_v17, %s8111_s26  ;;  %1858 = vrot.lane.b32.xlu0 %v1854_v17, %s8112_s0 }
 0xaba   : > { %1862 = vrot.lane.b32.xlu1 %v1854_v17, %s8113_s1  ;;  %1864 = vrot.lane.b32.xlu0 %v1854_v17, %s8114_s17 }
 0xb28   : > { %v7392_v21 = vpop.permute.xlu1 %1860  ;;  %v7394_v22 = vpop.permute.xlu0 %1858 }
 0xb29   : > { %2016 = vrot.lane.b32.xlu0 %v7392_v21, %s8114_s17  ;;  %1940 = vrot.lane.b32.xlu1 %v7394_v22, %s8114_s17 }
 0xb2c   : > { %v7400_v23 = vpop.permute.xlu1 %1862  ;;  %v1865_v25 = vpop.permute.xlu0 %1864 }
 0xb2d   : > { %2092 = vrot.lane.b32.xlu1 %v7400_v23, %s8114_s17  ;;  %6330 = vmatpush3.xpose.msk.msra.mxu0 %vm576_vm2, %v1865_v25 }
 0xb2e   : > { %6339 = vmatprep.subr.mxu0 %v6987_v6 }
 0xb30   : > { %6332 = vmatmul.mubr.msk.f32.vlgmr.msra.gmra.mrb[12].mxu0 %vm576_vm2, %v1854_v17 }
 0xb31   : > { %6341 = vmatprep.mubr.msk.f32.mxu0 %vm6986_vm0, %v6987_v6 }
 0xb9b   : > { %v1941_v26 = vpop.permute.xlu1 %1940  ;;  %v2017_v27 = vpop.permute.xlu0 %2016 }
 0xb9c   : > { %6335 = vmatpush3.xpose.msk.msra.mxu1 %vm576_vm2, %v1941_v26  ;;  %6340 = vmatpush3.xpose.msk.msra.mxu0 %vm576_vm2, %v2017_v27 }
 0xb9d   : > { %6344 = vmatprep.subr.mxu1 %v6987_v6  ;;  %6349 = vmatprep.subr.mxu0 %v6987_v6 }
 0xb9f   : > { %6337 = vmatmul.mubr.msk.f32.vlgmr.msra.gmra.mrb[20].mxu1 %vm576_vm2, %v7394_v22  ;;  %v2093_v28 = vpop.permute.xlu1 %2092  ;;  %6342 = vmatmul.mubr.msk.f32.vlgmr.msra.gmra.mrb[14].mxu0 %vm576_vm2, %v7392_v21 }
 0xba0   : > { %6345 = vmatpush3.xpose.msk.msra.mxu1 %vm576_vm2, %v2093_v28  ;;  %6346 = vmatprep.mubr.msk.f32.mxu1 %vm6986_vm0, %v6987_v6 }
 0xba1   : > { %6351 = vmatprep.mubr.msk.f32.mxu0 %vm6986_vm0, %v6987_v6  ;;  %6354 = vmatprep.subr.mxu1 %v6987_v6 }
 0xba3   : > { %6347 = vmatmul.mubr.msk.f32.vlgmr.msra.gmra.mrb[22].mxu1 %vm576_vm2, %v7400_v23 }
 0xba4   : > { %6356 = vmatprep.mubr.msk.f32.mxu1 %vm6986_vm0, %v6987_v6 }
 0xc03   : > { %v1936_v29 = vpop.f32.mrb[12].mxu0 }
 0xc04   : > { %v2168_v31 = vmul.f32 0.35355338, %v1936_v29  ;;  %v6333_v32 = vpop.f32.mrb[13].mxu0 }
 0xc06   : > { %v2172_v33 = vadd.f32 %v7208_v24, %v2168_v31  ;;  %v5907_v31 = vld [vmem:[%s8073_s3 + $0x20] sm:$0xff] }
 0xc08   : > { %v2176_v34 = vsel %vm576_vm2, %v2172_v33, -inf }
 0xc09   : > { %2177 = vmax.xlane.f32.xlu0 %v2176_v34 }
 0xc72   : > { %v2012_v35 = vpop.f32.mrb[20].mxu1  ;;  %v2088_v36 = vpop.f32.mrb[14].mxu0 }
 0xc73   : > { %v2169_v37 = vmul.f32 0.35355338, %v2012_v35  ;;  %v2170_v38 = vmul.f32 0.35355338, %v2088_v36  ;;  %v6338_v40 = vpop.f32.mrb[21].mxu1  ;;  %v6343_v41 = vpop.f32.mrb[15].mxu0 }
 0xc74   : > { %v5908_v36 = vld [vmem:[%s8073_s3 + $0x28] sm:$0xff] }
 0xc75   : > { %v2174_v42 = vadd.f32 %v7208_v24, %v2170_v38  ;;  %v2173_v43 = vadd.f32 %v7208_v24, %v2169_v37  ;;  %v5909_v37 = vld [vmem:[%s8073_s3 + $0x30] sm:$0xff] }
 0xc76   : > { %v2164_v44 = vpop.f32.mrb[22].mxu1 }
 0xc77   : > { %v2171_v46 = vmul.f32 0.35355338, %v2164_v44  ;;  %v6348_v47 = vpop.f32.mrb[23].mxu1  ;;  %v2182_v48 = vsel %vm576_vm2, %v2174_v42, -inf  ;;  %v2179_v49 = vsel %vm576_vm2, %v2173_v43, -inf }
 0xc78   : > { %2183 = vmax.xlane.f32.xlu0 %v2182_v48  ;;  %2180 = vmax.xlane.f32.xlu1 %v2179_v49 }
 0xc79   : > { %v2175_v50 = vadd.f32 %v7208_v24, %v2171_v46 }
 0xc7b   : > { %v2185_v51 = vsel %vm576_vm2, %v2175_v50, -inf }
 0xc7c   : > { %2186 = vmax.xlane.f32.xlu0 %v2185_v51  ;;  %v2600_v51 = vrot.slane %v7384_v10, %v7274_v39 }
 0xc89   : > { %2220 = vrot.lane.b32.xlu1 %v1854_v17, %s8115_s28 }
 0xc96   : > { %v2178_v52 = vpop.xlane.xlu0 %2177 }
 0xc97   : > { %v2188_v53 = vsub.f32 %v2172_v33, %v2178_v52 }
 0xc99   : > { %v2192_v54 = vmul.f32 1.442695, %v2188_v53 }
 0xc9b   : > { %6850 = vpow2.f32 %v2192_v54 }
 0xca5   : > { %v6851_v55 = vpop.eup %6850 }
 0xca6   : > { %v2200_v56 = vsel %vm576_vm2, %v6851_v55, 0.0 }
 0xcad   : > { %2201 = vadd.xlane.f32.xlu1 %v2200_v56 }
 0xd05   : > { %v2184_v57 = vpop.xlane.xlu0 %2183  ;;  %v2181_v58 = vpop.xlane.xlu1 %2180 }
 0xd06   : > { %v2190_v59 = vsub.f32 %v2174_v42, %v2184_v57  ;;  %v2189_v60 = vsub.f32 %v2173_v43, %v2181_v58  ;;  %v5910_v42 = vld [vmem:[%s8073_s3 + $0x38] sm:$0xff] }
 0xd08   : > { %v2196_v8 = vmul.f32 1.442695, %v2190_v59  ;;  %v2194_v61 = vmul.f32 1.442695, %v2189_v60 }
 0xd09   : > { %v2221_v24 = vpop.permute.xlu1 %2220  ;;  %v2187_v62 = vpop.xlane.xlu0 %2186 }
 0xd0a   : > { %6852 = vpow2.f32 %v2196_v8  ;;  %v2191_v63 = vsub.f32 %v2175_v50, %v2187_v62  ;;  %6350 = vmatpush3.msra.mxu0 %v2221_v24 }
 0xd0b   : > { %6854 = vpow2.f32 %v2194_v61  ;;  %6359 = vmatprep.subr.mxu0 %v6987_v6 }
 0xd0c   : > { %v2198_v0 = vmul.f32 1.442695, %v2191_v63 }
 0xd0e   : > { %6856 = vpow2.f32 %v2198_v0 }
 0xd14   : > { %v6853_v7 = vpop.eup %6852 }
 0xd15   : > { %v6855_v13 = vpop.eup %6854  ;;  %v2206_v14 = vsel %vm576_vm2, %v6853_v7, 0.0 }
 0xd16   : > { %2207 = vadd.xlane.f32.xlu1 %v2206_v14  ;;  %v2203_v15 = vsel %vm576_vm2, %v6855_v13, 0.0  ;;  %v5911_v14 = vld [vmem:[%s8074_s4 + $0x20] sm:$0xff] }
 0xd17   : > { %2204 = vadd.xlane.f32.xlu0 %v2203_v15  ;;  %v5912_v15 = vld [vmem:[%s8074_s4 + $0x28] sm:$0xff] }
 0xd18   : > { %v6857_v16 = vpop.eup %6856 }
 0xd19   : > { %v2209_v19 = vsel %vm576_vm2, %v6857_v16, 0.0 }
 0xd1b   : > { %2210 = vadd.xlane.f32.xlu0 %v2209_v19  ;;  %v5913_v19 = vld [vmem:[%s8074_s4 + $0x30] sm:$0xff] }
 0xd27   : > { %2372 = vrot.lane.b32.xlu1 %v7392_v21, %s8115_s28 }
 0xd2b   : > { %2448 = vrot.lane.b32.xlu1 %v7400_v23, %s8115_s28 }
 0xd31   : > { %2296 = vrot.lane.b32.xlu0 %v7394_v22, %s8115_s28 }
 0xd3a   : > { %v2202_v20 = vpop.xlane.xlu1 %2201 }
 0xd3b   : > { %6858 = vrcp.f32 %v2202_v20  ;;  %v5914_v20 = vld [vmem:[%s8074_s4 + $0x38] sm:$0xff] }
 0xd45   : > { %v6859_v17 = vpop.eup %6858 }
 0xd46   : > { %v2216_v12 = vmul.f32 %v6859_v17, %v6851_v55  ;;  %v6690_v17 = vpack.c.bf16 %v5914_v20, %v5913_v19  ;;  %v5945_v19 = vld [vmem:[%s8072_s2 + $0x50] sm:$0xff]  ;;  %v5946_v20 = vld [vmem:[%s8072_s2 + $0x58] sm:$0xff] }
 0xd48   : > { %6352 = vmatmul.mubr.msk.f32.vlgmr.msra.gmra.mrb[16].mxu0 %vm576_vm2, %v2216_v12 }
 0xd49   : > { %6361 = vmatprep.mubr.msk.f32.mxu0 %vm6986_vm0, %v6987_v6 }
 0xda3   : > { %v2208_v25 = vpop.xlane.xlu1 %2207 }
 0xda4   : > { %6860 = vrcp.f32 %v2208_v25  ;;  %v2205_v26 = vpop.xlane.xlu0 %2204 }
 0xda5   : > { %6862 = vrcp.f32 %v2205_v26 }
 0xda7   : > { %v2373_v21 = vpop.permute.xlu1 %2372 }
 0xda8   : > { %v2211_v27 = vpop.xlane.xlu0 %2210  ;;  %6360 = vmatpush3.msra.mxu0 %v2373_v21  ;;  %v2841_v21 = vrot.slane %v7384_v10, %v7296_v2 }
 0xda9   : > { %6864 = vrcp.f32 %v2211_v27  ;;  %6369 = vmatprep.subr.mxu0 %v6987_v6 }
 0xdab   : > { %v2449_v33 = vpop.permute.xlu1 %2448 }
 0xdac   : > { %v2297_v22 = vpop.permute.xlu0 %2296 }
 0xdad   : > { %6355 = vmatpush3.msra.mxu1 %v2297_v22 }
 0xdae   : > { %v6861_v23 = vpop.eup %6860  ;;  %6364 = vmatprep.subr.mxu1 %v6987_v6 }
 0xdaf   : > { %v6863_v28 = vpop.eup %6862  ;;  %v2218_v29 = vmul.f32 %v6861_v23, %v6853_v7  ;;  %v2846_v23 = vrot.slane %v7384_v10, %v7299_v4 }
 0xdb0   : > { %v2217_v32 = vmul.f32 %v6863_v28, %v6855_v13 }
 0xdb1   : > { %6362 = vmatmul.mubr.msk.f32.vlgmr.msra.gmra.mrb[18].mxu0 %vm576_vm2, %v2218_v29 }
 0xdb2   : > { %6357 = vmatmul.mubr.msk.f32.vlgmr.msra.gmra.mrb[24].mxu1 %vm576_vm2, %v2217_v32  ;;  %6370 = vmatpush3.msra.mxu0 %v5907_v31  ;;  %v5915_v31 = vld [vmem:[%s8075_s5 + $0x40] sm:$0xff]  ;;  %v5916_v32 = vld [vmem:[%s8075_s5 + $0x48] sm:$0xff] }
 0xdb3   : > { %v6865_v34 = vpop.eup %6864  ;;  %6365 = vmatpush3.msra.mxu1 %v2449_v33  ;;  %6366 = vmatprep.mubr.msk.f32.mxu1 %vm6986_vm0, %v6987_v6  ;;  %v6693_v33 = vpack.c.bf16 %v5916_v32, %v5915_v31  ;;  %v7580_v31 = vld [vmem:[%s8076_s6 + $0x10] sm:$0xff] }
 0xdb4   : > { %v2219_v35 = vmul.f32 %v6865_v34, %v6857_v16  ;;  %6371 = vmatprep.mubr.msk.f32.mxu0 %vm6986_vm0, %v6987_v6  ;;  %6374 = vmatprep.subr.mxu1 %v6987_v6  ;;  %v6687_v16 = vpack.c.bf16 %v5912_v15, %v5911_v14  ;;  %v5917_v34 = vld [vmem:[%s8075_s5 + $0x50] sm:$0xff]  ;;  %v5943_v14 = vld [vmem:[%s8072_s2 + $0x40] sm:$0xff]  ;;  %v5944_v15 = vld [vmem:[%s8072_s2 + $0x48] sm:$0xff]  ;;  %v3064_v32 = vrot.slane %v7580_v31, %v7150_v11 }
 0xdb5   : > { %6379 = vmatprep.subr.mxu0 %v6987_v6 }
 0xdb6   : > { %6367 = vmatmul.mubr.msk.f32.vlgmr.msra.gmra.mrb[26].mxu1 %vm576_vm2, %v2219_v35  ;;  %v5918_v35 = vld [vmem:[%s8075_s5 + $0x58] sm:$0xff] }
 0xdb7   : > { %6375 = vmatpush3.msra.mxu1 %v5908_v36  ;;  %6376 = vmatprep.mubr.msk.f32.mxu1 %vm6986_vm0, %v6987_v6  ;;  %v6696_v36 = vpack.c.bf16 %v5918_v35, %v5917_v34 }
 0xdb8   : > { %6384 = vmatprep.subr.mxu1 %v6987_v6 }
 0xe1b   : > { %v2292_v38 = vpop.f32.mrb[16].mxu0 }
 0xe1c   : > { %v6353_v40 = vpop.f32.mrb[17].mxu0  ;;  %6372 = vmatmul.mubr.msk.f32.vlgmr.msra.gmra.mrb[20].mxu0 %vm576_vm2, %v2292_v38  ;;  %v5920_v38 = vld [vmem:[%s8075_s5 + $0x68] sm:$0xff] }
 0xe1d   : > { %6380 = vmatpush3.msra.mxu0 %v5909_v37  ;;  %6381 = vmatprep.mubr.msk.f32.mxu0 %vm6986_vm0, %v6987_v6  ;;  %v5919_v37 = vld [vmem:[%s8075_s5 + $0x60] sm:$0xff] }
 0xe1e   : > { %6686 = vmatprep.subr.bf16.mxu0 %v6985_v3  ;;  %v6699_v40 = vpack.c.bf16 %v5920_v38, %v5919_v37 }
 0xe84   : > { %v2444_v41 = vpop.f32.mrb[18].mxu0 }
 0xe85   : > { %v2368_v43 = vpop.f32.mrb[24].mxu1  ;;  %v6363_v44 = vpop.f32.mrb[19].mxu0  ;;  %6382 = vmatmul.mubr.msk.f32.vlgmr.msra.gmra.mrb[22].mxu0 %vm576_vm2, %v2444_v41  ;;  %v5921_v41 = vld [vmem:[%s8075_s5 + $0x70] sm:$0xff] }
 0xe86   : > { %v6358_v46 = vpop.f32.mrb[25].mxu1  ;;  %6377 = vmatmul.mubr.msk.f32.vlgmr.msra.gmra.mrb[28].mxu1 %vm576_vm2, %v2368_v43  ;;  %6397 = vmatprep.mubr.msk.f32.mxu0 %vm6986_vm0, %v6987_v6  ;;  %v2851_v44 = vrot.slane %v7384_v10, %v7337_v30 }
 0xe87   : > { %6385 = vmatpush3.msra.mxu1 %v5910_v42  ;;  %6386 = vmatprep.mubr.msk.f32.mxu1 %vm6986_vm0, %v6987_v6  ;;  %v5922_v42 = vld [vmem:[%s8075_s5 + $0x78] sm:$0xff] }
 0xe88   : > { %6692 = vmatprep.subr.bf16.mxu1 %v6985_v3  ;;  %6688 = vmatpush3.bf16.msra.mxu0 %v6687_v16  ;;  %v6702_v43 = vpack.c.bf16 %v5922_v42, %v5921_v41  ;;  %v6705_v16 = vpack.c.bf16 %v5944_v15, %v5943_v14 }
 0xe89   : > { %v2520_v47 = vpop.f32.mrb[26].mxu1  ;;  %6689 = vmatprep.subr.bf16.mxu0 %v6985_v3 }
 0xe8a   : > { %v6368_v48 = vpop.f32.mrb[27].mxu1  ;;  %6387 = vmatmul.mubr.msk.f32.vlgmr.msra.gmra.mrb[30].mxu1 %vm576_vm2, %v2520_v47 }
 0xe8b   : > { %6416 = vmatprep.mubr.msk.f32.mxu1 %vm6986_vm0, %v6987_v6  ;;  %6694 = vmatpush3.bf16.msra.mxu1 %v6693_v33 }
 0xe8c   : > { %6691 = vmatpush3.bf16.msra.mxu0 %v6690_v17  ;;  %6695 = vmatprep.subr.bf16.mxu1 %v6985_v3  ;;  %v6708_v17 = vpack.c.bf16 %v5946_v20, %v5945_v19 }
 0xe8d   : > { %6704 = vmatprep.subr.bf16.mxu0 %v6985_v3 }
 0xe8f   : > { %6697 = vmatpush3.bf16.msra.mxu1 %v6696_v36 }
 0xe90   : > { %6698 = vmatprep.subr.bf16.mxu1 %v6985_v3 }
 0xe93   : > { %6700 = vmatpush3.bf16.msra.mxu1 %v6699_v40 }
 0xe94   : > { %6701 = vmatprep.subr.bf16.mxu1 %v6985_v3 }
 0xe97   : > { %6703 = vmatpush3.bf16.msra.mxu1 %v6702_v43 }
 0xe98   : > { %6435 = vmatprep.subr.mxu1 %v6987_v6 }
 0xeef   : > { %v2593_v49 = vpop.f32.mrb[20].mxu0 }
 0xef0   : > { %v6373_v50 = vpop.f32.mrb[21].mxu0  ;;  %v2601_v52 = vadd.f32 %v2600_v51, %v2593_v49 }
 0xf58   : > { %v2745_v53 = vpop.f32.mrb[22].mxu0 }
 0xf59   : > { %v2671_v54 = vpop.f32.mrb[28].mxu1  ;;  %v6383_v55 = vpop.f32.mrb[23].mxu0 }
 0xf5a   : > { %v2675_v56 = vadd.f32 %v2671_v54, %v2601_v52  ;;  %v6378_v57 = vpop.f32.mrb[29].mxu1 }
 0xf5c   : > { %v2749_v58 = vadd.f32 %v2745_v53, %v2675_v56 }
 0xf5d   : > { %v2819_v59 = vpop.f32.mrb[30].mxu1 }
 0xf5e   : > { %v2823_v60 = vadd.f32 %v2819_v59, %v2749_v58  ;;  %v6388_v8 = vpop.f32.mrb[31].mxu1  ;;  %v2937_v58 = vrot.slane %v7384_v10, %v7345_v45 }
 0xf60   : > { %v2824_v61 = vadd.f32 %v2823_v60, %v7375_v18 }
 0xf62   : > { %v2825_v24 = vsel %vm493_vm1, %v2824_v61, 0.0 }
 0xf63   : > { %2826 = vadd.xlane.f32.xlu0 %v2825_v24 }
 0xff0   : > { %v2827_v62 = vpop.xlane.xlu0 %2826 }
 0xff1   : > { %v2828_v63 = vmul.f32 0.03125, %v2827_v62 }
 0xff3   : > { %v2829_v0 = vsub.f32 %v2824_v61, %v2828_v63 }
 0xff5   : > { %v2830_v7 = vmul.f32 %v2829_v0, %v2829_v0 }
 0xff7   : > { %v2831_v13 = vsel %vm493_vm1, %v2830_v7, 0.0 }
 0xff8   : > { %2832 = vadd.xlane.f32.xlu1 %v2831_v13 }
0x1085   : > { %v2833_v12 = vpop.xlane.xlu1 %2832 }
0x1086   : > { %v2834_v25 = vmul.f32 0.03125, %v2833_v12 }
0x1088   : > { %v2835_v26 = vadd.f32 1e-07, %v2834_v25 }
0x108a   : > { %6866 = vrsqrt.f32 %v2835_v26 }
0x1094   : > { %v6867_v27 = vpop.eup %6866 }
0x1095   : > { %v2837_v22 = vmul.f32 %v6867_v27, %v2829_v0 }
0x1097   : > { %v2842_v28 = vmul.f32 %v2841_v21, %v2837_v22  ;;  %v3028_v21 = vrot.slane %v7384_v10, %v7366_v1 }
0x1099   : > { %v2847_v29 = vadd.f32 %v2846_v23, %v2842_v28  ;;  %v3033_v23 = vrot.slane %v7384_v10, %v7369_v5 }
0x109b   : > { %6398 = vmatmul.mubr.msk.f32.vlgmr.msra.gmra.mrb[24].mxu0 %vm493_vm1, %v2847_v29 }
0x109c   : > { %6427 = vmatprep.mubr.msk.f32.mxu0 %vm6986_vm0, %v6987_v6  ;;  %6706 = vmatpush3.bf16.msra.mxu0 %v6705_v16 }
0x109d   : > { %6707 = vmatprep.subr.bf16.mxu0 %v6985_v3 }
0x10a0   : > { %6709 = vmatpush3.bf16.msra.mxu0 %v6708_v17 }
0x10a1   : > { %6430 = vmatprep.subr.mxu0 %v6987_v6 }
0x116e   : > { %v2921_v46 = vpop.f32.mrb[24].mxu0 }
0x116f   : > { %v2922_v47 = vadd.f32 %v2921_v46, %v2851_v44  ;;  %v6399_v48 = vpop.f32.mrb[25].mxu0 }
0x1171   : > { %v2926_v49 = vmul.f32 0.044715, %v2922_v47  ;;  %v2925_v55 = vmul.f32 0.5, %v2922_v47 }
0x1173   : > { %v2927_v50 = vmul.f32 %v2926_v49, %v2922_v47 }
0x1175   : > { %v2928_v51 = vmul.f32 %v2927_v50, %v2922_v47 }
0x1177   : > { %v2929_v52 = vadd.f32 %v2928_v51, %v2922_v47  ;;  %v7620_v47 = vld [vmem:[%s7205_s20] ss:$0 sm:$0xff]  ;;  %s8028_s20 = scalar_lea.hbm %s8081_s11, %s6025_s16 }
0x1179   : > { %v2930_v53 = vmul.f32 0.7978846, %v2929_v52 }
0x117b   : > { %6868 = vtanh.f32 %v2930_v53 }
0x1185   : > { %v6869_v54 = vpop.eup %6868 }
0x1186   : > { %v2932_v56 = vadd.f32 1.0, %v6869_v54 }
0x1188   : > { %v2933_v57 = vmul.f32 %v2932_v56, %v2925_v55 }
0x118a   : > { %6417 = vmatmul.mubr.msk.f32.vlgmr.msra.gmra.mrb[32].mxu1 %vm1656_vm3, %v2933_v57 }
0x118b   : > { %6437 = vmatprep.mubr.msk.f32.mxu1 %vm6986_vm0, %v6987_v6 }
0x125d   : > { %v3007_v59 = vpop.f32.mrb[32].mxu1 }
0x125e   : > { %v3008_v60 = vadd.f32 %v3007_v59, %v2937_v58  ;;  %v6418_v8 = vpop.f32.mrb[33].mxu1 }
0x1260   : > { %v3011_v61 = vadd.f32 %v3008_v60, %v2847_v29 }
0x1262   : > { %v3012_v24 = vsel %vm493_vm1, %v3011_v61, 0.0 }
0x1263   : > { %3013 = vadd.xlane.f32.xlu0 %v3012_v24 }
0x12f0   : > { %v3014_v62 = vpop.xlane.xlu0 %3013 }
0x12f1   : > { %v3015_v63 = vmul.f32 0.03125, %v3014_v62 }
0x12f3   : > { %v3016_v0 = vsub.f32 %v3011_v61, %v3015_v63 }
0x12f5   : > { %v3017_v7 = vmul.f32 %v3016_v0, %v3016_v0 }
0x12f7   : > { %v3018_v13 = vsel %vm493_vm1, %v3017_v7, 0.0 }
0x12f8   : > { %3019 = vadd.xlane.f32.xlu0 %v3018_v13 }
0x1385   : > { %v3020_v12 = vpop.xlane.xlu0 %3019 }
0x1386   : > { %v3021_v25 = vmul.f32 0.03125, %v3020_v12 }
0x1388   : > { %v3022_v26 = vadd.f32 1e-07, %v3021_v25 }
0x138a   : > { %6870 = vrsqrt.f32 %v3022_v26 }
0x1394   : > { %v6871_v27 = vpop.eup %6870 }
0x1395   : > { %v3024_v22 = vmul.f32 %v6871_v27, %v3016_v0 }
0x1397   : > { %v3029_v28 = vmul.f32 %v3028_v21, %v3024_v22 }
0x1399   : > { %v7571_v29 = vadd.f32 %v3033_v23, %v3029_v28 }
0x139b   : > { %6428 = vmatmul.mubr.msk.f32.vlgmr.msra.gmra.mrb[26].mxu0 %vm493_vm1, %v7571_v29 }
0x139c   : > { %6432 = vmatprep.mubr.msk.f32.mxu0 %vm6986_vm0, %v6987_v6 }
0x146e   : > { %v3134_v33 = vpop.f32.mrb[26].mxu0 }
0x146f   : > { %v3135_v34 = vadd.f32 %v3134_v33, %v3064_v32  ;;  %v6429_v10 = vpop.f32.mrb[27].mxu0 }
0x1471   : > { %3141 = vrot.lane.b32.xlu0 %v3135_v34, %s8111_s26  ;;  %3139 = vrot.lane.b32.xlu1 %v3135_v34, %s8112_s0 }
0x1475   : > { %3143 = vrot.lane.b32.xlu1 %v3135_v34, %s8113_s1 }
0x1479   : > { %3145 = vrot.lane.b32.xlu1 %v3135_v34, %s8114_s17 }
0x14e3   : > { %v7588_v35 = vpop.permute.xlu0 %3141  ;;  %v3140_v36 = vpop.permute.xlu1 %3139 }
0x14e4   : > { %3297 = vrot.lane.b32.xlu1 %v7588_v35, %s8114_s17  ;;  %3221 = vrot.lane.b32.xlu0 %v3140_v36, %s8114_s17 }
0x14e7   : > { %v7593_v37 = vpop.permute.xlu1 %3143 }
0x14e8   : > { %3373 = vrot.lane.b32.xlu0 %v7593_v37, %s8114_s17 }
0x14eb   : > { %v3146_v38 = vpop.permute.xlu1 %3145 }
0x14ec   : > { %6431 = vmatpush3.xpose.msk.msra.mxu0 %vm576_vm2, %v3146_v38 }
0x14ed   : > { %6440 = vmatprep.subr.mxu0 %v6987_v6 }
0x14ef   : > { %6433 = vmatmul.mubr.msk.f32.vlgmr.msra.gmra.mrb[28].mxu0 %vm576_vm2, %v3135_v34 }
0x14f0   : > { %6442 = vmatprep.mubr.msk.f32.mxu0 %vm6986_vm0, %v6987_v6 }
0x1556   : > { %v3222_v40 = vpop.permute.xlu0 %3221  ;;  %v3298_v41 = vpop.permute.xlu1 %3297 }
0x1557   : > { %6436 = vmatpush3.xpose.msk.msra.mxu1 %vm576_vm2, %v3222_v40  ;;  %6441 = vmatpush3.xpose.msk.msra.mxu0 %vm576_vm2, %v3298_v41 }
0x1558   : > { %6445 = vmatprep.subr.mxu1 %v6987_v6  ;;  %6450 = vmatprep.subr.mxu0 %v6987_v6 }
0x155a   : > { %6438 = vmatmul.mubr.msk.f32.vlgmr.msra.gmra.mrb[34].mxu1 %vm576_vm2, %v3140_v36  ;;  %v3374_v42 = vpop.permute.xlu0 %3373  ;;  %6443 = vmatmul.mubr.msk.f32.vlgmr.msra.gmra.mrb[30].mxu0 %vm576_vm2, %v7588_v35 }
0x155b   : > { %6446 = vmatpush3.xpose.msk.msra.mxu1 %vm576_vm2, %v3374_v42  ;;  %6447 = vmatprep.mubr.msk.f32.mxu1 %vm6986_vm0, %v6987_v6 }
0x155c   : > { %6455 = vmatprep.subr.mxu1 %v6987_v6  ;;  %6452 = vmatprep.mubr.msk.f32.mxu0 %vm6986_vm0, %v6987_v6 }
0x155e   : > { %6448 = vmatmul.mubr.msk.f32.vlgmr.msra.gmra.mrb[36].mxu1 %vm576_vm2, %v7593_v37 }
0x155f   : > { %6457 = vmatprep.mubr.msk.f32.mxu1 %vm6986_vm0, %v6987_v6 }
0x15c2   : > { %v3217_v43 = vpop.f32.mrb[28].mxu0 }
0x15c3   : > { %v3449_v44 = vmul.f32 0.35355338, %v3217_v43  ;;  %v6434_v46 = vpop.f32.mrb[29].mxu0 }
0x15c5   : > { %v3453_v48 = vadd.f32 %v7620_v47, %v3449_v44 }
0x15c7   : > { %v3457_v49 = vsel %vm576_vm2, %v3453_v48, -inf }
0x15c8   : > { %3458 = vmax.xlane.f32.xlu1 %v3457_v49 }
0x162d   : > { %v3293_v50 = vpop.f32.mrb[34].mxu1  ;;  %v3369_v51 = vpop.f32.mrb[30].mxu0 }
0x162e   : > { %v3450_v52 = vmul.f32 0.35355338, %v3293_v50  ;;  %v3451_v53 = vmul.f32 0.35355338, %v3369_v51  ;;  %v6439_v54 = vpop.f32.mrb[35].mxu1  ;;  %v6444_v55 = vpop.f32.mrb[31].mxu0 }
0x162f   : > { %v5947_v51 = vld [vmem:[%s8073_s3 + $0x40] sm:$0xff]  ;;  %v5949_v54 = vld [vmem:[%s8073_s3 + $0x50] sm:$0xff] }
0x1630   : > { %v3454_v56 = vadd.f32 %v7620_v47, %v3450_v52  ;;  %v3455_v8 = vadd.f32 %v7620_v47, %v3451_v53  ;;  %v5948_v53 = vld [vmem:[%s8073_s3 + $0x48] sm:$0xff] }
0x1631   : > { %v3445_v57 = vpop.f32.mrb[36].mxu1 }
0x1632   : > { %v3452_v58 = vmul.f32 0.35355338, %v3445_v57  ;;  %v6449_v59 = vpop.f32.mrb[37].mxu1  ;;  %v3460_v60 = vsel %vm576_vm2, %v3454_v56, -inf  ;;  %v3463_v24 = vsel %vm576_vm2, %v3455_v8, -inf  ;;  %v5950_v57 = vld [vmem:[%s8073_s3 + $0x58] sm:$0xff] }
0x1633   : > { %3461 = vmax.xlane.f32.xlu0 %v3460_v60 }
0x1634   : > { %v3456_v61 = vadd.f32 %v7620_v47, %v3452_v58 }
0x1636   : > { %v3466_v62 = vsel %vm576_vm2, %v3456_v61, -inf }
0x1637   : > { %3464 = vmax.xlane.f32.xlu0 %v3463_v24  ;;  %3467 = vmax.xlane.f32.xlu1 %v3466_v62 }
0x1648   : > { %3577 = vrot.lane.b32.xlu1 %v3140_v36, %s8115_s28 }
0x164d   : > { %3501 = vrot.lane.b32.xlu0 %v3135_v34, %s8115_s28 }
0x1655   : > { %v3459_v63 = vpop.xlane.xlu1 %3458 }
0x1656   : > { %v3469_v0 = vsub.f32 %v3453_v48, %v3459_v63 }
0x1658   : > { %v3473_v7 = vmul.f32 1.442695, %v3469_v0  ;;  %v3881_v0 = vrot.slane %v7580_v31, %v7274_v39 }
0x165a   : > { %6872 = vpow2.f32 %v3473_v7 }
0x1664   : > { %v6873_v13 = vpop.eup %6872 }
0x1665   : > { %v3481_v14 = vsel %vm576_vm2, %v6873_v13, 0.0 }
0x166c   : > { %3482 = vadd.xlane.f32.xlu0 %v3481_v14 }
0x16c0   : > { %v3462_v15 = vpop.xlane.xlu0 %3461 }
0x16c1   : > { %v3470_v16 = vsub.f32 %v3454_v56, %v3462_v15 }
0x16c3   : > { %v3475_v19 = vmul.f32 1.442695, %v3470_v16 }
0x16c4   : > { %v3465_v20 = vpop.xlane.xlu0 %3464  ;;  %v3468_v17 = vpop.xlane.xlu1 %3467 }
0x16c5   : > { %6874 = vpow2.f32 %v3475_v19  ;;  %v3471_v12 = vsub.f32 %v3455_v8, %v3465_v20  ;;  %v3472_v25 = vsub.f32 %v3456_v61, %v3468_v17 }
0x16c7   : > { %v3477_v26 = vmul.f32 1.442695, %v3471_v12  ;;  %v3479_v21 = vmul.f32 1.442695, %v3472_v25 }
0x16c8   : > { %v3502_v27 = vpop.permute.xlu0 %3501  ;;  %v3578_v22 = vpop.permute.xlu1 %3577 }
0x16c9   : > { %6876 = vpow2.f32 %v3477_v26  ;;  %6451 = vmatpush3.msra.mxu0 %v3502_v27  ;;  %6456 = vmatpush3.msra.mxu1 %v3578_v22 }
0x16ca   : > { %6878 = vpow2.f32 %v3479_v21  ;;  %6460 = vmatprep.subr.mxu0 %v6987_v6  ;;  %6465 = vmatprep.subr.mxu1 %v6987_v6 }
0x16cf   : > { %v6875_v23 = vpop.eup %6874 }
0x16d0   : > { %v3484_v28 = vsel %vm576_vm2, %v6875_v23, 0.0 }
0x16d1   : > { %3485 = vadd.xlane.f32.xlu1 %v3484_v28 }
0x16d3   : > { %v6877_v32 = vpop.eup %6876 }
0x16d4   : > { %v6879_v33 = vpop.eup %6878  ;;  %v3487_v34 = vsel %vm576_vm2, %v6877_v32, 0.0 }
0x16d5   : > { %3488 = vadd.xlane.f32.xlu0 %v3487_v34  ;;  %v3490_v10 = vsel %vm576_vm2, %v6879_v33, 0.0  ;;  %v5952_v34 = vld [vmem:[%s8074_s4 + $0x48] sm:$0xff] }
0x16d6   : > { %3491 = vadd.xlane.f32.xlu1 %v3490_v10 }
0x16e7   : > { %3653 = vrot.lane.b32.xlu1 %v7588_v35, %s8115_s28 }
0x16eb   : > { %3729 = vrot.lane.b32.xlu0 %v7593_v37, %s8115_s28 }
0x16f9   : > { %v3483_v36 = vpop.xlane.xlu0 %3482 }
0x16fa   : > { %6880 = vrcp.f32 %v3483_v36  ;;  %v5953_v36 = vld [vmem:[%s8074_s4 + $0x50] sm:$0xff] }
0x1704   : > { %v6881_v38 = vpop.eup %6880 }
0x1705   : > { %v3497_v40 = vmul.f32 %v6881_v38, %v6873_v13  ;;  %v5954_v38 = vld [vmem:[%s8074_s4 + $0x58] sm:$0xff] }
0x1707   : > { %6453 = vmatmul.mubr.msk.f32.vlgmr.msra.gmra.mrb[32].mxu0 %vm576_vm2, %v3497_v40  ;;  %v6714_v40 = vpack.c.bf16 %v5954_v38, %v5953_v36  ;;  %v5984_v36 = vld [vmem:[%s8072_s2 + $0x68] sm:$0xff] }
0x1708   : > { %6462 = vmatprep.mubr.msk.f32.mxu0 %vm6986_vm0, %v6987_v6 }
0x175e   : > { %v3486_v41 = vpop.xlane.xlu1 %3485 }
0x175f   : > { %6882 = vrcp.f32 %v3486_v41 }
0x1762   : > { %v3489_v42 = vpop.xlane.xlu0 %3488 }
0x1763   : > { %6884 = vrcp.f32 %v3489_v42  ;;  %v3492_v43 = vpop.xlane.xlu1 %3491 }
0x1764   : > { %6886 = vrcp.f32 %v3492_v43 }
0x1766   : > { %v3730_v46 = vpop.permute.xlu0 %3729 }
0x1767   : > { %v3654_v44 = vpop.permute.xlu1 %3653 }
0x1768   : > { %6461 = vmatpush3.msra.mxu0 %v3654_v44  ;;  %v4122_v44 = vrot.slane %v7580_v31, %v7296_v2 }
0x1769   : > { %v6883_v35 = vpop.eup %6882  ;;  %6470 = vmatprep.subr.mxu0 %v6987_v6 }
0x176a   : > { %v3498_v37 = vmul.f32 %v6883_v35, %v6875_v23 }
0x176c   : > { %6458 = vmatmul.mubr.msk.f32.vlgmr.msra.gmra.mrb[38].mxu1 %vm576_vm2, %v3498_v37 }
0x176d   : > { %v6885_v48 = vpop.eup %6884  ;;  %6466 = vmatpush3.msra.mxu1 %v3730_v46  ;;  %6467 = vmatprep.mubr.msk.f32.mxu1 %vm6986_vm0, %v6987_v6  ;;  %v4127_v46 = vrot.slane %v7580_v31, %v7299_v4 }
0x176e   : > { %v6887_v49 = vpop.eup %6886  ;;  %v3499_v50 = vmul.f32 %v6885_v48, %v6877_v32  ;;  %6475 = vmatprep.subr.mxu1 %v6987_v6 }
0x176f   : > { %v3500_v52 = vmul.f32 %v6887_v49, %v6879_v33  ;;  %v5951_v33 = vld [vmem:[%s8074_s4 + $0x40] sm:$0xff] }
0x1770   : > { %6463 = vmatmul.mubr.msk.f32.vlgmr.msra.gmra.mrb[34].mxu0 %vm576_vm2, %v3499_v50  ;;  %v6711_v10 = vpack.c.bf16 %v5952_v34, %v5951_v33  ;;  %v5955_v50 = vld [vmem:[%s8075_s5 + $0x80] sm:$0xff] }
0x1771   : > { %6468 = vmatmul.mubr.msk.f32.vlgmr.msra.gmra.mrb[40].mxu1 %vm576_vm2, %v3500_v52  ;;  %6471 = vmatpush3.msra.mxu0 %v5947_v51  ;;  %v5956_v51 = vld [vmem:[%s8075_s5 + $0x88] sm:$0xff] }
0x1772   : > { %6472 = vmatprep.mubr.msk.f32.mxu0 %vm6986_vm0, %v6987_v6  ;;  %6477 = vmatprep.mubr.msk.f32.mxu1 %vm6986_vm0, %v6987_v6  ;;  %v6717_v52 = vpack.c.bf16 %v5956_v51, %v5955_v50 }
0x1773   : > { %6480 = vmatprep.subr.mxu0 %v6987_v6  ;;  %6476 = vmatpush3.msra.mxu1 %v5948_v53  ;;  %v5957_v53 = vld [vmem:[%s8075_s5 + $0x90] sm:$0xff] }
0x1774   : > { %6485 = vmatprep.subr.mxu1 %v6987_v6 }
0x17da   : > { %v3573_v55 = vpop.f32.mrb[32].mxu0 }
0x17db   : > { %v6454_v56 = vpop.f32.mrb[33].mxu0  ;;  %6473 = vmatmul.mubr.msk.f32.vlgmr.msra.gmra.mrb[36].mxu0 %vm576_vm2, %v3573_v55 }
0x17dc   : > { %6481 = vmatpush3.msra.mxu0 %v5949_v54  ;;  %6482 = vmatprep.mubr.msk.f32.mxu0 %vm6986_vm0, %v6987_v6  ;;  %v5958_v54 = vld [vmem:[%s8075_s5 + $0x98] sm:$0xff]  ;;  %v5959_v56 = vld [vmem:[%s8075_s5 + $0xa0] sm:$0xff] }
0x17dd   : > { %6710 = vmatprep.subr.bf16.mxu0 %v6985_v3  ;;  %v6720_v55 = vpack.c.bf16 %v5958_v54, %v5957_v53 }
0x183f   : > { %v3649_v58 = vpop.f32.mrb[38].mxu1 }
0x1840   : > { %v6459_v59 = vpop.f32.mrb[39].mxu1  ;;  %6478 = vmatmul.mubr.msk.f32.vlgmr.msra.gmra.mrb[42].mxu1 %vm576_vm2, %v3649_v58 }
0x1841   : > { %6486 = vmatpush3.msra.mxu1 %v5950_v57  ;;  %6487 = vmatprep.mubr.msk.f32.mxu1 %vm6986_vm0, %v6987_v6  ;;  %v5960_v57 = vld [vmem:[%s8075_s5 + $0xa8] sm:$0xff]  ;;  %v5961_v59 = vld [vmem:[%s8075_s5 + $0xb0] sm:$0xff] }
0x1842   : > { %6716 = vmatprep.subr.bf16.mxu1 %v6985_v3  ;;  %v6723_v58 = vpack.c.bf16 %v5960_v57, %v5959_v56 }
0x1843   : > { %v3725_v60 = vpop.f32.mrb[34].mxu0 }
0x1844   : > { %v3801_v8 = vpop.f32.mrb[40].mxu1  ;;  %v6464_v61 = vpop.f32.mrb[35].mxu0  ;;  %6483 = vmatmul.mubr.msk.f32.vlgmr.msra.gmra.mrb[38].mxu0 %vm576_vm2, %v3725_v60  ;;  %v5962_v60 = vld [vmem:[%s8075_s5 + $0xb8] sm:$0xff] }
0x1845   : > { %v6469_v24 = vpop.f32.mrb[41].mxu1  ;;  %6488 = vmatmul.mubr.msk.f32.vlgmr.msra.gmra.mrb[44].mxu1 %vm576_vm2, %v3801_v8  ;;  %6498 = vmatprep.mubr.msk.f32.mxu0 %vm6986_vm0, %v6987_v6  ;;  %v6726_v8 = vpack.c.bf16 %v5962_v60, %v5961_v59  ;;  %v4132_v61 = vrot.slane %v7580_v31, %v7337_v30 }
0x1846   : > { %6517 = vmatprep.mubr.msk.f32.mxu1 %vm6986_vm0, %v6987_v6  ;;  %6712 = vmatpush3.bf16.msra.mxu0 %v6711_v10  ;;  %v5983_v10 = vld [vmem:[%s8072_s2 + $0x60] sm:$0xff] }
0x1847   : > { %6713 = vmatprep.subr.bf16.mxu0 %v6985_v3  ;;  %6718 = vmatpush3.bf16.msra.mxu1 %v6717_v52  ;;  %v6729_v38 = vpack.c.bf16 %v5984_v36, %v5983_v10  ;;  %v7774_v52 = vld [vmem:[%s8076_s6 + $0x18] sm:$0xff] }
0x1848   : > { %6719 = vmatprep.subr.bf16.mxu1 %v6985_v3  ;;  %v4345_v53 = vrot.slane %v7774_v52, %v7150_v11 }
0x184a   : > { %6715 = vmatpush3.bf16.msra.mxu0 %v6714_v40  ;;  %v5985_v40 = vld [vmem:[%s8072_s2 + $0x70] sm:$0xff] }
0x184b   : > { %6728 = vmatprep.subr.bf16.mxu0 %v6985_v3  ;;  %6721 = vmatpush3.bf16.msra.mxu1 %v6720_v55 }
0x184c   : > { %6722 = vmatprep.subr.bf16.mxu1 %v6985_v3 }
0x184f   : > { %6724 = vmatpush3.bf16.msra.mxu1 %v6723_v58 }
0x1850   : > { %6725 = vmatprep.subr.bf16.mxu1 %v6985_v3 }
0x1853   : > { %6727 = vmatpush3.bf16.msra.mxu1 %v6726_v8 }
0x1854   : > { %6536 = vmatprep.subr.mxu1 %v6987_v6 }
0x18ae   : > { %v3874_v62 = vpop.f32.mrb[36].mxu0 }
0x18af   : > { %v6474_v63 = vpop.f32.mrb[37].mxu0  ;;  %v3882_v7 = vadd.f32 %v3881_v0, %v3874_v62 }
0x1913   : > { %v3952_v13 = vpop.f32.mrb[42].mxu1 }
0x1914   : > { %v3956_v14 = vadd.f32 %v3952_v13, %v3882_v7  ;;  %v6479_v15 = vpop.f32.mrb[43].mxu1 }
0x1917   : > { %v4026_v16 = vpop.f32.mrb[38].mxu0 }
0x1918   : > { %v4030_v19 = vadd.f32 %v4026_v16, %v3956_v14  ;;  %v4100_v20 = vpop.f32.mrb[44].mxu1  ;;  %v6484_v17 = vpop.f32.mrb[39].mxu0 }
0x1919   : > { %v6489_v12 = vpop.f32.mrb[45].mxu1 }
0x191a   : > { %v4104_v25 = vadd.f32 %v4100_v20, %v4030_v19  ;;  %v4218_v12 = vrot.slane %v7580_v31, %v7345_v45 }
0x191c   : > { %v4105_v26 = vadd.f32 %v4104_v25, %v7571_v29 }
0x191e   : > { %v4106_v21 = vsel %vm493_vm1, %v4105_v26, 0.0 }
0x191f   : > { %4107 = vadd.xlane.f32.xlu1 %v4106_v21 }
0x19ac   : > { %v4108_v27 = vpop.xlane.xlu1 %4107 }
0x19ad   : > { %v4109_v22 = vmul.f32 0.03125, %v4108_v27 }
0x19af   : > { %v4110_v23 = vsub.f32 %v4105_v26, %v4109_v22 }
0x19b1   : > { %v4111_v28 = vmul.f32 %v4110_v23, %v4110_v23 }
0x19b3   : > { %v4112_v32 = vsel %vm493_vm1, %v4111_v28, 0.0 }
0x19b4   : > { %4113 = vadd.xlane.f32.xlu0 %v4112_v32 }
0x1a41   : > { %v4114_v41 = vpop.xlane.xlu0 %4113 }
0x1a42   : > { %v4115_v42 = vmul.f32 0.03125, %v4114_v41  ;;  %v5986_v41 = vld [vmem:[%s8072_s2 + $0x78] sm:$0xff] }
0x1a44   : > { %v4116_v43 = vadd.f32 1e-07, %v4115_v42  ;;  %v6732_v42 = vpack.c.bf16 %v5986_v41, %v5985_v40 }
0x1a46   : > { %6888 = vrsqrt.f32 %v4116_v43 }
0x1a50   : > { %v6889_v35 = vpop.eup %6888 }
0x1a51   : > { %v4118_v37 = vmul.f32 %v6889_v35, %v4110_v23 }
0x1a53   : > { %v4123_v48 = vmul.f32 %v4122_v44, %v4118_v37  ;;  %v4309_v37 = vrot.slane %v7580_v31, %v7366_v1 }
0x1a55   : > { %v4128_v49 = vadd.f32 %v4127_v46, %v4123_v48 }
0x1a57   : > { %6499 = vmatmul.mubr.msk.f32.vlgmr.msra.gmra.mrb[40].mxu0 %vm493_vm1, %v4128_v49 }
0x1a58   : > { %6528 = vmatprep.mubr.msk.f32.mxu0 %vm6986_vm0, %v6987_v6  ;;  %6730 = vmatpush3.bf16.msra.mxu0 %v6729_v38 }
0x1a59   : > { %6731 = vmatprep.subr.bf16.mxu0 %v6985_v3 }
0x1a5c   : > { %6733 = vmatpush3.bf16.msra.mxu0 %v6732_v42 }
0x1a5d   : > { %6531 = vmatprep.subr.mxu0 %v6987_v6 }
0x1b2a   : > { %v4202_v24 = vpop.f32.mrb[40].mxu0 }
0x1b2b   : > { %v4203_v62 = vadd.f32 %v4202_v24, %v4132_v61  ;;  %v6500_v63 = vpop.f32.mrb[41].mxu0 }
0x1b2d   : > { %v4207_v0 = vmul.f32 0.044715, %v4203_v62  ;;  %v4206_v19 = vmul.f32 0.5, %v4203_v62 }
0x1b2f   : > { %v4208_v7 = vmul.f32 %v4207_v0, %v4203_v62 }
0x1b31   : > { %v4209_v13 = vmul.f32 %v4208_v7, %v4203_v62 }
0x1b33   : > { %v4210_v14 = vadd.f32 %v4209_v13, %v4203_v62 }
0x1b35   : > { %v4211_v15 = vmul.f32 0.7978846, %v4210_v14 }
0x1b37   : > { %6890 = vtanh.f32 %v4211_v15 }
0x1b41   : > { %v6891_v16 = vpop.eup %6890 }
0x1b42   : > { %v4213_v20 = vadd.f32 1.0, %v6891_v16 }
0x1b44   : > { %v4214_v17 = vmul.f32 %v4213_v20, %v4206_v19 }
0x1b46   : > { %6518 = vmatmul.mubr.msk.f32.vlgmr.msra.gmra.mrb[46].mxu1 %vm1656_vm3, %v4214_v17 }
0x1b47   : > { %6538 = vmatprep.mubr.msk.f32.mxu1 %vm6986_vm0, %v6987_v6 }
0x1c19   : > { %v4288_v25 = vpop.f32.mrb[46].mxu1 }
0x1c1a   : > { %v4289_v26 = vadd.f32 %v4288_v25, %v4218_v12  ;;  %v6519_v21 = vpop.f32.mrb[47].mxu1 }
0x1c1c   : > { %v4292_v27 = vadd.f32 %v4289_v26, %v4128_v49  ;;  %v4314_v49 = vrot.slane %v7580_v31, %v7369_v5 }
0x1c1e   : > { %v4293_v22 = vsel %vm493_vm1, %v4292_v27, 0.0 }
0x1c1f   : > { %4294 = vadd.xlane.f32.xlu0 %v4293_v22 }
0x1cac   : > { %v4295_v23 = vpop.xlane.xlu0 %4294 }
0x1cad   : > { %v4296_v28 = vmul.f32 0.03125, %v4295_v23 }
0x1caf   : > { %v4297_v32 = vsub.f32 %v4292_v27, %v4296_v28 }
0x1cb1   : > { %v4298_v33 = vmul.f32 %v4297_v32, %v4297_v32 }
0x1cb3   : > { %v4299_v34 = vsel %vm493_vm1, %v4298_v33, 0.0 }
0x1cb4   : > { %4300 = vadd.xlane.f32.xlu1 %v4299_v34 }
0x1d41   : > { %v4301_v43 = vpop.xlane.xlu1 %4300 }
0x1d42   : > { %v4302_v44 = vmul.f32 0.03125, %v4301_v43 }
0x1d44   : > { %v4303_v35 = vadd.f32 1e-07, %v4302_v44 }
0x1d46   : > { %6892 = vrsqrt.f32 %v4303_v35 }
0x1d50   : > { %v6893_v46 = vpop.eup %6892 }
0x1d51   : > { %v4305_v48 = vmul.f32 %v6893_v46, %v4297_v32 }
0x1d53   : > { %v4310_v50 = vmul.f32 %v4309_v37, %v4305_v48 }
0x1d55   : > { %v7765_v51 = vadd.f32 %v4314_v49, %v4310_v50 }
0x1d57   : > { %6529 = vmatmul.mubr.msk.f32.vlgmr.msra.gmra.mrb[42].mxu0 %vm493_vm1, %v7765_v51 }
0x1d58   : > { %6533 = vmatprep.mubr.msk.f32.mxu0 %vm6986_vm0, %v6987_v6 }
0x1e2a   : > { %v4415_v54 = vpop.f32.mrb[42].mxu0 }
0x1e2b   : > { %v4416_v55 = vadd.f32 %v4415_v54, %v4345_v53  ;;  %v6530_v31 = vpop.f32.mrb[43].mxu0 }
0x1e2d   : > { %4422 = vrot.lane.b32.xlu1 %v4416_v55, %s8111_s26  ;;  %4420 = vrot.lane.b32.xlu0 %v4416_v55, %s8112_s0  ;;  %s458_s26 = scalar_lea.vmem %s8079_s9, %s7133_s15  ;;  %s440_s0 = sand.u32 1, %s6975_s22  }
0x1e2e   : > { %s5745_s30 = scalar_lea.sflag [#allocation3], %s440_s0 }
0x1e31   : > { %4424 = vrot.lane.b32.xlu1 %v4416_v55, %s8113_s1  ;;  %4426 = vrot.lane.b32.xlu0 %v4416_v55, %s8114_s17 }
0x1e9f   : > { %v7782_v56 = vpop.permute.xlu1 %4422  ;;  %v7784_v57 = vpop.permute.xlu0 %4420 }
0x1ea0   : > { %4578 = vrot.lane.b32.xlu0 %v7782_v56, %s8114_s17  ;;  %4502 = vrot.lane.b32.xlu1 %v7784_v57, %s8114_s17 }
0x1ea3   : > { %v7790_v11 = vpop.permute.xlu1 %4424  ;;  %v4427_v58 = vpop.permute.xlu0 %4426 }
0x1ea4   : > { %4654 = vrot.lane.b32.xlu1 %v7790_v11, %s8114_s17  ;;  %6532 = vmatpush3.xpose.msk.msra.mxu0 %vm576_vm2, %v4427_v58 }
0x1ea5   : > { %6541 = vmatprep.subr.mxu0 %v6987_v6 }
0x1ea7   : > { %6534 = vmatmul.mubr.msk.f32.vlgmr.msra.gmra.mrb[44].mxu0 %vm576_vm2, %v4416_v55 }
0x1ea8   : > { %6543 = vmatprep.mubr.msk.f32.mxu0 %vm6986_vm0, %v6987_v6 }
0x1f12   : > { %v4503_v59 = vpop.permute.xlu1 %4502  ;;  %v4579_v60 = vpop.permute.xlu0 %4578 }
0x1f13   : > { %6537 = vmatpush3.xpose.msk.msra.mxu1 %vm576_vm2, %v4503_v59  ;;  %6542 = vmatpush3.xpose.msk.msra.mxu0 %vm576_vm2, %v4579_v60 }
0x1f14   : > { %6546 = vmatprep.subr.mxu1 %v6987_v6  ;;  %6551 = vmatprep.subr.mxu0 %v6987_v6 }
0x1f16   : > { %6539 = vmatmul.mubr.msk.f32.vlgmr.msra.gmra.mrb[48].mxu1 %vm576_vm2, %v7784_v57  ;;  %v4655_v8 = vpop.permute.xlu1 %4654  ;;  %6544 = vmatmul.mubr.msk.f32.vlgmr.msra.gmra.mrb[46].mxu0 %vm576_vm2, %v7782_v56 }
0x1f17   : > { %6547 = vmatpush3.xpose.msk.msra.mxu1 %vm576_vm2, %v4655_v8  ;;  %6548 = vmatprep.mubr.msk.f32.mxu1 %vm6986_vm0, %v6987_v6 }
0x1f18   : > { %6553 = vmatprep.mubr.msk.f32.mxu0 %vm6986_vm0, %v6987_v6  ;;  %6556 = vmatprep.subr.mxu1 %v6987_v6 }
0x1f1a   : > { %6549 = vmatmul.mubr.msk.f32.vlgmr.msra.gmra.mrb[50].mxu1 %vm576_vm2, %v7790_v11 }
0x1f1b   : > { %6558 = vmatprep.mubr.msk.f32.mxu1 %vm6986_vm0, %v6987_v6 }
0x1f7a   : > { %v4498_v61 = vpop.f32.mrb[44].mxu0 }
0x1f7b   : > { %v4730_v24 = vmul.f32 0.35355338, %v4498_v61  ;;  %v6535_v62 = vpop.f32.mrb[45].mxu0 }
0x1f7c   : > { %v5987_v62 = vld [vmem:[%s8073_s3 + $0x60] sm:$0xff] }
0x1f7d   : > { %v4734_v63 = vadd.f32 %v7620_v47, %v4730_v24 }
0x1f7f   : > { %v4738_v0 = vsel %vm576_vm2, %v4734_v63, -inf }
0x1f80   : > { %4739 = vmax.xlane.f32.xlu0 %v4738_v0 }
0x1fe9   : > { %v4574_v7 = vpop.f32.mrb[48].mxu1  ;;  %v4650_v13 = vpop.f32.mrb[46].mxu0 }
0x1fea   : > { %v4731_v14 = vmul.f32 0.35355338, %v4574_v7  ;;  %v4732_v15 = vmul.f32 0.35355338, %v4650_v13  ;;  %v6540_v16 = vpop.f32.mrb[49].mxu1  ;;  %v6545_v19 = vpop.f32.mrb[47].mxu0 }
0x1fec   : > { %v4736_v20 = vadd.f32 %v7620_v47, %v4732_v15  ;;  %v4735_v17 = vadd.f32 %v7620_v47, %v4731_v14  ;;  %v5988_v14 = vld [vmem:[%s8073_s3 + $0x68] sm:$0xff]  ;;  %v5989_v15 = vld [vmem:[%s8073_s3 + $0x70] sm:$0xff] }
0x1fed   : > { %v4726_v12 = vpop.f32.mrb[50].mxu1 }
0x1fee   : > { %v4733_v25 = vmul.f32 0.35355338, %v4726_v12  ;;  %v6550_v26 = vpop.f32.mrb[51].mxu1  ;;  %v4744_v21 = vsel %vm576_vm2, %v4736_v20, -inf  ;;  %v4741_v27 = vsel %vm576_vm2, %v4735_v17, -inf }
0x1fef   : > { %4745 = vmax.xlane.f32.xlu0 %v4744_v21  ;;  %4742 = vmax.xlane.f32.xlu1 %v4741_v27 }
0x1ff0   : > { %v4737_v22 = vadd.f32 %v7620_v47, %v4733_v25 }
0x1ff2   : > { %v4747_v23 = vsel %vm576_vm2, %v4737_v22, -inf }
0x1ff3   : > { %4748 = vmax.xlane.f32.xlu0 %v4747_v23 }
0x2000   : > { %4782 = vrot.lane.b32.xlu1 %v4416_v55, %s8115_s28 }
0x200d   : > { %v4740_v28 = vpop.xlane.xlu0 %4739 }
0x200e   : > { %v4750_v32 = vsub.f32 %v4734_v63, %v4740_v28  ;;  %v5162_v28 = vrot.slane %v7774_v52, %v7274_v39 }
0x2010   : > { %v4754_v33 = vmul.f32 1.442695, %v4750_v32 }
0x2012   : > { %6894 = vpow2.f32 %v4754_v33 }
0x201c   : > { %v6895_v34 = vpop.eup %6894 }
0x201d   : > { %v4762_v10 = vsel %vm576_vm2, %v6895_v34, 0.0 }
0x2024   : > { %4763 = vadd.xlane.f32.xlu1 %v4762_v10 }
0x207c   : > { %v4746_v36 = vpop.xlane.xlu0 %4745  ;;  %v4743_v38 = vpop.xlane.xlu1 %4742 }
0x207d   : > { %v4752_v40 = vsub.f32 %v4736_v20, %v4746_v36  ;;  %v4751_v41 = vsub.f32 %v4735_v17, %v4743_v38  ;;  %v5990_v17 = vld [vmem:[%s8073_s3 + $0x78] sm:$0xff] }
0x207f   : > { %v4758_v42 = vmul.f32 1.442695, %v4752_v40  ;;  %v4756_v43 = vmul.f32 1.442695, %v4751_v41 }
0x2080   : > { %v4783_v47 = vpop.permute.xlu1 %4782  ;;  %v4749_v44 = vpop.xlane.xlu0 %4748 }
0x2081   : > { %6896 = vpow2.f32 %v4758_v42  ;;  %v4753_v35 = vsub.f32 %v4737_v22, %v4749_v44  ;;  %6552 = vmatpush3.msra.mxu0 %v4783_v47 }
0x2082   : > { %6898 = vpow2.f32 %v4756_v43  ;;  %6561 = vmatprep.subr.mxu0 %v6987_v6 }
0x2083   : > { %v4760_v37 = vmul.f32 1.442695, %v4753_v35 }
0x2085   : > { %6900 = vpow2.f32 %v4760_v37 }
0x208b   : > { %v6897_v46 = vpop.eup %6896 }
0x208c   : > { %v6899_v48 = vpop.eup %6898  ;;  %v4768_v49 = vsel %vm576_vm2, %v6897_v46, 0.0 }
0x208d   : > { %4769 = vadd.xlane.f32.xlu1 %v4768_v49  ;;  %v4765_v50 = vsel %vm576_vm2, %v6899_v48, 0.0  ;;  %v5991_v49 = vld [vmem:[%s8074_s4 + $0x60] sm:$0xff] }
0x208e   : > { %4766 = vadd.xlane.f32.xlu0 %v4765_v50  ;;  %v5992_v50 = vld [vmem:[%s8074_s4 + $0x68] sm:$0xff] }
0x208f   : > { %v6901_v53 = vpop.eup %6900 }
0x2090   : > { %v4771_v54 = vsel %vm576_vm2, %v6901_v53, 0.0 }
0x2092   : > { %4772 = vadd.xlane.f32.xlu0 %v4771_v54  ;;  %v5993_v54 = vld [vmem:[%s8074_s4 + $0x70] sm:$0xff] }
0x209e   : > { %4934 = vrot.lane.b32.xlu1 %v7782_v56, %s8115_s28 }
0x20a2   : > { %5010 = vrot.lane.b32.xlu1 %v7790_v11, %s8115_s28 }
0x20a8   : > { %4858 = vrot.lane.b32.xlu0 %v7784_v57, %s8115_s28 }
0x20b1   : > { %v4764_v55 = vpop.xlane.xlu1 %4763 }
0x20b2   : > { %6902 = vrcp.f32 %v4764_v55  ;;  %v5994_v55 = vld [vmem:[%s8074_s4 + $0x78] sm:$0xff] }
0x20bc   : > { %v6903_v31 = vpop.eup %6902 }
0x20bd   : > { %v4778_v58 = vmul.f32 %v6903_v31, %v6895_v34 }
0x20bf   : > { %6554 = vmatmul.mubr.msk.f32.vlgmr.msra.gmra.mrb[48].mxu0 %vm576_vm2, %v4778_v58 }
0x20c0   : > { %6563 = vmatprep.mubr.msk.f32.mxu0 %vm6986_vm0, %v6987_v6 }
0x211a   : > { %v4770_v59 = vpop.xlane.xlu1 %4769 }
0x211b   : > { %6904 = vrcp.f32 %v4770_v59  ;;  %v4767_v60 = vpop.xlane.xlu0 %4766 }
0x211c   : > { %6906 = vrcp.f32 %v4767_v60  ;;  %v5403_v60 = vrot.slane %v7774_v52, %v7296_v2  ;;  %v5996_v2 = vld [vmem:[%s8075_s5 + $0xc8] sm:$0xff] }
0x211e   : > { %v4935_v56 = vpop.permute.xlu1 %4934 }
0x211f   : > { %v4773_v8 = vpop.xlane.xlu0 %4772  ;;  %6562 = vmatpush3.msra.mxu0 %v4935_v56 }
0x2120   : > { %6908 = vrcp.f32 %v4773_v8  ;;  %6571 = vmatprep.subr.mxu0 %v6987_v6 }
0x2122   : > { %v5011_v0 = vpop.permute.xlu1 %5010 }
0x2123   : > { %v4859_v57 = vpop.permute.xlu0 %4858 }
0x2124   : > { %6557 = vmatpush3.msra.mxu1 %v4859_v57  ;;  %v5408_v57 = vrot.slane %v7774_v52, %v7299_v4  ;;  %v5997_v4 = vld [vmem:[%s8075_s5 + $0xd0] sm:$0xff] }
0x2125   : > { %v6905_v11 = vpop.eup %6904  ;;  %6566 = vmatprep.subr.mxu1 %v6987_v6 }
0x2126   : > { %v6907_v61 = vpop.eup %6906  ;;  %v4780_v24 = vmul.f32 %v6905_v11, %v6897_v46 }
0x2127   : > { %v4779_v63 = vmul.f32 %v6907_v61, %v6899_v48 }
0x2128   : > { %6564 = vmatmul.mubr.msk.f32.vlgmr.msra.gmra.mrb[50].mxu0 %vm576_vm2, %v4780_v24  ;;  %v5995_v24 = vld [vmem:[%s8075_s5 + $0xc0] sm:$0xff] }
0x2129   : > { %6559 = vmatmul.mubr.msk.f32.vlgmr.msra.gmra.mrb[52].mxu1 %vm576_vm2, %v4779_v63  ;;  %6572 = vmatpush3.msra.mxu0 %v5987_v62  ;;  %v6741_v62 = vpack.c.bf16 %v5996_v2, %v5995_v24  ;;  %v5998_v63 = vld [vmem:[%s8075_s5 + $0xd8] sm:$0xff] }
0x212a   : > { %v6909_v7 = vpop.eup %6908  ;;  %6567 = vmatpush3.msra.mxu1 %v5011_v0  ;;  %6568 = vmatprep.mubr.msk.f32.mxu1 %vm6986_vm0, %v6987_v6  ;;  %v6744_v0 = vpack.c.bf16 %v5998_v63, %v5997_v4  ;;  %v5626_v24 = vld [vmem:[%s8077_s7 + $0x78] sm:$0xff] }
0x212b   : > { %v4781_v13 = vmul.f32 %v6909_v7, %v6901_v53  ;;  %6573 = vmatprep.mubr.msk.f32.mxu0 %vm6986_vm0, %v6987_v6  ;;  %6576 = vmatprep.subr.mxu1 %v6987_v6  ;;  %v6735_v53 = vpack.c.bf16 %v5992_v50, %v5991_v49  ;;  %v6000_v7 = vld [vmem:[%s8075_s5 + $0xe8] sm:$0xff] }
0x212c   : > { %6581 = vmatprep.subr.mxu0 %v6987_v6  ;;  %v5616_v49 = vld [vmem:[%s8077_s7 + $0x28] sm:$0xff] }
0x212d   : > { %6569 = vmatmul.mubr.msk.f32.vlgmr.msra.gmra.mrb[54].mxu1 %vm576_vm2, %v4781_v13 }
0x212e   : > { %6577 = vmatpush3.msra.mxu1 %v5988_v14  ;;  %6578 = vmatprep.mubr.msk.f32.mxu1 %vm6986_vm0, %v6987_v6  ;;  %v6001_v14 = vld [vmem:[%s8075_s5 + $0xf0] sm:$0xff] }
0x212f   : > { %6586 = vmatprep.subr.mxu1 %v6987_v6 }
0x2192   : > { %v4854_v16 = vpop.f32.mrb[48].mxu0 }
0x2193   : > { %v6555_v19 = vpop.f32.mrb[49].mxu0  ;;  %6574 = vmatmul.mubr.msk.f32.vlgmr.msra.gmra.mrb[52].mxu0 %vm576_vm2, %v4854_v16 }
0x2194   : > { %6582 = vmatpush3.msra.mxu0 %v5989_v15  ;;  %6583 = vmatprep.mubr.msk.f32.mxu0 %vm6986_vm0, %v6987_v6  ;;  %v6002_v15 = vld [vmem:[%s8075_s5 + $0xf8] sm:$0xff]  ;;  %v5413_v19 = vrot.slane %v7774_v52, %v7337_v30 }
0x2195   : > { %6734 = vmatprep.subr.bf16.mxu0 %v6985_v3  ;;  %v6750_v16 = vpack.c.bf16 %v6002_v15, %v6001_v14  ;;  %v5595_v14 = vrot.slane %v7774_v52, %v7369_v5  ;;  %v6023_v5 = vld [vmem:[%s8078_s8] ss:$0 sm:$0xff] }
0x21fb   : > { %v5006_v20 = vpop.f32.mrb[50].mxu0 }
0x21fc   : > { %v4930_v12 = vpop.f32.mrb[52].mxu1  ;;  %v6565_v25 = vpop.f32.mrb[51].mxu0  ;;  %6584 = vmatmul.mubr.msk.f32.vlgmr.msra.gmra.mrb[54].mxu0 %vm576_vm2, %v5006_v20 }
0x21fd   : > { %v6560_v26 = vpop.f32.mrb[53].mxu1  ;;  %6579 = vmatmul.mubr.msk.f32.vlgmr.msra.gmra.mrb[56].mxu1 %vm576_vm2, %v4930_v12  ;;  %6599 = vmatprep.mubr.msk.f32.mxu0 %vm6986_vm0, %v6987_v6 }
0x21fe   : > { %6587 = vmatpush3.msra.mxu1 %v5990_v17  ;;  %6588 = vmatprep.mubr.msk.f32.mxu1 %vm6986_vm0, %v6987_v6 }
0x21ff   : > { %6740 = vmatprep.subr.bf16.mxu1 %v6985_v3  ;;  %6736 = vmatpush3.bf16.msra.mxu0 %v6735_v53  ;;  %v5617_v53 = vld [vmem:[%s8077_s7 + $0x30] sm:$0xff] }
0x2200   : > { %v5082_v21 = vpop.f32.mrb[54].mxu1  ;;  %6737 = vmatprep.subr.bf16.mxu0 %v6985_v3 }
0x2201   : > { %v6570_v27 = vpop.f32.mrb[55].mxu1  ;;  %6589 = vmatmul.mubr.msk.f32.vlgmr.msra.gmra.mrb[58].mxu1 %vm576_vm2, %v5082_v21 }
0x2202   : > { %6618 = vmatprep.mubr.msk.f32.mxu1 %vm6986_vm0, %v6987_v6  ;;  %6742 = vmatpush3.bf16.msra.mxu1 %v6741_v62 }
0x2203   : > { %6743 = vmatprep.subr.bf16.mxu1 %v6985_v3 }
0x2206   : > { %6745 = vmatpush3.bf16.msra.mxu1 %v6744_v0  ;;  %v6994_v0 = vmov 0  }
0x2207   : > { %6746 = vmatprep.subr.bf16.mxu1 %v6985_v3  ;;  %6827 = vset.pattern.permute.xlu0 %v6994_v0 }
0x2266   : > { %v5155_v22 = vpop.f32.mrb[52].mxu0 }
0x2267   : > { %v6575_v23 = vpop.f32.mrb[53].mxu0  ;;  %v5163_v32 = vadd.f32 %v5162_v28, %v5155_v22 }
0x22cf   : > { %v5307_v33 = vpop.f32.mrb[54].mxu0 }
0x22d0   : > { %v5233_v34 = vpop.f32.mrb[56].mxu1  ;;  %v6585_v10 = vpop.f32.mrb[55].mxu0 }
0x22d1   : > { %v5237_v36 = vadd.f32 %v5233_v34, %v5163_v32  ;;  %v6580_v38 = vpop.f32.mrb[57].mxu1  ;;  %v5499_v34 = vrot.slane %v7774_v52, %v7345_v45  ;;  %v5611_v45 = vld [vmem:[%s8077_s7] sm:$0xff] }
0x22d3   : > { %v5311_v40 = vadd.f32 %v5307_v33, %v5237_v36 }
0x22d4   : > { %v5381_v41 = vpop.f32.mrb[58].mxu1 }
0x22d5   : > { %v5385_v42 = vadd.f32 %v5381_v41, %v5311_v40  ;;  %v6590_v43 = vpop.f32.mrb[59].mxu1 }
0x22d7   : > { %v5386_v47 = vadd.f32 %v5385_v42, %v7765_v51 }
0x22d9   : > { %v5387_v44 = vsel %vm493_vm1, %v5386_v47, 0.0 }
0x22da   : > { %5388 = vadd.xlane.f32.xlu0 %v5387_v44 }
0x2367   : > { %v5389_v35 = vpop.xlane.xlu0 %5388 }
0x2368   : > { %v5390_v37 = vmul.f32 0.03125, %v5389_v35  ;;  %v5612_v35 = vld [vmem:[%s8077_s7 + $0x8] sm:$0xff] }
0x236a   : > { %v5391_v46 = vsub.f32 %v5386_v47, %v5390_v37  ;;  %v5613_v37 = vld [vmem:[%s8077_s7 + $0x10] sm:$0xff] }
0x236c   : > { %v5392_v48 = vmul.f32 %v5391_v46, %v5391_v46 }
0x236e   : > { %v5393_v39 = vsel %vm493_vm1, %v5392_v48, 0.0  ;;  %v5614_v48 = vld [vmem:[%s8077_s7 + $0x18] sm:$0xff] }
0x236f   : > { %5394 = vadd.xlane.f32.xlu1 %v5393_v39  ;;  %v6756_v39 = vpack.c.bf16 %v5614_v48, %v5613_v37 }
0x2380   : > { %5597 = vrot.lane.b32.xlu1 %v7571_v29, %s6993_s18  ;;  %v6738_v29 = vpack.c.bf16 %v5994_v55, %v5993_v54  ;;  %v5618_v54 = vld [vmem:[%s8077_s7 + $0x38] sm:$0xff] }
0x2381   : > { %v6762_v55 = vpack.c.bf16 %v5618_v54, %v5617_v53 }
0x2382   : > { %6739 = vmatpush3.bf16.msra.mxu0 %v6738_v29  ;;  %v5619_v29 = vld [vmem:[%s8077_s7 + $0x40] sm:$0xff] }
0x2383   : > { %6752 = vmatprep.subr.bf16.mxu0 %v6985_v3 }
0x23fc   : > { %v5395_v31 = vpop.xlane.xlu1 %5394 }
0x23fd   : > { %v5396_v58 = vmul.f32 0.03125, %v5395_v31  ;;  %v5620_v31 = vld [vmem:[%s8077_s7 + $0x48] sm:$0xff] }
0x23ff   : > { %v5397_v59 = vadd.f32 1e-07, %v5396_v58  ;;  %v6765_v58 = vpack.c.bf16 %v5620_v31, %v5619_v29 }
0x2401   : > { %6910 = vrsqrt.f32 %v5397_v59  ;;  %v5621_v59 = vld [vmem:[%s8077_s7 + $0x50] sm:$0xff] }
0x240b   : > { %v6911_v56 = vpop.eup %6910 }
0x240c   : > { %v5399_v8 = vmul.f32 %v6911_v56, %v5391_v46  ;;  %v6753_v46 = vpack.c.bf16 %v5612_v35, %v5611_v45 }
0x240e   : > { %v5404_v11 = vmul.f32 %v5403_v60, %v5399_v8  ;;  %v5622_v60 = vld [vmem:[%s8077_s7 + $0x58] sm:$0xff]  ;;  %v5623_v8 = vld [vmem:[%s8077_s7 + $0x60] sm:$0xff] }
0x240f   : > { %v6768_v56 = vpack.c.bf16 %v5622_v60, %v5621_v59 }
0x2410   : > { %v5409_v61 = vadd.f32 %v5408_v57, %v5404_v11  ;;  %v5624_v57 = vld [vmem:[%s8077_s7 + $0x68] sm:$0xff] }
0x2411   : > { %v6771_v11 = vpack.c.bf16 %v5624_v57, %v5623_v8 }
0x2412   : > { %6600 = vmatmul.mubr.msk.f32.vlgmr.msra.gmra.mrb[56].mxu0 %vm493_vm1, %v5409_v61 }
0x2413   : > { %6653 = vmatprep.mubr.msk.f32.mxu0 %vm6986_vm0, %v6987_v6  ;;  %v5999_v6 = vld [vmem:[%s8075_s5 + $0xe0] sm:$0xff]  ;;  %6754 = vmatpush3.bf16.msra.mxu0 %v6753_v46 }
0x2414   : > { %v6747_v13 = vpack.c.bf16 %v6000_v7, %v5999_v6  ;;  %6755 = vmatprep.subr.bf16.mxu0 %v6985_v3  ;;  %v5719_v6 = vld [vmem:[%s458_s26] sm:$0xff]  ;;  %v5590_v7 = vrot.slane %v7774_v52, %v7366_v1  ;;  %s6995_s26 = smov [#allocation2]  }
0x2416   : > { %6748 = vmatpush3.bf16.msra.mxu1 %v6747_v13 }
0x2417   : > { %6749 = vmatprep.subr.bf16.mxu1 %v6985_v3  ;;  %6757 = vmatpush3.bf16.msra.mxu0 %v6756_v39 }
0x2418   : > { %6758 = vmatprep.subr.bf16.mxu0 %v6985_v3 }
0x241a   : > { %6751 = vmatpush3.bf16.msra.mxu1 %v6750_v16 }
0x24e5   : > { %v5483_v20 = vpop.f32.mrb[56].mxu0 }
0x24e6   : > { %v5484_v17 = vadd.f32 %v5483_v20, %v5413_v19  ;;  %v6601_v12 = vpop.f32.mrb[57].mxu0  ;;  %v5598_v19 = vpop.permute.xlu1 %5597 }
0x24e8   : > { %v5488_v25 = vmul.f32 0.044715, %v5484_v17  ;;  %v5487_v28 = vmul.f32 0.5, %v5484_v17 }
0x24ea   : > { %v5489_v26 = vmul.f32 %v5488_v25, %v5484_v17 }
0x24ec   : > { %v5490_v21 = vmul.f32 %v5489_v26, %v5484_v17  ;;  %v5706_v26 = vand.u32 127, %v489_v9 }
0x24ee   : > { %v5491_v27 = vadd.f32 %v5490_v21, %v5484_v17  ;;  %v5607_v17 = vsel %vm493_vm1, %v7375_v18, %v5598_v19  ;;  %vm5707_vm5 = vcmp.lt.s32.totalorder %v5706_v26, 15 }
0x24f0   : > { %v5492_v22 = vmul.f32 0.7978846, %v5491_v27 }
0x24f2   : > { %6912 = vtanh.f32 %v5492_v22 }
0x24fc   : > { %v6913_v23 = vpop.eup %6912 }
0x24fd   : > { %v5494_v32 = vadd.f32 1.0, %v6913_v23 }
0x24ff   : > { %v5495_v33 = vmul.f32 %v5494_v32, %v5487_v28 }
0x2501   : > { %6619 = vmatmul.mubr.msk.f32.vlgmr.msra.gmra.mrb[60].mxu1 %vm1656_vm3, %v5495_v33 }
0x25d4   : > { %v5569_v10 = vpop.f32.mrb[60].mxu1 }
0x25d5   : > { %v5570_v30 = vadd.f32 %v5569_v10, %v5499_v34  ;;  %v6620_v36 = vpop.f32.mrb[61].mxu1 }
0x25d7   : > { %v5573_v38 = vadd.f32 %v5570_v30, %v5409_v61  ;;  %v5625_v61 = vld [vmem:[%s8077_s7 + $0x70] sm:$0xff] }
0x25d8   : > { %v6774_v2 = vpack.c.bf16 %v5626_v24, %v5625_v61 }
0x25d9   : > { %v5574_v40 = vsel %vm493_vm1, %v5573_v38, 0.0 }
0x25da   : > { %5575 = vadd.xlane.f32.xlu0 %v5574_v40  ;;  %v5728_v40 = vld [vmem:[%s462_s14] sm:$0xff] }
0x2667   : > { %v5576_v41 = vpop.xlane.xlu0 %5575 }
0x2668   : > { %v5577_v42 = vmul.f32 0.03125, %v5576_v41 }
0x266a   : > { %v5578_v43 = vsub.f32 %v5573_v38, %v5577_v42 }
0x266c   : > { %v5579_v47 = vmul.f32 %v5578_v43, %v5578_v43 }
0x266e   : > { %v5580_v44 = vsel %vm493_vm1, %v5579_v47, 0.0 }
0x266f   : > { %5581 = vadd.xlane.f32.xlu0 %v5580_v44 }
0x2685   : > { %5600 = vrot.lane.b32.xlu0 %v7765_v51, %s8115_s28  ;;  %v5615_v51 = vld [vmem:[%s8077_s7 + $0x20] sm:$0xff]  ;;  %s8014_s28 = sshll.u32 %s440_s0, 3 }
0x2686   : > { %v6759_v50 = vpack.c.bf16 %v5616_v49, %v5615_v51 }
0x2688   : > { %6760 = vmatpush3.bf16.msra.mxu0 %v6759_v50 }
0x2689   : > { %6761 = vmatprep.subr.bf16.mxu0 %v6985_v3  ;;  %5721 = vperm.xlu0 %6827, %v5719_v6  }
0x268c   : > { %6763 = vmatpush3.bf16.msra.mxu0 %v6762_v55 }
0x268d   : > { %6764 = vmatprep.subr.bf16.mxu0 %v6985_v3 }
0x2690   : > { %6766 = vmatpush3.bf16.msra.mxu0 %v6765_v58 }
0x2691   : > { %6767 = vmatprep.subr.bf16.mxu0 %v6985_v3 }
0x2694   : > { %6769 = vmatpush3.bf16.msra.mxu0 %v6768_v56 }
0x2695   : > { %6770 = vmatprep.subr.bf16.mxu0 %v6985_v3 }
0x2698   : > { %6772 = vmatpush3.bf16.msra.mxu0 %v6771_v11 }
0x2699   : > { %6773 = vmatprep.subr.bf16.mxu0 %v6985_v3 }
0x269c   : > { %6775 = vmatpush3.bf16.msra.mxu0 %v6774_v2 }
0x26fc   : > { %v5582_v62 = vpop.xlane.xlu0 %5581 }
0x26fd   : > { %v5583_v4 = vmul.f32 0.03125, %v5582_v62 }
0x26ff   : > { %v5584_v63 = vadd.f32 1e-07, %v5583_v4 }
0x2700   : > { %v5601_v20 = vpop.permute.xlu0 %5600 }
0x2701   : > { %6914 = vrsqrt.f32 %v5584_v63  ;;  %v5608_v12 = vsel %vm1656_vm3, %v5607_v17, %v5601_v20 }
0x2708   : > { %v5722_v27 = vpop.permute.xlu0 %5721 }
0x2709   : > { %vm5723_vm6 = vcmp.eq.s32.totalorder %v5706_v26, %v5722_v27 }
0x270b   : > { %v6915_v13 = vpop.eup %6914 }
0x270c   : > { %v5586_v3 = vmul.f32 %v6915_v13, %v5578_v43 }
0x270e   : > { %v5591_v15 = vmul.f32 %v5590_v7, %v5586_v3 }
0x2710   : > { %v5596_v16 = vadd.f32 %v5595_v14, %v5591_v15 }
0x2712   : > { %5604 = vrot.lane.b32.xlu1 %v5596_v16, %s8114_s17  ;;  %s442_s17 = scalar_lea.vmem [#allocation2], %s8014_s28  ;;  %s6925_s28 = sshll.u32 %s6995_s26, 4  ;;  %s6926_s28 = int_to_ptr.vmem [resolvable:$false] %s6925_s28 }
0x2713   : > { %s5761_s18 = sshll.u32 %s442_s17, 4  ;;  %s6927_s1 = scalar_lea.vmem %s6926_s28, 256  ;;  %s5762_s18 = int_to_ptr.vmem [resolvable:$true] %s5761_s18 }
0x2714   : > { %s6921_s15 = scalar_lea.vmem %s5762_s18, 128  ;;  %p6928_p0 = scmp.lt.s32.totalorder %s5762_s18, %s6926_s28 }
0x2715   : > { %p6922_p11 = scmp.ne.s32.totalorder %s5762_s18, %s6921_s15  ;;  %p6929_p1 = scmp.lt.s32.totalorder %s6927_s1, %s6921_s15 }
0x2717   : > { %p6923_p12 = pnand %p6922_p11, %p7099_p5  ;;  %p6930_p2 = por %p6929_p1, %p6928_p0 }
0x2719   : > { %p6924_p13 = pneg %p6923_p12 }
0x271b   : > { %p6931_p3 = pnand %p6930_p2, %p6924_p13 }
0x2784   : > { %v5605_v25 = vpop.permute.xlu1 %5604 }
0x2785   : > { %v5610_v1 = vsel %vm5609_vm4, %v5608_v12, %v5605_v25 }
0x2786   : > { %6654 = vmatmul.mubr.f32.vlgmr.msra.gmra.mrb[58].mxu0 %v5610_v1 }
0x2859   : > { %v5700_v52 = vpop.f32.mrb[58].mxu0 }
0x285a   : > { %v5701_v21 = vadd.f32 %v6023_v5, %v5700_v52  ;;  %v6655_v18 = vpop.f32.mrb[59].mxu0 }
0x285c   : > { %v5708_v22 = vsel %vm5707_vm5, %v5701_v21, -1e+30  ;;  %5704 = vst [vmem:[%s442_s17] sm:$0xff] %v5701_v21  ;;  %v5724_v9 = vsel %vm5723_vm6, %v5701_v21, 0.0 }
0x285d   : > { %5709 = vmax.xlane.f32.xlu1 %v5708_v22 }
0x2861   : > { %5725 = vadd.xlane.f32.xlu1 %v5724_v9 }
0x28ea   : > { %v5710_v23 = vpop.xlane.xlu1 %5709 }
0x28eb   : > { %v5711_v28 = vsub.f32 %v5708_v22, %v5710_v23 }
0x28ed   : > { %v5712_v32 = vmul.f32 1.442695, %v5711_v28 }
0x28ee   : > { %v5726_v38 = vpop.xlane.xlu1 %5725 }
0x28ef   : > { %6916 = vpow2.f32 %v5712_v32 }
0x28f9   : > { %v6917_v33 = vpop.eup %6916 }
0x28fa   : > { %5714 = vadd.xlane.f32.xlu0 %v6917_v33 }
0x2987   : > { %v5715_v34 = vpop.xlane.xlu0 %5714 }
0x2988   : > { %6918 = vlog2.f32 %v5715_v34 }
0x2992   : > { %v6919_v10 = vpop.eup %6918 }
0x2993   : > { %v5717_v30 = vmul.f32 0.6931472, %v6919_v10 }
0x2995   : > { %v5718_v36 = vadd.f32 %v5717_v30, %v5710_v23 }
0x2997   : > { %v5727_v41 = vsub.f32 %v5718_v36, %v5726_v38 }
0x2999   : > { %v5729_v42 = vmul.f32 %v5728_v40, %v5727_v41 }
0x299b   : > { %v5731_v43 = vsel %vm5730_vm7, %v5729_v42, 0.0 }
0x299c   : > { %5732 = vadd.xlane.f32.xlu1 %v5731_v43 }
0x299d   : > { %6934 = shalt.err (!%p6931_p3)
}
0x299e   : > { %s6935_s25 = scalar_lea.hbm %s8028_s20, 128  ;;  %s6939_s17 = scalar_lea.hbm %s8081_s11, 256 }
0x299f   : > { %p6936_p4 = scmp.ne.s32.totalorder %s8028_s20, %s6935_s25  ;;  %p6940_p9 = scmp.lt.u32.totalorder %s8028_s20, %s8081_s11 }
0x29a0   : > { %p6941_p10 = scmp.lt.u32.totalorder %s6939_s17, %s6935_s25  ;;  %p6943_p12 = scmp.lt.u32.totalorder %s6935_s25, %s8028_s20 }
0x29a1   : > { %p6937_p7 = pnand %p6936_p4, %p7099_p5 }
0x29a2   : > { %p6942_p11 = por %p6941_p10, %p6940_p9 }
0x29a3   : > { %p6938_p8 = pneg %p6937_p7 }
0x29a4   : > { %p6944_p13 = por %p6943_p12, %p6942_p11 }
0x29a6   : > { %p6945_p0 = pnand %p6944_p13, %p6938_p8 }
0x29a8   : > { %6948 = shalt.err (!%p6945_p0)
}
0x29a9   : > { %6778 = dma.vmem_to_hbm [thread:$0]  (%p7099_p5), %s5762_s18, 128, %s8028_s20, %s5745_s30   ;;  %vm5742_vm8 = vcmask 0  }
0x29aa   : > { %s465_s19 = scalar_lea.vmem %s8082_s12, %s7129_s29 }
0x2a29   : > { %v5733_v47 = vpop.xlane.xlu1 %5732 }
0x2a2a   : > { %v5734_v44 = vrot.slane %v5733_v47, 4 }
0x2a2c   : > { %v5735_v45 = vadd.f32 %v5734_v44, %v5733_v47 }
0x2a2e   : > { %v5736_v35 = vrot.slane %v5735_v45, 2 }
0x2a30   : > { %v5737_v37 = vadd.f32 %v5736_v35, %v5735_v45 }
0x2a32   : > { %v5738_v46 = vrot.slane %v5737_v37, 1 }
0x2a34   : > { %v5739_v48 = vadd.f32 %v5738_v46, %v5737_v37 }
0x2a36   : > { %6776 = vpush %v5739_v48 }
0x2a67   : > { %s6777_s24 = spop %6776 }
0x2a68   : > { %v5741_v39 = vstv %s6777_s24 }
0x2a69   : > { %5743 = vst.msk [vmem:[%s465_s19] sm:$0x1] %vm5742_vm8, %v5741_v39 }
0x2a6a PF: > { %s8116_s13 = sld [smem:[#allocation7_spill]]  ;;  %s8117_s15 = sld [smem:[#allocation5_spill]] }
0x2a70   : > { %p6784_p5 = scmp.ge.s32.totalorder %s8116_s13, 2  ;;  %s5776_s20 = sand.u32 1, %s8117_s15  }
0x2a71   : > { %s5777_s30 = scalar_lea.sflag [#allocation3], %s5776_s20 }
0x2a72   : > { %p6781_p1 = pnand %p6784_p5, %p7103_p6 }
0x2a74   : > { %6966 = dma.done.wait (!%p6781_p1), %s5777_s30, 128  }
0x2a75   : > { %6968 = vsyncadd (!%p6781_p1), %s5777_s30, 4294967168  ;;  %s8119_s24 = sld [smem:[#allocation8_spill]]  ;;  %s8120_s26 = sld [smem:[#allocation6_spill]] }
0x2a76   : > { %s8121_s23 = sld [smem:[#allocation9_spill]]  ;;  %s8122_s21 = smov %s6975_s22 }
0x2a7b   : > { %p23_p2 = scmp.ge.s32.totalorder %s8119_s24, 4   ;;  %s8123_s22 = smov %s8120_s26 }
0x2a7d   :  { %25 = sbr.rel (!%p23_p2) target bundleno = 6 (0x6), region = 135 }
0x2a84   :  { %5788 = vsyncpa [#allocation3], 1 }
0x2a85   :  { %5790 = vsyncpa [#allocation3 + $0x1], 1 }

</bundles_post_ra>
